<compile_context>
chip_gen: v5e
topology: v5e:2x2
jax: 0.10.0
libtpu: 0.0.40
codegen_flags: <defaults>
</compile_context>

<pallas_src>
import functools

import jax
import jax.numpy as jnp
import numpy as np
from jax import lax
from jax.experimental import pallas as pl
from jax.experimental.pallas import tpu as pltpu


# --------------------------------------------------------------------------
# Pallas kernel: whole sequence in one invocation (no grid).
# --------------------------------------------------------------------------
def _lstm_kernel(xp_ref, w0_ref, b0_ref, w1_ref, b1_ref, wfc_ref, bfc_ref,
                 out_ref, *, hp, n_steps, batch):
    # Hoisted bias broadcasts only (weights are read at the dot sites so the
    # two (128, 512) values are never live at the same time).
    b0 = jnp.broadcast_to(b0_ref[...], (batch, 4 * hp))
    b1 = jnp.broadcast_to(b1_ref[...], (batch, 4 * hp))

    h3 = 3 * hp

    def gates_to_state(gates, c_prev):
        # Packed gate order: i, f, o, g  ->  one wide sigmoid + one tanh.
        sg = jax.nn.sigmoid(gates[:, :h3])
        i_g = sg[:, 0 * hp:1 * hp]
        f_g = sg[:, 1 * hp:2 * hp]
        o_g = sg[:, 2 * hp:3 * hp]
        g_g = jnp.tanh(gates[:, h3:])
        c_new = f_g * c_prev + i_g * g_g
        h_new = o_g * jnp.tanh(c_new)
        return h_new, c_new

    def dot0(a):  # layer-0 gate preactivations (bf16 operands, f32 accum)
        return jnp.dot(a.astype(jnp.bfloat16), w0_ref[...],
                       preferred_element_type=jnp.float32) + b0

    def dot1(a):  # layer-1 gate preactivations (bf16 operands, f32 accum)
        return jnp.dot(a.astype(jnp.bfloat16), w1_ref[...],
                       preferred_element_type=jnp.float32) + b1

    zeros = jnp.zeros((batch, hp), jnp.float32)

    # ---- prologue: layer-0, step 0 (h0 = c0 = 0, so a0 = x_packed[0]) ----
    h0, c0 = gates_to_state(dot0(xp_ref[0]), zeros)
    h1, c1 = zeros, zeros

    # ---- skewed steady state: layer-1(t) and layer-0(t+1) both depend only
    #      on h0(t), so the two matmuls below are independent & adjacent
    #      (dual-MXU overlap on v6e/v7x). ----
    def step(t, carry):
        h0, c0, h1, c1 = carry
        a1 = h0 + h1                      # layer-1 input, step t
        a0 = h0 + xp_ref[t + 1]           # layer-0 input, step t+1
        g1 = dot1(a1)
        g0 = dot0(a0)
        h1n, c1n = gates_to_state(g1, c1)
        h0n, c0n = gates_to_state(g0, c0)
        return (h0n, c0n, h1n, c1n)

    h0, c0, h1, c1 = lax.fori_loop(0, n_steps - 1, step,
                                   (h0, c0, h1, c1), unroll=True)

    # ---- epilogue: layer-1, last step ----
    h1, _ = gates_to_state(dot1(h0 + h1), c1)

    # Final FC (kept f32; lane-dense padded output slab).
    out_ref[...] = (jnp.dot(h1, wfc_ref[...],
                            preferred_element_type=jnp.float32)
                    + bfc_ref[...]).astype(out_ref.dtype)


# --------------------------------------------------------------------------
# Host-side parameter packing (fused, lane-padded weights; bf16 matmul weights)
# --------------------------------------------------------------------------
# PyTorch gate row order is (i, f, g, o); packed column slot order is
# (i, f, o, g) so the kernel applies a single sigmoid over the first 3 slots.
_GATE_SLOT = (0, 1, 3, 2)   # src gate index -> packed slot index


def pack_kernel_params(p, *, H, I, hp, off):
    """Pack PyTorch-layout LSTM params into fused, lane-aligned kernel weights.

    Layer 0 fused weight rows: [0:H) -> W_hh0,   [H:H+I)     -> W_ih0
    Layer 1 fused weight rows: [0:H) -> W_ih1,   [off:off+H) -> W_hh1
    Layer 1 gate OUTPUT columns sit at lane offset `off` inside each gate
    slot, so h1/c1 live at lanes [off:off+H) with no in-kernel shuffles.
    """
    assert H + I <= hp and off >= H and off + H <= hp

    def np32(a):
        return np.asarray(a, np.float32)

    w_ih0, w_hh0 = np32(p["w_ih_l0"]), np32(p["w_hh_l0"])   # (4H,I), (4H,H)
    w_ih1, w_hh1 = np32(p["w_ih_l1"]), np32(p["w_hh_l1"])   # (4H,H), (4H,H)
    bsum0 = np32(p["b_ih_l0"]) + np32(p["b_hh_l0"])
    bsum1 = np32(p["b_ih_l1"]) + np32(p["b_hh_l1"])

    w0 = np.zeros((hp, 4 * hp), np.float32)
    b0 = np.zeros((1, 4 * hp), np.float32)
    w1 = np.zeros((hp, 4 * hp), np.float32)
    b1 = np.zeros((1, 4 * hp), np.float32)
    for src_g, dst in enumerate(_GATE_SLOT):
        rows = slice(src_g * H, (src_g + 1) * H)
        # layer 0: outputs at lanes [0:H) of packed slot `dst`
        cols0 = slice(dst * hp, dst * hp + H)
        w0[0:H,     cols0] = w_hh0[rows, :].T
        w0[H:H + I, cols0] = w_ih0[rows, :].T
        b0[0,       cols0] = bsum0[rows]
        # layer 1: outputs at lanes [off:off+H) of packed slot `dst`
        cols1 = slice(dst * hp + off, dst * hp + off + H)
        w1[0:H,         cols1] = w_ih1[rows, :].T
        w1[off:off + H, cols1] = w_hh1[rows, :].T
        b1[0,           cols1] = bsum1[rows]

    # Lane-dense padded FC: (hp, hp) weight, (1, hp) bias; only [:, :I] is real.
    wfc = np.zeros((hp, hp), np.float32)
    wfc[off:off + H, :I] = np32(p["fc_w"]).T
    bfc = np.zeros((1, hp), np.float32)
    bfc[0, :I] = np32(p["fc_b"])

    return (jnp.asarray(w0, jnp.bfloat16),   # bf16 matmul operands
            jnp.asarray(b0, jnp.float32),
            jnp.asarray(w1, jnp.bfloat16),
            jnp.asarray(b1, jnp.float32),
            jnp.asarray(wfc, jnp.float32),
            jnp.asarray(bfc, jnp.float32))


# --------------------------------------------------------------------------
# Wrapper: input packing + pallas_call, all inside one jit.
# --------------------------------------------------------------------------
@functools.partial(jax.jit, static_argnames=("hidden_size", "input_size", "hp"))
def golf_lstm_forward(x, kparams, *, hidden_size, input_size, hp):
    B, T, I = x.shape
    # time-major, place x_t at lanes [H : H+I) of the layer-0 hidden vector
    x_tm = jnp.transpose(x, (1, 0, 2)).astype(jnp.float32)           # (T,B,I)
    xp = jnp.pad(x_tm, ((0, 0), (0, 0),
                        (hidden_size, hp - hidden_size - input_size)))

    kernel = functools.partial(_lstm_kernel, hp=hp, n_steps=T, batch=B)
    vspec = pl.BlockSpec(memory_space=pltpu.MemorySpace.VMEM)

    out_pad = pl.pallas_call(
        kernel,
        out_shape=jax.ShapeDtypeStruct((B, hp), jnp.float32),
        in_specs=[vspec] * 7,
        out_specs=vspec,
    )(xp, *kparams)
    return out_pad[:, :input_size]


# --------------------------------------------------------------------------
# Deterministic parameter init (PyTorch-style uniform(-1/sqrt(H), 1/sqrt(H)))
# --------------------------------------------------------------------------
def init_params(key, input_size=2, hidden_size=50):
    k = 1.0 / np.sqrt(hidden_size)
    keys = jax.random.split(key, 10)

    def u(kk, shape):
        return jax.random.uniform(kk, shape, jnp.float32, -k, k)

    H, I = hidden_size, input_size
    return {
        "w_ih_l0": u(keys[0], (4 * H, I)),
        "w_hh_l0": u(keys[1], (4 * H, H)),
        "b_ih_l0": u(keys[2], (4 * H,)),
        "b_hh_l0": u(keys[3], (4 * H,)),
        "w_ih_l1": u(keys[4], (4 * H, H)),
        "w_hh_l1": u(keys[5], (4 * H, H)),
        "b_ih_l1": u(keys[6], (4 * H,)),
        "b_hh_l1": u(keys[7], (4 * H,)),
        "fc_w":    u(keys[8], (I, H)),
        "fc_b":    u(keys[9], (I,)),
    }


# --------------------------------------------------------------------------
# Pure-JAX reference (mirrors torch.nn.LSTM + Linear semantics exactly, f32)
# --------------------------------------------------------------------------
def golf_lstm_reference(x, p, hidden_size):
    B, T, I = x.shape
    H = hidden_size
    h = [jnp.zeros((B, H), jnp.float32), jnp.zeros((B, H), jnp.float32)]
    c = [jnp.zeros((B, H), jnp.float32), jnp.zeros((B, H), jnp.float32)]

    def cell(inp, h_, c_, w_ih, w_hh, b_ih, b_hh):
        gates = inp @ w_ih.T + h_ @ w_hh.T + b_ih + b_hh
        i, f, g, o = jnp.split(gates, 4, axis=-1)
        i = jax.nn.sigmoid(i)
        f = jax.nn.sigmoid(f)
        g = jnp.tanh(g)
        o = jax.nn.sigmoid(o)
        c_new = f * c_ + i * g
        h_new = o * jnp.tanh(c_new)
        return h_new, c_new

    for t in range(T):
        x_t = x[:, t, :]
        h[0], c[0] = cell(x_t, h[0], c[0],
                          p["w_ih_l0"], p["w_hh_l0"], p["b_ih_l0"], p["b_hh_l0"])
        h[1], c[1] = cell(h[0], h[1], c[1],
                          p["w_ih_l1"], p["w_hh_l1"], p["b_ih_l1"], p["b_hh_l1"])
    return h[1] @ p["fc_w"].T + p["fc_b"]


if __name__ == "__main__":
    B, T, I, H = 2, 8, 2, 50
    HP = 128   # padded hidden size (one lane-aligned 128-wide slot per gate)
    OFF = 64   # lane offset where layer-1 state lives (OFF >= H, OFF + H <= HP)

    x = jax.random.normal(jax.random.PRNGKey(0), (B, T, I), jnp.float32)
    params = init_params(jax.random.PRNGKey(42), input_size=I, hidden_size=H)
    kparams = pack_kernel_params(params, H=H, I=I, hp=HP, off=OFF)

    out = golf_lstm_forward(x, kparams, hidden_size=H, input_size=I, hp=HP)
    out = jax.block_until_ready(out)

    ref = golf_lstm_reference(x, params, hidden_size=H)
    # bf16 matmul operands (per perf review) introduce ~1e-3-level quantization
    # noise over the 8-step recurrence, so tolerance is relaxed from 1e-4.
    np.testing.assert_allclose(np.asarray(out), np.asarray(ref),
                               rtol=2e-2, atol=2e-2)
    print("KERNEL_OK")
</pallas_src>

<mosaic_0001>
module attributes {stable_mosaic.version = 11 : i64} {
  func.func @_lstm_kernel(%arg0: memref<8x2x128xf32, #tpu.memory_space<vmem>>, %arg1: memref<128x512xbf16, #tpu.memory_space<vmem>>, %arg2: memref<1x512xf32, #tpu.memory_space<vmem>>, %arg3: memref<128x512xbf16, #tpu.memory_space<vmem>>, %arg4: memref<1x512xf32, #tpu.memory_space<vmem>>, %arg5: memref<128x128xf32, #tpu.memory_space<vmem>>, %arg6: memref<1x128xf32, #tpu.memory_space<vmem>>, %arg7: memref<2x128xf32, #tpu.memory_space<vmem>>) attributes {dimension_semantics = [], scalar_prefetch = 0 : i64, scratch_operands = 0 : i64, tpu.core_type = #tpu.core_type<tc>} {
    %c0 = arith.constant 0 : index
    %c0_0 = arith.constant 0 : index
    %0 = vector.load %arg2[%c0, %c0_0] : memref<1x512xf32, #tpu.memory_space<vmem>>, vector<1x512xf32>
    %1 = vector.shape_cast %0 : vector<1x512xf32> to vector<1x512xf32>
    %2 = vector.broadcast %1 : vector<1x512xf32> to vector<2x512xf32>
    %c0_1 = arith.constant 0 : index
    %c0_2 = arith.constant 0 : index
    %3 = vector.load %arg4[%c0_1, %c0_2] : memref<1x512xf32, #tpu.memory_space<vmem>>, vector<1x512xf32>
    %4 = vector.shape_cast %3 : vector<1x512xf32> to vector<1x512xf32>
    %5 = vector.broadcast %4 : vector<1x512xf32> to vector<2x512xf32>
    %cst = arith.constant 0.000000e+00 : f32
    %6 = vector.broadcast %cst : f32 to vector<2x128xf32>
    %c0_3 = arith.constant 0 : index
    %c0_4 = arith.constant 0 : index
    %c0_5 = arith.constant 0 : index
    %7 = vector.load %arg0[%c0_3, %c0_4, %c0_5] : memref<8x2x128xf32, #tpu.memory_space<vmem>>, vector<1x2x128xf32>
    %8 = vector.shape_cast %7 : vector<1x2x128xf32> to vector<2x128xf32>
    %9 = arith.truncf %8 : vector<2x128xf32> to vector<2x128xbf16>
    %c0_6 = arith.constant 0 : index
    %c0_7 = arith.constant 0 : index
    %10 = vector.load %arg1[%c0_6, %c0_7] : memref<128x512xbf16, #tpu.memory_space<vmem>>, vector<128x512xbf16>
    %cst_8 = arith.constant dense<0.000000e+00> : vector<2x512xf32>
    %11 = tpu.matmul %9, %10, %cst_8 {dimension_numbers = #tpu.dot_dimension_numbers<[1], [0], [0], [1], [0, 0, 1, 1], [], []>} : vector<2x128xbf16>, vector<128x512xbf16>, vector<2x512xf32> -> vector<2x512xf32>
    %12 = arith.addf %11, %2 : vector<2x512xf32>
    %13 = vector.extract_strided_slice %12 {offsets = [0, 0], sizes = [2, 384], strides = [1, 1]} : vector<2x512xf32> to vector<2x384xf32>
    %14 = arith.negf %13 : vector<2x384xf32>
    %15 = math.exp %14 : vector<2x384xf32>
    %cst_9 = arith.constant 1.000000e+00 : f32
    %16 = vector.broadcast %cst_9 : f32 to vector<2x384xf32>
    %17 = arith.addf %16, %15 : vector<2x384xf32>
    %18 = arith.divf %16, %17 : vector<2x384xf32>
    %19 = vector.extract_strided_slice %18 {offsets = [0, 0], sizes = [2, 128], strides = [1, 1]} : vector<2x384xf32> to vector<2x128xf32>
    %20 = vector.extract_strided_slice %18 {offsets = [0, 128], sizes = [2, 128], strides = [1, 1]} : vector<2x384xf32> to vector<2x128xf32>
    %21 = vector.extract_strided_slice %18 {offsets = [0, 256], sizes = [2, 128], strides = [1, 1]} : vector<2x384xf32> to vector<2x128xf32>
    %22 = vector.extract_strided_slice %12 {offsets = [0, 384], sizes = [2, 128], strides = [1, 1]} : vector<2x512xf32> to vector<2x128xf32>
    %23 = math.tanh %22 : vector<2x128xf32>
    %24 = arith.mulf %20, %6 : vector<2x128xf32>
    %25 = arith.mulf %19, %23 : vector<2x128xf32>
    %26 = arith.addf %24, %25 : vector<2x128xf32>
    %27 = math.tanh %26 : vector<2x128xf32>
    %28 = arith.mulf %21, %27 : vector<2x128xf32>
    %c0_i32 = arith.constant 0 : i32
    %29 = arith.addf %28, %6 : vector<2x128xf32>
    %c1_i32 = arith.constant 1 : i32
    %30 = arith.addi %c0_i32, %c1_i32 : i32
    %31 = arith.index_cast %30 : i32 to index
    %c0_10 = arith.constant 0 : index
    %c0_11 = arith.constant 0 : index
    %32 = vector.load %arg0[%31, %c0_10, %c0_11] : memref<8x2x128xf32, #tpu.memory_space<vmem>>, vector<1x2x128xf32>
    %33 = vector.shape_cast %32 : vector<1x2x128xf32> to vector<2x128xf32>
    %34 = arith.addf %28, %33 : vector<2x128xf32>
    %35 = arith.truncf %29 : vector<2x128xf32> to vector<2x128xbf16>
    %c0_12 = arith.constant 0 : index
    %c0_13 = arith.constant 0 : index
    %36 = vector.load %arg3[%c0_12, %c0_13] : memref<128x512xbf16, #tpu.memory_space<vmem>>, vector<128x512xbf16>
    %cst_14 = arith.constant dense<0.000000e+00> : vector<2x512xf32>
    %37 = tpu.matmul %35, %36, %cst_14 {dimension_numbers = #tpu.dot_dimension_numbers<[1], [0], [0], [1], [0, 0, 1, 1], [], []>} : vector<2x128xbf16>, vector<128x512xbf16>, vector<2x512xf32> -> vector<2x512xf32>
    %38 = arith.addf %37, %5 : vector<2x512xf32>
    %39 = arith.truncf %34 : vector<2x128xf32> to vector<2x128xbf16>
    %c0_15 = arith.constant 0 : index
    %c0_16 = arith.constant 0 : index
    %40 = vector.load %arg1[%c0_15, %c0_16] : memref<128x512xbf16, #tpu.memory_space<vmem>>, vector<128x512xbf16>
    %cst_17 = arith.constant dense<0.000000e+00> : vector<2x512xf32>
    %41 = tpu.matmul %39, %40, %cst_17 {dimension_numbers = #tpu.dot_dimension_numbers<[1], [0], [0], [1], [0, 0, 1, 1], [], []>} : vector<2x128xbf16>, vector<128x512xbf16>, vector<2x512xf32> -> vector<2x512xf32>
    %42 = arith.addf %41, %2 : vector<2x512xf32>
    %43 = vector.extract_strided_slice %38 {offsets = [0, 0], sizes = [2, 384], strides = [1, 1]} : vector<2x512xf32> to vector<2x384xf32>
    %44 = arith.negf %43 : vector<2x384xf32>
    %45 = math.exp %44 : vector<2x384xf32>
    %cst_18 = arith.constant 1.000000e+00 : f32
    %46 = vector.broadcast %cst_18 : f32 to vector<2x384xf32>
    %47 = arith.addf %46, %45 : vector<2x384xf32>
    %48 = arith.divf %46, %47 : vector<2x384xf32>
    %49 = vector.extract_strided_slice %48 {offsets = [0, 0], sizes = [2, 128], strides = [1, 1]} : vector<2x384xf32> to vector<2x128xf32>
    %50 = vector.extract_strided_slice %48 {offsets = [0, 128], sizes = [2, 128], strides = [1, 1]} : vector<2x384xf32> to vector<2x128xf32>
    %51 = vector.extract_strided_slice %48 {offsets = [0, 256], sizes = [2, 128], strides = [1, 1]} : vector<2x384xf32> to vector<2x128xf32>
    %52 = vector.extract_strided_slice %38 {offsets = [0, 384], sizes = [2, 128], strides = [1, 1]} : vector<2x512xf32> to vector<2x128xf32>
    %53 = math.tanh %52 : vector<2x128xf32>
    %54 = arith.mulf %50, %6 : vector<2x128xf32>
    %55 = arith.mulf %49, %53 : vector<2x128xf32>
    %56 = arith.addf %54, %55 : vector<2x128xf32>
    %57 = math.tanh %56 : vector<2x128xf32>
    %58 = arith.mulf %51, %57 : vector<2x128xf32>
    %59 = vector.extract_strided_slice %42 {offsets = [0, 0], sizes = [2, 384], strides = [1, 1]} : vector<2x512xf32> to vector<2x384xf32>
    %60 = arith.negf %59 : vector<2x384xf32>
    %61 = math.exp %60 : vector<2x384xf32>
    %cst_19 = arith.constant 1.000000e+00 : f32
    %62 = vector.broadcast %cst_19 : f32 to vector<2x384xf32>
    %63 = arith.addf %62, %61 : vector<2x384xf32>
    %64 = arith.divf %62, %63 : vector<2x384xf32>
    %65 = vector.extract_strided_slice %64 {offsets = [0, 0], sizes = [2, 128], strides = [1, 1]} : vector<2x384xf32> to vector<2x128xf32>
    %66 = vector.extract_strided_slice %64 {offsets = [0, 128], sizes = [2, 128], strides = [1, 1]} : vector<2x384xf32> to vector<2x128xf32>
    %67 = vector.extract_strided_slice %64 {offsets = [0, 256], sizes = [2, 128], strides = [1, 1]} : vector<2x384xf32> to vector<2x128xf32>
    %68 = vector.extract_strided_slice %42 {offsets = [0, 384], sizes = [2, 128], strides = [1, 1]} : vector<2x512xf32> to vector<2x128xf32>
    %69 = math.tanh %68 : vector<2x128xf32>
    %70 = arith.mulf %66, %26 : vector<2x128xf32>
    %71 = arith.mulf %65, %69 : vector<2x128xf32>
    %72 = arith.addf %70, %71 : vector<2x128xf32>
    %73 = math.tanh %72 : vector<2x128xf32>
    %74 = arith.mulf %67, %73 : vector<2x128xf32>
    %c1_i32_20 = arith.constant 1 : i32
    %75 = arith.addf %74, %58 : vector<2x128xf32>
    %c1_i32_21 = arith.constant 1 : i32
    %76 = arith.addi %c1_i32_20, %c1_i32_21 : i32
    %77 = arith.index_cast %76 : i32 to index
    %c0_22 = arith.constant 0 : index
    %c0_23 = arith.constant 0 : index
    %78 = vector.load %arg0[%77, %c0_22, %c0_23] : memref<8x2x128xf32, #tpu.memory_space<vmem>>, vector<1x2x128xf32>
    %79 = vector.shape_cast %78 : vector<1x2x128xf32> to vector<2x128xf32>
    %80 = arith.addf %74, %79 : vector<2x128xf32>
    %81 = arith.truncf %75 : vector<2x128xf32> to vector<2x128xbf16>
    %c0_24 = arith.constant 0 : index
    %c0_25 = arith.constant 0 : index
    %82 = vector.load %arg3[%c0_24, %c0_25] : memref<128x512xbf16, #tpu.memory_space<vmem>>, vector<128x512xbf16>
    %cst_26 = arith.constant dense<0.000000e+00> : vector<2x512xf32>
    %83 = tpu.matmul %81, %82, %cst_26 {dimension_numbers = #tpu.dot_dimension_numbers<[1], [0], [0], [1], [0, 0, 1, 1], [], []>} : vector<2x128xbf16>, vector<128x512xbf16>, vector<2x512xf32> -> vector<2x512xf32>
    %84 = arith.addf %83, %5 : vector<2x512xf32>
    %85 = arith.truncf %80 : vector<2x128xf32> to vector<2x128xbf16>
    %c0_27 = arith.constant 0 : index
    %c0_28 = arith.constant 0 : index
    %86 = vector.load %arg1[%c0_27, %c0_28] : memref<128x512xbf16, #tpu.memory_space<vmem>>, vector<128x512xbf16>
    %cst_29 = arith.constant dense<0.000000e+00> : vector<2x512xf32>
    %87 = tpu.matmul %85, %86, %cst_29 {dimension_numbers = #tpu.dot_dimension_numbers<[1], [0], [0], [1], [0, 0, 1, 1], [], []>} : vector<2x128xbf16>, vector<128x512xbf16>, vector<2x512xf32> -> vector<2x512xf32>
    %88 = arith.addf %87, %2 : vector<2x512xf32>
    %89 = vector.extract_strided_slice %84 {offsets = [0, 0], sizes = [2, 384], strides = [1, 1]} : vector<2x512xf32> to vector<2x384xf32>
    %90 = arith.negf %89 : vector<2x384xf32>
    %91 = math.exp %90 : vector<2x384xf32>
    %cst_30 = arith.constant 1.000000e+00 : f32
    %92 = vector.broadcast %cst_30 : f32 to vector<2x384xf32>
    %93 = arith.addf %92, %91 : vector<2x384xf32>
    %94 = arith.divf %92, %93 : vector<2x384xf32>
    %95 = vector.extract_strided_slice %94 {offsets = [0, 0], sizes = [2, 128], strides = [1, 1]} : vector<2x384xf32> to vector<2x128xf32>
    %96 = vector.extract_strided_slice %94 {offsets = [0, 128], sizes = [2, 128], strides = [1, 1]} : vector<2x384xf32> to vector<2x128xf32>
    %97 = vector.extract_strided_slice %94 {offsets = [0, 256], sizes = [2, 128], strides = [1, 1]} : vector<2x384xf32> to vector<2x128xf32>
    %98 = vector.extract_strided_slice %84 {offsets = [0, 384], sizes = [2, 128], strides = [1, 1]} : vector<2x512xf32> to vector<2x128xf32>
    %99 = math.tanh %98 : vector<2x128xf32>
    %100 = arith.mulf %96, %56 : vector<2x128xf32>
    %101 = arith.mulf %95, %99 : vector<2x128xf32>
    %102 = arith.addf %100, %101 : vector<2x128xf32>
    %103 = math.tanh %102 : vector<2x128xf32>
    %104 = arith.mulf %97, %103 : vector<2x128xf32>
    %105 = vector.extract_strided_slice %88 {offsets = [0, 0], sizes = [2, 384], strides = [1, 1]} : vector<2x512xf32> to vector<2x384xf32>
    %106 = arith.negf %105 : vector<2x384xf32>
    %107 = math.exp %106 : vector<2x384xf32>
    %cst_31 = arith.constant 1.000000e+00 : f32
    %108 = vector.broadcast %cst_31 : f32 to vector<2x384xf32>
    %109 = arith.addf %108, %107 : vector<2x384xf32>
    %110 = arith.divf %108, %109 : vector<2x384xf32>
    %111 = vector.extract_strided_slice %110 {offsets = [0, 0], sizes = [2, 128], strides = [1, 1]} : vector<2x384xf32> to vector<2x128xf32>
    %112 = vector.extract_strided_slice %110 {offsets = [0, 128], sizes = [2, 128], strides = [1, 1]} : vector<2x384xf32> to vector<2x128xf32>
    %113 = vector.extract_strided_slice %110 {offsets = [0, 256], sizes = [2, 128], strides = [1, 1]} : vector<2x384xf32> to vector<2x128xf32>
    %114 = vector.extract_strided_slice %88 {offsets = [0, 384], sizes = [2, 128], strides = [1, 1]} : vector<2x512xf32> to vector<2x128xf32>
    %115 = math.tanh %114 : vector<2x128xf32>
    %116 = arith.mulf %112, %72 : vector<2x128xf32>
    %117 = arith.mulf %111, %115 : vector<2x128xf32>
    %118 = arith.addf %116, %117 : vector<2x128xf32>
    %119 = math.tanh %118 : vector<2x128xf32>
    %120 = arith.mulf %113, %119 : vector<2x128xf32>
    %c2_i32 = arith.constant 2 : i32
    %121 = arith.addf %120, %104 : vector<2x128xf32>
    %c1_i32_32 = arith.constant 1 : i32
    %122 = arith.addi %c2_i32, %c1_i32_32 : i32
    %123 = arith.index_cast %122 : i32 to index
    %c0_33 = arith.constant 0 : index
    %c0_34 = arith.constant 0 : index
    %124 = vector.load %arg0[%123, %c0_33, %c0_34] : memref<8x2x128xf32, #tpu.memory_space<vmem>>, vector<1x2x128xf32>
    %125 = vector.shape_cast %124 : vector<1x2x128xf32> to vector<2x128xf32>
    %126 = arith.addf %120, %125 : vector<2x128xf32>
    %127 = arith.truncf %121 : vector<2x128xf32> to vector<2x128xbf16>
    %c0_35 = arith.constant 0 : index
    %c0_36 = arith.constant 0 : index
    %128 = vector.load %arg3[%c0_35, %c0_36] : memref<128x512xbf16, #tpu.memory_space<vmem>>, vector<128x512xbf16>
    %cst_37 = arith.constant dense<0.000000e+00> : vector<2x512xf32>
    %129 = tpu.matmul %127, %128, %cst_37 {dimension_numbers = #tpu.dot_dimension_numbers<[1], [0], [0], [1], [0, 0, 1, 1], [], []>} : vector<2x128xbf16>, vector<128x512xbf16>, vector<2x512xf32> -> vector<2x512xf32>
    %130 = arith.addf %129, %5 : vector<2x512xf32>
    %131 = arith.truncf %126 : vector<2x128xf32> to vector<2x128xbf16>
    %c0_38 = arith.constant 0 : index
    %c0_39 = arith.constant 0 : index
    %132 = vector.load %arg1[%c0_38, %c0_39] : memref<128x512xbf16, #tpu.memory_space<vmem>>, vector<128x512xbf16>
    %cst_40 = arith.constant dense<0.000000e+00> : vector<2x512xf32>
    %133 = tpu.matmul %131, %132, %cst_40 {dimension_numbers = #tpu.dot_dimension_numbers<[1], [0], [0], [1], [0, 0, 1, 1], [], []>} : vector<2x128xbf16>, vector<128x512xbf16>, vector<2x512xf32> -> vector<2x512xf32>
    %134 = arith.addf %133, %2 : vector<2x512xf32>
    %135 = vector.extract_strided_slice %130 {offsets = [0, 0], sizes = [2, 384], strides = [1, 1]} : vector<2x512xf32> to vector<2x384xf32>
    %136 = arith.negf %135 : vector<2x384xf32>
    %137 = math.exp %136 : vector<2x384xf32>
    %cst_41 = arith.constant 1.000000e+00 : f32
    %138 = vector.broadcast %cst_41 : f32 to vector<2x384xf32>
    %139 = arith.addf %138, %137 : vector<2x384xf32>
    %140 = arith.divf %138, %139 : vector<2x384xf32>
    %141 = vector.extract_strided_slice %140 {offsets = [0, 0], sizes = [2, 128], strides = [1, 1]} : vector<2x384xf32> to vector<2x128xf32>
    %142 = vector.extract_strided_slice %140 {offsets = [0, 128], sizes = [2, 128], strides = [1, 1]} : vector<2x384xf32> to vector<2x128xf32>
    %143 = vector.extract_strided_slice %140 {offsets = [0, 256], sizes = [2, 128], strides = [1, 1]} : vector<2x384xf32> to vector<2x128xf32>
    %144 = vector.extract_strided_slice %130 {offsets = [0, 384], sizes = [2, 128], strides = [1, 1]} : vector<2x512xf32> to vector<2x128xf32>
    %145 = math.tanh %144 : vector<2x128xf32>
    %146 = arith.mulf %142, %102 : vector<2x128xf32>
    %147 = arith.mulf %141, %145 : vector<2x128xf32>
    %148 = arith.addf %146, %147 : vector<2x128xf32>
    %149 = math.tanh %148 : vector<2x128xf32>
    %150 = arith.mulf %143, %149 : vector<2x128xf32>
    %151 = vector.extract_strided_slice %134 {offsets = [0, 0], sizes = [2, 384], strides = [1, 1]} : vector<2x512xf32> to vector<2x384xf32>
    %152 = arith.negf %151 : vector<2x384xf32>
    %153 = math.exp %152 : vector<2x384xf32>
    %cst_42 = arith.constant 1.000000e+00 : f32
    %154 = vector.broadcast %cst_42 : f32 to vector<2x384xf32>
    %155 = arith.addf %154, %153 : vector<2x384xf32>
    %156 = arith.divf %154, %155 : vector<2x384xf32>
    %157 = vector.extract_strided_slice %156 {offsets = [0, 0], sizes = [2, 128], strides = [1, 1]} : vector<2x384xf32> to vector<2x128xf32>
    %158 = vector.extract_strided_slice %156 {offsets = [0, 128], sizes = [2, 128], strides = [1, 1]} : vector<2x384xf32> to vector<2x128xf32>
    %159 = vector.extract_strided_slice %156 {offsets = [0, 256], sizes = [2, 128], strides = [1, 1]} : vector<2x384xf32> to vector<2x128xf32>
    %160 = vector.extract_strided_slice %134 {offsets = [0, 384], sizes = [2, 128], strides = [1, 1]} : vector<2x512xf32> to vector<2x128xf32>
    %161 = math.tanh %160 : vector<2x128xf32>
    %162 = arith.mulf %158, %118 : vector<2x128xf32>
    %163 = arith.mulf %157, %161 : vector<2x128xf32>
    %164 = arith.addf %162, %163 : vector<2x128xf32>
    %165 = math.tanh %164 : vector<2x128xf32>
    %166 = arith.mulf %159, %165 : vector<2x128xf32>
    %c3_i32 = arith.constant 3 : i32
    %167 = arith.addf %166, %150 : vector<2x128xf32>
    %c1_i32_43 = arith.constant 1 : i32
    %168 = arith.addi %c3_i32, %c1_i32_43 : i32
    %169 = arith.index_cast %168 : i32 to index
    %c0_44 = arith.constant 0 : index
    %c0_45 = arith.constant 0 : index
    %170 = vector.load %arg0[%169, %c0_44, %c0_45] : memref<8x2x128xf32, #tpu.memory_space<vmem>>, vector<1x2x128xf32>
    %171 = vector.shape_cast %170 : vector<1x2x128xf32> to vector<2x128xf32>
    %172 = arith.addf %166, %171 : vector<2x128xf32>
    %173 = arith.truncf %167 : vector<2x128xf32> to vector<2x128xbf16>
    %c0_46 = arith.constant 0 : index
    %c0_47 = arith.constant 0 : index
    %174 = vector.load %arg3[%c0_46, %c0_47] : memref<128x512xbf16, #tpu.memory_space<vmem>>, vector<128x512xbf16>
    %cst_48 = arith.constant dense<0.000000e+00> : vector<2x512xf32>
    %175 = tpu.matmul %173, %174, %cst_48 {dimension_numbers = #tpu.dot_dimension_numbers<[1], [0], [0], [1], [0, 0, 1, 1], [], []>} : vector<2x128xbf16>, vector<128x512xbf16>, vector<2x512xf32> -> vector<2x512xf32>
    %176 = arith.addf %175, %5 : vector<2x512xf32>
    %177 = arith.truncf %172 : vector<2x128xf32> to vector<2x128xbf16>
    %c0_49 = arith.constant 0 : index
    %c0_50 = arith.constant 0 : index
    %178 = vector.load %arg1[%c0_49, %c0_50] : memref<128x512xbf16, #tpu.memory_space<vmem>>, vector<128x512xbf16>
    %cst_51 = arith.constant dense<0.000000e+00> : vector<2x512xf32>
    %179 = tpu.matmul %177, %178, %cst_51 {dimension_numbers = #tpu.dot_dimension_numbers<[1], [0], [0], [1], [0, 0, 1, 1], [], []>} : vector<2x128xbf16>, vector<128x512xbf16>, vector<2x512xf32> -> vector<2x512xf32>
    %180 = arith.addf %179, %2 : vector<2x512xf32>
    %181 = vector.extract_strided_slice %176 {offsets = [0, 0], sizes = [2, 384], strides = [1, 1]} : vector<2x512xf32> to vector<2x384xf32>
    %182 = arith.negf %181 : vector<2x384xf32>
    %183 = math.exp %182 : vector<2x384xf32>
    %cst_52 = arith.constant 1.000000e+00 : f32
    %184 = vector.broadcast %cst_52 : f32 to vector<2x384xf32>
    %185 = arith.addf %184, %183 : vector<2x384xf32>
    %186 = arith.divf %184, %185 : vector<2x384xf32>
    %187 = vector.extract_strided_slice %186 {offsets = [0, 0], sizes = [2, 128], strides = [1, 1]} : vector<2x384xf32> to vector<2x128xf32>
    %188 = vector.extract_strided_slice %186 {offsets = [0, 128], sizes = [2, 128], strides = [1, 1]} : vector<2x384xf32> to vector<2x128xf32>
    %189 = vector.extract_strided_slice %186 {offsets = [0, 256], sizes = [2, 128], strides = [1, 1]} : vector<2x384xf32> to vector<2x128xf32>
    %190 = vector.extract_strided_slice %176 {offsets = [0, 384], sizes = [2, 128], strides = [1, 1]} : vector<2x512xf32> to vector<2x128xf32>
    %191 = math.tanh %190 : vector<2x128xf32>
    %192 = arith.mulf %188, %148 : vector<2x128xf32>
    %193 = arith.mulf %187, %191 : vector<2x128xf32>
    %194 = arith.addf %192, %193 : vector<2x128xf32>
    %195 = math.tanh %194 : vector<2x128xf32>
    %196 = arith.mulf %189, %195 : vector<2x128xf32>
    %197 = vector.extract_strided_slice %180 {offsets = [0, 0], sizes = [2, 384], strides = [1, 1]} : vector<2x512xf32> to vector<2x384xf32>
    %198 = arith.negf %197 : vector<2x384xf32>
    %199 = math.exp %198 : vector<2x384xf32>
    %cst_53 = arith.constant 1.000000e+00 : f32
    %200 = vector.broadcast %cst_53 : f32 to vector<2x384xf32>
    %201 = arith.addf %200, %199 : vector<2x384xf32>
    %202 = arith.divf %200, %201 : vector<2x384xf32>
    %203 = vector.extract_strided_slice %202 {offsets = [0, 0], sizes = [2, 128], strides = [1, 1]} : vector<2x384xf32> to vector<2x128xf32>
    %204 = vector.extract_strided_slice %202 {offsets = [0, 128], sizes = [2, 128], strides = [1, 1]} : vector<2x384xf32> to vector<2x128xf32>
    %205 = vector.extract_strided_slice %202 {offsets = [0, 256], sizes = [2, 128], strides = [1, 1]} : vector<2x384xf32> to vector<2x128xf32>
    %206 = vector.extract_strided_slice %180 {offsets = [0, 384], sizes = [2, 128], strides = [1, 1]} : vector<2x512xf32> to vector<2x128xf32>
    %207 = math.tanh %206 : vector<2x128xf32>
    %208 = arith.mulf %204, %164 : vector<2x128xf32>
    %209 = arith.mulf %203, %207 : vector<2x128xf32>
    %210 = arith.addf %208, %209 : vector<2x128xf32>
    %211 = math.tanh %210 : vector<2x128xf32>
    %212 = arith.mulf %205, %211 : vector<2x128xf32>
    %c4_i32 = arith.constant 4 : i32
    %213 = arith.addf %212, %196 : vector<2x128xf32>
    %c1_i32_54 = arith.constant 1 : i32
    %214 = arith.addi %c4_i32, %c1_i32_54 : i32
    %215 = arith.index_cast %214 : i32 to index
    %c0_55 = arith.constant 0 : index
    %c0_56 = arith.constant 0 : index
    %216 = vector.load %arg0[%215, %c0_55, %c0_56] : memref<8x2x128xf32, #tpu.memory_space<vmem>>, vector<1x2x128xf32>
    %217 = vector.shape_cast %216 : vector<1x2x128xf32> to vector<2x128xf32>
    %218 = arith.addf %212, %217 : vector<2x128xf32>
    %219 = arith.truncf %213 : vector<2x128xf32> to vector<2x128xbf16>
    %c0_57 = arith.constant 0 : index
    %c0_58 = arith.constant 0 : index
    %220 = vector.load %arg3[%c0_57, %c0_58] : memref<128x512xbf16, #tpu.memory_space<vmem>>, vector<128x512xbf16>
    %cst_59 = arith.constant dense<0.000000e+00> : vector<2x512xf32>
    %221 = tpu.matmul %219, %220, %cst_59 {dimension_numbers = #tpu.dot_dimension_numbers<[1], [0], [0], [1], [0, 0, 1, 1], [], []>} : vector<2x128xbf16>, vector<128x512xbf16>, vector<2x512xf32> -> vector<2x512xf32>
    %222 = arith.addf %221, %5 : vector<2x512xf32>
    %223 = arith.truncf %218 : vector<2x128xf32> to vector<2x128xbf16>
    %c0_60 = arith.constant 0 : index
    %c0_61 = arith.constant 0 : index
    %224 = vector.load %arg1[%c0_60, %c0_61] : memref<128x512xbf16, #tpu.memory_space<vmem>>, vector<128x512xbf16>
    %cst_62 = arith.constant dense<0.000000e+00> : vector<2x512xf32>
    %225 = tpu.matmul %223, %224, %cst_62 {dimension_numbers = #tpu.dot_dimension_numbers<[1], [0], [0], [1], [0, 0, 1, 1], [], []>} : vector<2x128xbf16>, vector<128x512xbf16>, vector<2x512xf32> -> vector<2x512xf32>
    %226 = arith.addf %225, %2 : vector<2x512xf32>
    %227 = vector.extract_strided_slice %222 {offsets = [0, 0], sizes = [2, 384], strides = [1, 1]} : vector<2x512xf32> to vector<2x384xf32>
    %228 = arith.negf %227 : vector<2x384xf32>
    %229 = math.exp %228 : vector<2x384xf32>
    %cst_63 = arith.constant 1.000000e+00 : f32
    %230 = vector.broadcast %cst_63 : f32 to vector<2x384xf32>
    %231 = arith.addf %230, %229 : vector<2x384xf32>
    %232 = arith.divf %230, %231 : vector<2x384xf32>
    %233 = vector.extract_strided_slice %232 {offsets = [0, 0], sizes = [2, 128], strides = [1, 1]} : vector<2x384xf32> to vector<2x128xf32>
    %234 = vector.extract_strided_slice %232 {offsets = [0, 128], sizes = [2, 128], strides = [1, 1]} : vector<2x384xf32> to vector<2x128xf32>
    %235 = vector.extract_strided_slice %232 {offsets = [0, 256], sizes = [2, 128], strides = [1, 1]} : vector<2x384xf32> to vector<2x128xf32>
    %236 = vector.extract_strided_slice %222 {offsets = [0, 384], sizes = [2, 128], strides = [1, 1]} : vector<2x512xf32> to vector<2x128xf32>
    %237 = math.tanh %236 : vector<2x128xf32>
    %238 = arith.mulf %234, %194 : vector<2x128xf32>
    %239 = arith.mulf %233, %237 : vector<2x128xf32>
    %240 = arith.addf %238, %239 : vector<2x128xf32>
    %241 = math.tanh %240 : vector<2x128xf32>
    %242 = arith.mulf %235, %241 : vector<2x128xf32>
    %243 = vector.extract_strided_slice %226 {offsets = [0, 0], sizes = [2, 384], strides = [1, 1]} : vector<2x512xf32> to vector<2x384xf32>
    %244 = arith.negf %243 : vector<2x384xf32>
    %245 = math.exp %244 : vector<2x384xf32>
    %cst_64 = arith.constant 1.000000e+00 : f32
    %246 = vector.broadcast %cst_64 : f32 to vector<2x384xf32>
    %247 = arith.addf %246, %245 : vector<2x384xf32>
    %248 = arith.divf %246, %247 : vector<2x384xf32>
    %249 = vector.extract_strided_slice %248 {offsets = [0, 0], sizes = [2, 128], strides = [1, 1]} : vector<2x384xf32> to vector<2x128xf32>
    %250 = vector.extract_strided_slice %248 {offsets = [0, 128], sizes = [2, 128], strides = [1, 1]} : vector<2x384xf32> to vector<2x128xf32>
    %251 = vector.extract_strided_slice %248 {offsets = [0, 256], sizes = [2, 128], strides = [1, 1]} : vector<2x384xf32> to vector<2x128xf32>
    %252 = vector.extract_strided_slice %226 {offsets = [0, 384], sizes = [2, 128], strides = [1, 1]} : vector<2x512xf32> to vector<2x128xf32>
    %253 = math.tanh %252 : vector<2x128xf32>
    %254 = arith.mulf %250, %210 : vector<2x128xf32>
    %255 = arith.mulf %249, %253 : vector<2x128xf32>
    %256 = arith.addf %254, %255 : vector<2x128xf32>
    %257 = math.tanh %256 : vector<2x128xf32>
    %258 = arith.mulf %251, %257 : vector<2x128xf32>
    %c5_i32 = arith.constant 5 : i32
    %259 = arith.addf %258, %242 : vector<2x128xf32>
    %c1_i32_65 = arith.constant 1 : i32
    %260 = arith.addi %c5_i32, %c1_i32_65 : i32
    %261 = arith.index_cast %260 : i32 to index
    %c0_66 = arith.constant 0 : index
    %c0_67 = arith.constant 0 : index
    %262 = vector.load %arg0[%261, %c0_66, %c0_67] : memref<8x2x128xf32, #tpu.memory_space<vmem>>, vector<1x2x128xf32>
    %263 = vector.shape_cast %262 : vector<1x2x128xf32> to vector<2x128xf32>
    %264 = arith.addf %258, %263 : vector<2x128xf32>
    %265 = arith.truncf %259 : vector<2x128xf32> to vector<2x128xbf16>
    %c0_68 = arith.constant 0 : index
    %c0_69 = arith.constant 0 : index
    %266 = vector.load %arg3[%c0_68, %c0_69] : memref<128x512xbf16, #tpu.memory_space<vmem>>, vector<128x512xbf16>
    %cst_70 = arith.constant dense<0.000000e+00> : vector<2x512xf32>
    %267 = tpu.matmul %265, %266, %cst_70 {dimension_numbers = #tpu.dot_dimension_numbers<[1], [0], [0], [1], [0, 0, 1, 1], [], []>} : vector<2x128xbf16>, vector<128x512xbf16>, vector<2x512xf32> -> vector<2x512xf32>
    %268 = arith.addf %267, %5 : vector<2x512xf32>
    %269 = arith.truncf %264 : vector<2x128xf32> to vector<2x128xbf16>
    %c0_71 = arith.constant 0 : index
    %c0_72 = arith.constant 0 : index
    %270 = vector.load %arg1[%c0_71, %c0_72] : memref<128x512xbf16, #tpu.memory_space<vmem>>, vector<128x512xbf16>
    %cst_73 = arith.constant dense<0.000000e+00> : vector<2x512xf32>
    %271 = tpu.matmul %269, %270, %cst_73 {dimension_numbers = #tpu.dot_dimension_numbers<[1], [0], [0], [1], [0, 0, 1, 1], [], []>} : vector<2x128xbf16>, vector<128x512xbf16>, vector<2x512xf32> -> vector<2x512xf32>
    %272 = arith.addf %271, %2 : vector<2x512xf32>
    %273 = vector.extract_strided_slice %268 {offsets = [0, 0], sizes = [2, 384], strides = [1, 1]} : vector<2x512xf32> to vector<2x384xf32>
    %274 = arith.negf %273 : vector<2x384xf32>
    %275 = math.exp %274 : vector<2x384xf32>
    %cst_74 = arith.constant 1.000000e+00 : f32
    %276 = vector.broadcast %cst_74 : f32 to vector<2x384xf32>
    %277 = arith.addf %276, %275 : vector<2x384xf32>
    %278 = arith.divf %276, %277 : vector<2x384xf32>
    %279 = vector.extract_strided_slice %278 {offsets = [0, 0], sizes = [2, 128], strides = [1, 1]} : vector<2x384xf32> to vector<2x128xf32>
    %280 = vector.extract_strided_slice %278 {offsets = [0, 128], sizes = [2, 128], strides = [1, 1]} : vector<2x384xf32> to vector<2x128xf32>
    %281 = vector.extract_strided_slice %278 {offsets = [0, 256], sizes = [2, 128], strides = [1, 1]} : vector<2x384xf32> to vector<2x128xf32>
    %282 = vector.extract_strided_slice %268 {offsets = [0, 384], sizes = [2, 128], strides = [1, 1]} : vector<2x512xf32> to vector<2x128xf32>
    %283 = math.tanh %282 : vector<2x128xf32>
    %284 = arith.mulf %280, %240 : vector<2x128xf32>
    %285 = arith.mulf %279, %283 : vector<2x128xf32>
    %286 = arith.addf %284, %285 : vector<2x128xf32>
    %287 = math.tanh %286 : vector<2x128xf32>
    %288 = arith.mulf %281, %287 : vector<2x128xf32>
    %289 = vector.extract_strided_slice %272 {offsets = [0, 0], sizes = [2, 384], strides = [1, 1]} : vector<2x512xf32> to vector<2x384xf32>
    %290 = arith.negf %289 : vector<2x384xf32>
    %291 = math.exp %290 : vector<2x384xf32>
    %cst_75 = arith.constant 1.000000e+00 : f32
    %292 = vector.broadcast %cst_75 : f32 to vector<2x384xf32>
    %293 = arith.addf %292, %291 : vector<2x384xf32>
    %294 = arith.divf %292, %293 : vector<2x384xf32>
    %295 = vector.extract_strided_slice %294 {offsets = [0, 0], sizes = [2, 128], strides = [1, 1]} : vector<2x384xf32> to vector<2x128xf32>
    %296 = vector.extract_strided_slice %294 {offsets = [0, 128], sizes = [2, 128], strides = [1, 1]} : vector<2x384xf32> to vector<2x128xf32>
    %297 = vector.extract_strided_slice %294 {offsets = [0, 256], sizes = [2, 128], strides = [1, 1]} : vector<2x384xf32> to vector<2x128xf32>
    %298 = vector.extract_strided_slice %272 {offsets = [0, 384], sizes = [2, 128], strides = [1, 1]} : vector<2x512xf32> to vector<2x128xf32>
    %299 = math.tanh %298 : vector<2x128xf32>
    %300 = arith.mulf %296, %256 : vector<2x128xf32>
    %301 = arith.mulf %295, %299 : vector<2x128xf32>
    %302 = arith.addf %300, %301 : vector<2x128xf32>
    %303 = math.tanh %302 : vector<2x128xf32>
    %304 = arith.mulf %297, %303 : vector<2x128xf32>
    %c6_i32 = arith.constant 6 : i32
    %305 = arith.addf %304, %288 : vector<2x128xf32>
    %c1_i32_76 = arith.constant 1 : i32
    %306 = arith.addi %c6_i32, %c1_i32_76 : i32
    %307 = arith.index_cast %306 : i32 to index
    %c0_77 = arith.constant 0 : index
    %c0_78 = arith.constant 0 : index
    %308 = vector.load %arg0[%307, %c0_77, %c0_78] : memref<8x2x128xf32, #tpu.memory_space<vmem>>, vector<1x2x128xf32>
    %309 = vector.shape_cast %308 : vector<1x2x128xf32> to vector<2x128xf32>
    %310 = arith.addf %304, %309 : vector<2x128xf32>
    %311 = arith.truncf %305 : vector<2x128xf32> to vector<2x128xbf16>
    %c0_79 = arith.constant 0 : index
    %c0_80 = arith.constant 0 : index
    %312 = vector.load %arg3[%c0_79, %c0_80] : memref<128x512xbf16, #tpu.memory_space<vmem>>, vector<128x512xbf16>
    %cst_81 = arith.constant dense<0.000000e+00> : vector<2x512xf32>
    %313 = tpu.matmul %311, %312, %cst_81 {dimension_numbers = #tpu.dot_dimension_numbers<[1], [0], [0], [1], [0, 0, 1, 1], [], []>} : vector<2x128xbf16>, vector<128x512xbf16>, vector<2x512xf32> -> vector<2x512xf32>
    %314 = arith.addf %313, %5 : vector<2x512xf32>
    %315 = arith.truncf %310 : vector<2x128xf32> to vector<2x128xbf16>
    %c0_82 = arith.constant 0 : index
    %c0_83 = arith.constant 0 : index
    %316 = vector.load %arg1[%c0_82, %c0_83] : memref<128x512xbf16, #tpu.memory_space<vmem>>, vector<128x512xbf16>
    %cst_84 = arith.constant dense<0.000000e+00> : vector<2x512xf32>
    %317 = tpu.matmul %315, %316, %cst_84 {dimension_numbers = #tpu.dot_dimension_numbers<[1], [0], [0], [1], [0, 0, 1, 1], [], []>} : vector<2x128xbf16>, vector<128x512xbf16>, vector<2x512xf32> -> vector<2x512xf32>
    %318 = arith.addf %317, %2 : vector<2x512xf32>
    %319 = vector.extract_strided_slice %314 {offsets = [0, 0], sizes = [2, 384], strides = [1, 1]} : vector<2x512xf32> to vector<2x384xf32>
    %320 = arith.negf %319 : vector<2x384xf32>
    %321 = math.exp %320 : vector<2x384xf32>
    %cst_85 = arith.constant 1.000000e+00 : f32
    %322 = vector.broadcast %cst_85 : f32 to vector<2x384xf32>
    %323 = arith.addf %322, %321 : vector<2x384xf32>
    %324 = arith.divf %322, %323 : vector<2x384xf32>
    %325 = vector.extract_strided_slice %324 {offsets = [0, 0], sizes = [2, 128], strides = [1, 1]} : vector<2x384xf32> to vector<2x128xf32>
    %326 = vector.extract_strided_slice %324 {offsets = [0, 128], sizes = [2, 128], strides = [1, 1]} : vector<2x384xf32> to vector<2x128xf32>
    %327 = vector.extract_strided_slice %324 {offsets = [0, 256], sizes = [2, 128], strides = [1, 1]} : vector<2x384xf32> to vector<2x128xf32>
    %328 = vector.extract_strided_slice %314 {offsets = [0, 384], sizes = [2, 128], strides = [1, 1]} : vector<2x512xf32> to vector<2x128xf32>
    %329 = math.tanh %328 : vector<2x128xf32>
    %330 = arith.mulf %326, %286 : vector<2x128xf32>
    %331 = arith.mulf %325, %329 : vector<2x128xf32>
    %332 = arith.addf %330, %331 : vector<2x128xf32>
    %333 = math.tanh %332 : vector<2x128xf32>
    %334 = arith.mulf %327, %333 : vector<2x128xf32>
    %335 = vector.extract_strided_slice %318 {offsets = [0, 0], sizes = [2, 384], strides = [1, 1]} : vector<2x512xf32> to vector<2x384xf32>
    %336 = arith.negf %335 : vector<2x384xf32>
    %337 = math.exp %336 : vector<2x384xf32>
    %cst_86 = arith.constant 1.000000e+00 : f32
    %338 = vector.broadcast %cst_86 : f32 to vector<2x384xf32>
    %339 = arith.addf %338, %337 : vector<2x384xf32>
    %340 = arith.divf %338, %339 : vector<2x384xf32>
    %341 = vector.extract_strided_slice %340 {offsets = [0, 0], sizes = [2, 128], strides = [1, 1]} : vector<2x384xf32> to vector<2x128xf32>
    %342 = vector.extract_strided_slice %340 {offsets = [0, 128], sizes = [2, 128], strides = [1, 1]} : vector<2x384xf32> to vector<2x128xf32>
    %343 = vector.extract_strided_slice %340 {offsets = [0, 256], sizes = [2, 128], strides = [1, 1]} : vector<2x384xf32> to vector<2x128xf32>
    %344 = vector.extract_strided_slice %318 {offsets = [0, 384], sizes = [2, 128], strides = [1, 1]} : vector<2x512xf32> to vector<2x128xf32>
    %345 = math.tanh %344 : vector<2x128xf32>
    %346 = arith.mulf %342, %302 : vector<2x128xf32>
    %347 = arith.mulf %341, %345 : vector<2x128xf32>
    %348 = arith.addf %346, %347 : vector<2x128xf32>
    %349 = math.tanh %348 : vector<2x128xf32>
    %350 = arith.mulf %343, %349 : vector<2x128xf32>
    %c7_i32 = arith.constant 7 : i32
    %351 = arith.addf %350, %334 : vector<2x128xf32>
    %352 = arith.truncf %351 : vector<2x128xf32> to vector<2x128xbf16>
    %c0_87 = arith.constant 0 : index
    %c0_88 = arith.constant 0 : index
    %353 = vector.load %arg3[%c0_87, %c0_88] : memref<128x512xbf16, #tpu.memory_space<vmem>>, vector<128x512xbf16>
    %cst_89 = arith.constant dense<0.000000e+00> : vector<2x512xf32>
    %354 = tpu.matmul %352, %353, %cst_89 {dimension_numbers = #tpu.dot_dimension_numbers<[1], [0], [0], [1], [0, 0, 1, 1], [], []>} : vector<2x128xbf16>, vector<128x512xbf16>, vector<2x512xf32> -> vector<2x512xf32>
    %355 = arith.addf %354, %5 : vector<2x512xf32>
    %356 = vector.extract_strided_slice %355 {offsets = [0, 0], sizes = [2, 384], strides = [1, 1]} : vector<2x512xf32> to vector<2x384xf32>
    %357 = arith.negf %356 : vector<2x384xf32>
    %358 = math.exp %357 : vector<2x384xf32>
    %cst_90 = arith.constant 1.000000e+00 : f32
    %359 = vector.broadcast %cst_90 : f32 to vector<2x384xf32>
    %360 = arith.addf %359, %358 : vector<2x384xf32>
    %361 = arith.divf %359, %360 : vector<2x384xf32>
    %362 = vector.extract_strided_slice %361 {offsets = [0, 0], sizes = [2, 128], strides = [1, 1]} : vector<2x384xf32> to vector<2x128xf32>
    %363 = vector.extract_strided_slice %361 {offsets = [0, 128], sizes = [2, 128], strides = [1, 1]} : vector<2x384xf32> to vector<2x128xf32>
    %364 = vector.extract_strided_slice %361 {offsets = [0, 256], sizes = [2, 128], strides = [1, 1]} : vector<2x384xf32> to vector<2x128xf32>
    %365 = vector.extract_strided_slice %355 {offsets = [0, 384], sizes = [2, 128], strides = [1, 1]} : vector<2x512xf32> to vector<2x128xf32>
    %366 = math.tanh %365 : vector<2x128xf32>
    %367 = arith.mulf %363, %332 : vector<2x128xf32>
    %368 = arith.mulf %362, %366 : vector<2x128xf32>
    %369 = arith.addf %367, %368 : vector<2x128xf32>
    %370 = math.tanh %369 : vector<2x128xf32>
    %371 = arith.mulf %364, %370 : vector<2x128xf32>
    %c0_91 = arith.constant 0 : index
    %c0_92 = arith.constant 0 : index
    %372 = vector.load %arg5[%c0_91, %c0_92] : memref<128x128xf32, #tpu.memory_space<vmem>>, vector<128x128xf32>
    %cst_93 = arith.constant dense<0.000000e+00> : vector<2x128xf32>
    %373 = tpu.matmul %371, %372, %cst_93 {dimension_numbers = #tpu.dot_dimension_numbers<[1], [0], [0], [1], [0, 0, 1, 1], [], []>} : vector<2x128xf32>, vector<128x128xf32>, vector<2x128xf32> -> vector<2x128xf32>
    %c0_94 = arith.constant 0 : index
    %c0_95 = arith.constant 0 : index
    %374 = vector.load %arg6[%c0_94, %c0_95] : memref<1x128xf32, #tpu.memory_space<vmem>>, vector<1x128xf32>
    %375 = vector.broadcast %374 : vector<1x128xf32> to vector<2x128xf32>
    %376 = arith.addf %373, %375 : vector<2x128xf32>
    %c0_96 = arith.constant 0 : index
    %c0_97 = arith.constant 0 : index
    %377 = vector.load %arg7[%c0_96, %c0_97] : memref<2x128xf32, #tpu.memory_space<vmem>>, vector<2x128xf32>
    tpu.vector_store %arg7[%c0_96, %c0_97], %376 {strides = array<i32>} : memref<2x128xf32, #tpu.memory_space<vmem>>, vector<2x128xf32>,
    return
  }
}

</mosaic_0001>

<bundles_post_ra>
// kernel: golf_lstm_forward.1
= control target key start
LH: loop header
LB: loop body
LE: loop exit
PB: predicated region body
PF: predicated region fallthrough
CT: control target
= control target key end

     0   :  { %12 = vsyncpa [#allocation3], 0  ;;  %s4424_s0 = inlined_call_operand.vmem [shape: f32[8,2,128], index: 0, kind: input, shape index: {}]   ;;  %s4425_s1 = inlined_call_operand.hbm [shape: bf16[128,512], index: 1, kind: input, shape index: {}]   ;;  %s4426_s2 = inlined_call_operand.vmem [shape: f32[1,512], index: 2, kind: input, shape index: {}]   ;;  %s4427_s3 = inlined_call_operand.hbm [shape: bf16[128,512], index: 3, kind: input, shape index: {}]   ;;  %s4428_s4 = inlined_call_operand.vmem [shape: f32[1,512], index: 4, kind: input, shape index: {}]   ;;  %s4429_s5 = inlined_call_operand.hbm [shape: f32[128,128], index: 5, kind: input, shape index: {}]   ;;  %s4430_s6 = inlined_call_operand.vmem [shape: f32[1,128], index: 6, kind: input, shape index: {}]   ;;  %s4431_s7 = inlined_call_operand.hbm [shape: f32[2,128], index: 7, kind: output, shape index: {}]  }
   0x1   :  { %13 = vsyncpa [#allocation6], 0 }
   0x2   :  { %14 = vsyncpa [#allocation4], 0  ;;  %s36_s26 = sshll.u32 %s4427_s3, 4  ;;  %s3165_s27 = smov [#allocation5]   ;;  %s37_s26 = int_to_ptr.hbm [resolvable:$true] %s36_s26 }
   0x3   :  { %s38_s28 = sshll.u32 %s3165_s27, 4  ;;  %s21_s8 = sshll.u32 %s4425_s1, 4  ;;  %s39_s28 = int_to_ptr.vmem [resolvable:$true] %s38_s28  ;;  %s22_s8 = int_to_ptr.hbm [resolvable:$true] %s21_s8 }
   0x4   :  { %s3166_s9 = smov 256   ;;  %s3167_s10 = smov 16  }
   0x5   :  { %44 = dma.hbm_to_vmem [thread:$0]  %s37_s26, 4096, %s39_s28, [#allocation6], %s3166_s9, %s3166_s9, %s3167_s10  }
   0x6   :  { %s3168_s11 = smov [#allocation2]   ;;  %s51_s15 = sshll.u32 %s4429_s5, 4  ;;  %s52_s15 = int_to_ptr.hbm [resolvable:$true] %s51_s15 }
   0x7   :  { %s23_s12 = sshll.u32 %s3168_s11, 4  ;;  %s3169_s3 = smov [#allocation7]   ;;  %s24_s12 = int_to_ptr.vmem [resolvable:$true] %s23_s12 }
   0x8   :  { %29 = dma.hbm_to_vmem [thread:$0]  %s22_s8, 4096, %s24_s12, [#allocation3], %s3166_s9, %s3166_s9, %s3167_s10  }
   0x9   :  { %s53_s16 = sshll.u32 %s3169_s3, 4  ;;  %s3170_s17 = smov 128   ;;  %s54_s16 = int_to_ptr.vmem [resolvable:$true] %s53_s16 }
   0xa   :  { %s3171_s18 = smov 8  }
   0xb   :  { %59 = dma.hbm_to_vmem [thread:$0]  %s52_s15, 2048, %s54_s16, [#allocation6], %s3170_s17, %s3170_s17, %s3171_s18  }
   0xc   :  { %3159 = dma.done.wait [#allocation3], 4096  }
   0xd   :  { %3160 = vsyncadd [#allocation3], 4294963200 }
   0xe   :  { %3161 = dma.done.wait [#allocation6], 6144  }
   0xf   :  { %3162 = vsyncadd [#allocation6], 4294961152  ;;  %v2537_v0 = vld [vmem:[#allocation2 + $0xe0] sm:$0xf]  ;;  %v2764_v1 = vld [vmem:[#allocation2 + $0xec] sm:$0xf0] }
  0x10   :  { %v2762_v2 = vld [vmem:[#allocation2 + $0xe4] sm:$0xf]  ;;  %v3222_v3 = vor.u32 %v2764_v1, %v2537_v0  ;;  %v2539_v4 = vld [vmem:[#allocation2 + $0xf0] sm:$0xf0]  ;;  %v2545_v5 = vld [vmem:[#allocation2 + $0xe8] sm:$0xf] }
  0x11   :  { %v2765_v6 = vld [vmem:[#allocation2 + $0xf4] sm:$0xf0]  ;;  %v3224_v7 = vor.u32 %v2762_v2, %v2539_v4  ;;  %v2521_v9 = vld [vmem:[#allocation2 + $0xc0] sm:$0xf]  ;;  %v2760_v10 = vld [vmem:[#allocation2 + $0xcc] sm:$0xf0] }
  0x12   :  { %v3226_v8 = vor.u32 %v2765_v6, %v2545_v5  ;;  %v2758_v11 = vld [vmem:[#allocation2 + $0xc4] sm:$0xf]  ;;  %288 = vmatpush.bf16.msra.mxu0 %v3222_v3  ;;  %v3229_v12 = vor.u32 %v2760_v10, %v2521_v9  ;;  %v2523_v13 = vld [vmem:[#allocation2 + $0xd0] sm:$0xf0]  ;;  %v2529_v14 = vld [vmem:[#allocation2 + $0xc8] sm:$0xf] }
  0x13   :  { %4534 = vst [vmem:[#allocation12_spill] sm:$0xff] %v3224_v7  ;;  %v2761_v15 = vld [vmem:[#allocation2 + $0xd4] sm:$0xf0]  ;;  %301 = vmatpush.bf16.msra.mxu1 %v3224_v7  ;;  %v3233_v16 = vor.u32 %v2758_v11, %v2523_v13  ;;  %v2763_v18 = vld [vmem:[#allocation2 + $0xec] sm:$0xf]  ;;  %s3172_s13 = smov [#allocation8]  }
  0x14   :  { %4535 = vst [vmem:[#allocation13_spill] sm:$0xff] %v3226_v8  ;;  %314 = vmatpush.bf16.msra.mxu2 %v3226_v8  ;;  %v3235_v17 = vor.u32 %v2761_v15, %v2529_v14  ;;  %v2547_v19 = vld [vmem:[#allocation2 + $0xf8] sm:$0xf0]  ;;  %v2505_v20 = vld [vmem:[#allocation2 + $0xa0] sm:$0xf]  ;;  %s2410_s14 = sshll.u32 %s3172_s13, 4  ;;  %s2411_s14 = int_to_ptr.vmem [resolvable:$true] %s2410_s14 }
  0x15   :  { %4536 = vst [vmem:[#allocation14_spill] sm:$0xff] %v3229_v12  ;;  %v3237_v21 = vor.u32 %v2763_v18, %v2547_v19  ;;  %v2756_v22 = vld [vmem:[#allocation2 + $0xac] sm:$0xf0]  ;;  %v2754_v23 = vld [vmem:[#allocation2 + $0xa4] sm:$0xf]  ;;  %s2412_s16 = sshll.u32 %s4431_s7, 4  ;;  %s2413_s16 = int_to_ptr.hbm [resolvable:$true] %s2412_s16 }
  0x16   :  { %4537 = vst [vmem:[#allocation15_spill] sm:$0xff] %v3233_v16  ;;  %v2507_v24 = vld [vmem:[#allocation2 + $0xb0] sm:$0xf0]  ;;  %v2513_v25 = vld [vmem:[#allocation2 + $0xa8] sm:$0xf]  ;;  %289 = vmatpush.bf16.msra.mxu0 %v3229_v12  ;;  %v3241_v28 = vor.u32 %v2756_v22, %v2505_v20 }
  0x17   :  { %4538 = vst [vmem:[#allocation16_spill] sm:$0xff] %v3235_v17  ;;  %v2757_v26 = vld [vmem:[#allocation2 + $0xb4] sm:$0xf0]  ;;  %v2759_v27 = vld [vmem:[#allocation2 + $0xcc] sm:$0xf]  ;;  %327 = vmatpush.bf16.msra.mxu3 %v3237_v21  ;;  %302 = vmatpush.bf16.msra.mxu1 %v3233_v16  ;;  %v3245_v32 = vor.u32 %v2754_v23, %v2507_v24 }
  0x18   :  { %4539 = vst [vmem:[#allocation17_spill] sm:$0xff] %v3237_v21  ;;  %v2531_v29 = vld [vmem:[#allocation2 + $0xd8] sm:$0xf0]  ;;  %v2489_v30 = vld [vmem:[#allocation2 + $0x80] sm:$0xf]  ;;  %315 = vmatpush.bf16.msra.mxu2 %v3235_v17  ;;  %v3247_v33 = vor.u32 %v2757_v26, %v2513_v25 }
  0x19   :  { %4540 = vst [vmem:[#allocation18_spill] sm:$0xff] %v3241_v28  ;;  %v2752_v31 = vld [vmem:[#allocation2 + $0x8c] sm:$0xf0]  ;;  %v3249_v34 = vor.u32 %v2759_v27, %v2531_v29  ;;  %v2750_v35 = vld [vmem:[#allocation2 + $0x84] sm:$0xf] }
  0x1a   :  { %4541 = vst [vmem:[#allocation19_spill] sm:$0xff] %v3245_v32  ;;  %v2491_v36 = vld [vmem:[#allocation2 + $0x90] sm:$0xf0]  ;;  %v2497_v37 = vld [vmem:[#allocation2 + $0x88] sm:$0xf]  ;;  %290 = vmatpush.bf16.msra.mxu0 %v3241_v28  ;;  %v3253_v41 = vor.u32 %v2752_v31, %v2489_v30 }
  0x1b   :  { %4542 = vst [vmem:[#allocation20_spill] sm:$0xff] %v3247_v33  ;;  %v2753_v38 = vld [vmem:[#allocation2 + $0x94] sm:$0xf0]  ;;  %v2755_v39 = vld [vmem:[#allocation2 + $0xac] sm:$0xf]  ;;  %328 = vmatpush.bf16.msra.mxu3 %v3249_v34  ;;  %303 = vmatpush.bf16.msra.mxu1 %v3245_v32  ;;  %v3259_v45 = vor.u32 %v2750_v35, %v2491_v36 }
  0x1c   :  { %4543 = vst [vmem:[#allocation21_spill] sm:$0xff] %v3249_v34  ;;  %v2515_v40 = vld [vmem:[#allocation2 + $0xb8] sm:$0xf0]  ;;  %v2473_v43 = vld [vmem:[#allocation2 + $0x60] sm:$0xf]  ;;  %316 = vmatpush.bf16.msra.mxu2 %v3247_v33  ;;  %v3261_v46 = vor.u32 %v2753_v38, %v2497_v37 }
  0x1d   :  { %4544 = vst [vmem:[#allocation22_spill] sm:$0xff] %v3253_v41  ;;  %v3255_v42 = vor.u32 %v2755_v39, %v2515_v40  ;;  %v2748_v44 = vld [vmem:[#allocation2 + $0x6c] sm:$0xf0]  ;;  %v2746_v47 = vld [vmem:[#allocation2 + $0x64] sm:$0xf] }
  0x1e   :  { %4546 = vst [vmem:[#allocation24_spill] sm:$0xff] %v3259_v45  ;;  %v2751_v48 = vld [vmem:[#allocation2 + $0x8c] sm:$0xf]  ;;  %v2499_v49 = vld [vmem:[#allocation2 + $0x98] sm:$0xf0]  ;;  %291 = vmatpush.bf16.msra.mxu0 %v3253_v41  ;;  %v3265_v53 = vor.u32 %v2748_v44, %v2473_v43 }
  0x1f   :  { %4545 = vst [vmem:[#allocation23_spill] sm:$0xff] %v3255_v42  ;;  %v2475_v50 = vld [vmem:[#allocation2 + $0x70] sm:$0xf0]  ;;  %v2481_v51 = vld [vmem:[#allocation2 + $0x68] sm:$0xf]  ;;  %329 = vmatpush.bf16.msra.mxu3 %v3255_v42  ;;  %v3267_v54 = vor.u32 %v2751_v48, %v2499_v49  ;;  %304 = vmatpush.bf16.msra.mxu1 %v3259_v45 }
  0x20   :  { %4547 = vst [vmem:[#allocation25_spill] sm:$0xff] %v3261_v46  ;;  %v2749_v52 = vld [vmem:[#allocation2 + $0x74] sm:$0xf0]  ;;  %v2457_v55 = vld [vmem:[#allocation2 + $0x40] sm:$0xf]  ;;  %317 = vmatpush.bf16.msra.mxu2 %v3261_v46  ;;  %v3271_v57 = vor.u32 %v2746_v47, %v2475_v50 }
  0x21   :  { %4548 = vst [vmem:[#allocation26_spill] sm:$0xff] %v3265_v53  ;;  %v2744_v56 = vld [vmem:[#allocation2 + $0x4c] sm:$0xf0]  ;;  %v3273_v58 = vor.u32 %v2749_v52, %v2481_v51  ;;  %v2742_v59 = vld [vmem:[#allocation2 + $0x44] sm:$0xf] }
  0x22   :  { %4549 = vst [vmem:[#allocation27_spill] sm:$0xff] %v3267_v54  ;;  %v2747_v60 = vld [vmem:[#allocation2 + $0x6c] sm:$0xf]  ;;  %v2483_v61 = vld [vmem:[#allocation2 + $0x78] sm:$0xf0]  ;;  %292 = vmatpush.bf16.msra.mxu0 %v3265_v53  ;;  %v3277_v1 = vor.u32 %v2744_v56, %v2457_v55 }
  0x23   :  { %4550 = vst [vmem:[#allocation28_spill] sm:$0xff] %v3271_v57  ;;  %v2459_v62 = vld [vmem:[#allocation2 + $0x50] sm:$0xf0]  ;;  %v2465_v63 = vld [vmem:[#allocation2 + $0x48] sm:$0xf]  ;;  %330 = vmatpush.bf16.msra.mxu3 %v3267_v54  ;;  %v3279_v2 = vor.u32 %v2747_v60, %v2483_v61  ;;  %305 = vmatpush.bf16.msra.mxu1 %v3271_v57 }
  0x24   :  { %4551 = vst [vmem:[#allocation29_spill] sm:$0xff] %v3273_v58  ;;  %v2745_v0 = vld [vmem:[#allocation2 + $0x54] sm:$0xf0]  ;;  %v2441_v4 = vld [vmem:[#allocation2 + $0x20] sm:$0xf]  ;;  %318 = vmatpush.bf16.msra.mxu2 %v3273_v58  ;;  %v3283_v6 = vor.u32 %v2742_v59, %v2459_v62 }
  0x25   :  { %4552 = vst [vmem:[#allocation30_spill] sm:$0xff] %v3277_v1  ;;  %v2740_v5 = vld [vmem:[#allocation2 + $0x2c] sm:$0xf0]  ;;  %v3285_v9 = vor.u32 %v2745_v0, %v2465_v63  ;;  %v2738_v10 = vld [vmem:[#allocation2 + $0x24] sm:$0xf] }
  0x26   :  { %4553 = vst [vmem:[#allocation31_spill] sm:$0xff] %v3279_v2  ;;  %v2743_v11 = vld [vmem:[#allocation2 + $0x4c] sm:$0xf]  ;;  %v2467_v13 = vld [vmem:[#allocation2 + $0x58] sm:$0xf0]  ;;  %293 = vmatpush.bf16.msra.mxu0 %v3277_v1  ;;  %v3289_v19 = vor.u32 %v2740_v5, %v2441_v4 }
  0x27   :  { %4554 = vst [vmem:[#allocation32_spill] sm:$0xff] %v3283_v6  ;;  %v2443_v14 = vld [vmem:[#allocation2 + $0x30] sm:$0xf0]  ;;  %v2449_v15 = vld [vmem:[#allocation2 + $0x28] sm:$0xf]  ;;  %331 = vmatpush.bf16.msra.mxu3 %v3279_v2  ;;  %v3291_v20 = vor.u32 %v2743_v11, %v2467_v13  ;;  %306 = vmatpush.bf16.msra.mxu1 %v3283_v6 }
  0x28   :  { %4555 = vst [vmem:[#allocation33_spill] sm:$0xff] %v3285_v9  ;;  %v2741_v18 = vld [vmem:[#allocation2 + $0x34] sm:$0xf0]  ;;  %v2425_v22 = vld [vmem:[#allocation2] sm:$0xf]  ;;  %319 = vmatpush.bf16.msra.mxu2 %v3285_v9  ;;  %v3295_v24 = vor.u32 %v2738_v10, %v2443_v14 }
  0x29   :  { %4556 = vst [vmem:[#allocation34_spill] sm:$0xff] %v3289_v19  ;;  %v2736_v23 = vld [vmem:[#allocation2 + $0xc] sm:$0xf0]  ;;  %v3297_v25 = vor.u32 %v2741_v18, %v2449_v15  ;;  %v2734_v26 = vld [vmem:[#allocation2 + $0x4] sm:$0xf] }
  0x2a   :  { %4557 = vst [vmem:[#allocation35_spill] sm:$0xff] %v3291_v20  ;;  %v2739_v27 = vld [vmem:[#allocation2 + $0x2c] sm:$0xf]  ;;  %v2451_v29 = vld [vmem:[#allocation2 + $0x38] sm:$0xf0]  ;;  %294 = vmatpush.bf16.msra.mxu0 %v3289_v19  ;;  %v3301_v36 = vor.u32 %v2736_v23, %v2425_v22 }
  0x2b   :  { %4558 = vst [vmem:[#allocation36_spill] sm:$0xff] %v3295_v24  ;;  %v2427_v30 = vld [vmem:[#allocation2 + $0x10] sm:$0xf0]  ;;  %v2433_v31 = vld [vmem:[#allocation2 + $0x8] sm:$0xf]  ;;  %332 = vmatpush.bf16.msra.mxu3 %v3291_v20  ;;  %v3306_v38 = vor.u32 %v2739_v27, %v2451_v29  ;;  %307 = vmatpush.bf16.msra.mxu1 %v3295_v24 }
  0x2c   :  { %4559 = vst [vmem:[#allocation37_spill] sm:$0xff] %v3297_v25  ;;  %v2737_v35 = vld [vmem:[#allocation2 + $0x14] sm:$0xf0]  ;;  %v94_v37 = vld [vmem:[%s4424_s0] sm:$0x3]  ;;  %320 = vmatpush.bf16.msra.mxu2 %v3297_v25  ;;  %v3310_v39 = vor.u32 %v2734_v26, %v2427_v30 }
  0x2d   :  { %4560 = vst [vmem:[#allocation38_spill] sm:$0xff] %v3301_v36  ;;  %v3312_v40 = vor.u32 %v2737_v35, %v2433_v31  ;;  %v2735_v43 = vld [vmem:[#allocation2 + $0xc] sm:$0xf]  ;;  %v2435_v44 = vld [vmem:[#allocation2 + $0x18] sm:$0xf0]  ;;  %v95_v47 = vpack.c.bf16 %v94_v37, %v94_v37 }
  0x2e   :  { %4561 = vst [vmem:[#allocation39_spill] sm:$0xff] %v3306_v38  ;;  %295 = vmatpush.bf16.msra.mxu0 %v3301_v36  ;;  %v3318_v48 = vor.u32 %v2735_v43, %v2435_v44  ;;  %v2669_v49 = vld [vmem:[#allocation5 + $0xe0] sm:$0xf]  ;;  %v2796_v50 = vld [vmem:[#allocation5 + $0xec] sm:$0xf0] }
  0x2f   :  { %4562 = vst [vmem:[#allocation40_spill] sm:$0xff] %v3310_v39  ;;  %333 = vmatpush.bf16.msra.mxu3 %v3306_v38  ;;  %308 = vmatpush.bf16.msra.mxu1 %v3310_v39  ;;  %v3321_v51 = vor.u32 %v2796_v50, %v2669_v49  ;;  %v2794_v52 = vld [vmem:[#allocation5 + $0xe4] sm:$0xf]  ;;  %v2671_v55 = vld [vmem:[#allocation5 + $0xf0] sm:$0xf0] }
  0x30   :  { %4563 = vst [vmem:[#allocation41_spill] sm:$0xff] %v3312_v40  ;;  %321 = vmatpush.bf16.msra.mxu2 %v3312_v40  ;;  %v2677_v56 = vld [vmem:[#allocation5 + $0xe8] sm:$0xf]  ;;  %v3323_v59 = vor.u32 %v2794_v52, %v2671_v55  ;;  %v2797_v60 = vld [vmem:[#allocation5 + $0xf4] sm:$0xf0] }
  0x31   :  { %4564 = vst [vmem:[#allocation42_spill] sm:$0xff] %v3318_v48  ;;  %296 = vmatmul.bf16.vlgmr.msra.gmra.mxu0 %v95_v47  ;;  %v2795_v61 = vld [vmem:[#allocation5 + $0xec] sm:$0xf]  ;;  %v2679_v62 = vld [vmem:[#allocation5 + $0xf8] sm:$0xf0]  ;;  %v3326_v63 = vor.u32 %v2797_v60, %v2677_v56 }
  0x32   :  { %309 = vmatmul.bf16.vlgmr.msra.gmra.mxu1 %v95_v47  ;;  %600 = vmatpush.bf16.msrb.mxu0 %v3321_v51  ;;  %v3328_v0 = vor.u32 %v2795_v61, %v2679_v62  ;;  %v2653_v4 = vld [vmem:[#allocation5 + $0xc0] sm:$0xf]  ;;  %v2792_v5 = vld [vmem:[#allocation5 + $0xcc] sm:$0xf0]  ;;  %v2790_v10 = vld [vmem:[#allocation5 + $0xc4] sm:$0xf] }
  0x33   :  { %322 = vmatmul.bf16.vlgmr.msra.gmra.mxu2 %v95_v47  ;;  %334 = vmatpush.bf16.msra.mxu3 %v3318_v48  ;;  %v3333_v11 = vor.u32 %v2792_v5, %v2653_v4  ;;  %v2655_v13 = vld [vmem:[#allocation5 + $0xd0] sm:$0xf0]  ;;  %v2661_v14 = vld [vmem:[#allocation5 + $0xc8] sm:$0xf]  ;;  %v2793_v15 = vld [vmem:[#allocation5 + $0xd4] sm:$0xf0] }
  0x34   :  { %613 = vmatpush.bf16.msrb.mxu1 %v3323_v59  ;;  %626 = vmatpush.bf16.msrb.mxu2 %v3326_v63  ;;  %v3335_v18 = vor.u32 %v2790_v10, %v2655_v13  ;;  %v3337_v22 = vor.u32 %v2793_v15, %v2661_v14  ;;  %v2791_v23 = vld [vmem:[#allocation5 + $0xcc] sm:$0xf]  ;;  %v2663_v26 = vld [vmem:[#allocation5 + $0xd8] sm:$0xf0]  ;;  %v2637_v29 = vld [vmem:[#allocation5 + $0xa0] sm:$0xf] }
  0x35   :  { %v3340_v27 = vor.u32 %v2791_v23, %v2663_v26  ;;  %v2788_v30 = vld [vmem:[#allocation5 + $0xac] sm:$0xf0]  ;;  %v2786_v31 = vld [vmem:[#allocation5 + $0xa4] sm:$0xf]  ;;  %v2639_v37 = vld [vmem:[#allocation5 + $0xb0] sm:$0xf0] }
  0x36   :  { %335 = vmatmul.bf16.vlgmr.msra.gmra.mxu3 %v95_v47  ;;  %601 = vmatpush.bf16.msrb.mxu0 %v3333_v11  ;;  %v3345_v35 = vor.u32 %v2788_v30, %v2637_v29  ;;  %v2645_v43 = vld [vmem:[#allocation5 + $0xa8] sm:$0xf]  ;;  %v2789_v44 = vld [vmem:[#allocation5 + $0xb4] sm:$0xf0]  ;;  %v3347_v47 = vor.u32 %v2786_v31, %v2639_v37  ;;  %v2787_v50 = vld [vmem:[#allocation5 + $0xac] sm:$0xf] }
  0x37   :  { %639 = vmatpush.bf16.msrb.mxu3 %v3328_v0  ;;  %v3349_v49 = vor.u32 %v2789_v44, %v2645_v43  ;;  %v2647_v52 = vld [vmem:[#allocation5 + $0xb8] sm:$0xf0]  ;;  %v2621_v56 = vld [vmem:[#allocation5 + $0x80] sm:$0xf]  ;;  %v2784_v60 = vld [vmem:[#allocation5 + $0x8c] sm:$0xf0] }
  0x38   :  { %614 = vmatpush.bf16.msrb.mxu1 %v3335_v18  ;;  %627 = vmatpush.bf16.msrb.mxu2 %v3337_v22  ;;  %v3352_v55 = vor.u32 %v2787_v50, %v2647_v52  ;;  %v2782_v61 = vld [vmem:[#allocation5 + $0x84] sm:$0xf]  ;;  %v3357_v62 = vor.u32 %v2784_v60, %v2621_v56  ;;  %v2623_v4 = vld [vmem:[#allocation5 + $0x90] sm:$0xf0]  ;;  %v2629_v5 = vld [vmem:[#allocation5 + $0x88] sm:$0xf] }
  0x39   :  { %v2785_v10 = vld [vmem:[#allocation5 + $0x94] sm:$0xf0]  ;;  %v3359_v13 = vor.u32 %v2782_v61, %v2623_v4  ;;  %v2783_v15 = vld [vmem:[#allocation5 + $0x8c] sm:$0xf]  ;;  %v2631_v23 = vld [vmem:[#allocation5 + $0x98] sm:$0xf0] }
  0x3a   :  { %602 = vmatpush.bf16.msrb.mxu0 %v3345_v35  ;;  %v3361_v14 = vor.u32 %v2785_v10, %v2629_v5  ;;  %v3364_v26 = vor.u32 %v2783_v15, %v2631_v23  ;;  %v2605_v29 = vld [vmem:[#allocation5 + $0x60] sm:$0xf]  ;;  %v2780_v30 = vld [vmem:[#allocation5 + $0x6c] sm:$0xf0]  ;;  %v2778_v31 = vld [vmem:[#allocation5 + $0x64] sm:$0xf] }
  0x3b   :  { %640 = vmatpush.bf16.msrb.mxu3 %v3340_v27  ;;  %v3369_v37 = vor.u32 %v2780_v30, %v2605_v29  ;;  %v2607_v43 = vld [vmem:[#allocation5 + $0x70] sm:$0xf0]  ;;  %v2613_v44 = vld [vmem:[#allocation5 + $0x68] sm:$0xf]  ;;  %v2781_v50 = vld [vmem:[#allocation5 + $0x74] sm:$0xf0] }
  0x3c   :  { %615 = vmatpush.bf16.msrb.mxu1 %v3347_v47  ;;  %628 = vmatpush.bf16.msrb.mxu2 %v3349_v49  ;;  %4565 = vst [vmem:[#allocation43_spill] sm:$0xff] %v3364_v26  ;;  %v3371_v52 = vor.u32 %v2778_v31, %v2607_v43  ;;  %v3373_v56 = vor.u32 %v2781_v50, %v2613_v44  ;;  %v2779_v60 = vld [vmem:[#allocation5 + $0x6c] sm:$0xf]  ;;  %v2615_v61 = vld [vmem:[#allocation5 + $0x78] sm:$0xf0] }
  0x3d   :  { %4566 = vst [vmem:[#allocation44_spill] sm:$0xff] %v3369_v37  ;;  %v3376_v4 = vor.u32 %v2779_v60, %v2615_v61  ;;  %v2589_v5 = vld [vmem:[#allocation5 + $0x40] sm:$0xf]  ;;  %v2776_v10 = vld [vmem:[#allocation5 + $0x4c] sm:$0xf0] }
  0x3e   :  { %603 = vmatpush.bf16.msrb.mxu0 %v3357_v62  ;;  %4567 = vst [vmem:[#allocation45_spill] sm:$0xff] %v3371_v52  ;;  %v2774_v15 = vld [vmem:[#allocation5 + $0x44] sm:$0xf]  ;;  %v3381_v23 = vor.u32 %v2776_v10, %v2589_v5  ;;  %v2591_v29 = vld [vmem:[#allocation5 + $0x50] sm:$0xf0] }
  0x3f   :  { %641 = vmatpush.bf16.msrb.mxu3 %v3352_v55  ;;  %4568 = vst [vmem:[#allocation46_spill] sm:$0xff] %v3373_v56  ;;  %v2597_v30 = vld [vmem:[#allocation5 + $0x48] sm:$0xf]  ;;  %v3383_v31 = vor.u32 %v2774_v15, %v2591_v29  ;;  %v2777_v43 = vld [vmem:[#allocation5 + $0x54] sm:$0xf0] }
  0x40   :  { %616 = vmatpush.bf16.msrb.mxu1 %v3359_v13  ;;  %629 = vmatpush.bf16.msrb.mxu2 %v3361_v14  ;;  %4569 = vst [vmem:[#allocation47_spill] sm:$0xff] %v3376_v4  ;;  %v2775_v44 = vld [vmem:[#allocation5 + $0x4c] sm:$0xf]  ;;  %v2599_v50 = vld [vmem:[#allocation5 + $0x58] sm:$0xf0]  ;;  %v3391_v61 = vor.u32 %v2777_v43, %v2597_v30 }
  0x41   :  { %4570 = vst [vmem:[#allocation48_spill] sm:$0xff] %v3381_v23  ;;  %v3388_v60 = vld [vmem:[%s4426_s2] sm:$0xf]  ;;  %v2772_v10 = vld [vmem:[#allocation5 + $0x2c] sm:$0xf0] }
  0x42   :  { %604 = vmatpush.bf16.msrb.mxu0 %v3369_v37  ;;  %4571 = vst [vmem:[#allocation49_spill] sm:$0xff] %v3383_v31  ;;  %v2573_v5 = vld [vmem:[#allocation5 + $0x20] sm:$0xf]  ;;  %v2770_v15 = vld [vmem:[#allocation5 + $0x24] sm:$0xf] }
  0x43   :  { %642 = vmatpush.bf16.msrb.mxu3 %v3364_v26  ;;  %4572 = vst [vmem:[#allocation50_spill] sm:$0xff] %v3391_v61  ;;  %v3398_v29 = vor.u32 %v2772_v10, %v2573_v5  ;;  %v2773_v37 = vld [vmem:[#allocation5 + $0x34] sm:$0xf0]  ;;  %v2771_v43 = vld [vmem:[#allocation5 + $0x2c] sm:$0xf] }
  0x44   :  { %617 = vmatpush.bf16.msrb.mxu1 %v3371_v52  ;;  %630 = vmatpush.bf16.msrb.mxu2 %v3373_v56  ;;  %v3393_v56 = vor.u32 %v2775_v44, %v2599_v50  ;;  %v2581_v52 = vld [vmem:[#allocation5 + $0x28] sm:$0xf]  ;;  %v2583_v44 = vld [vmem:[#allocation5 + $0x38] sm:$0xf0]  ;;  %v3405_v50 = vperm.slane %v3388_v60, 0 }
  0x45   :  { %4574 = vst [vmem:[#allocation52_spill] sm:$0xff] %v3398_v29  ;;  %v3402_v30 = vor.u32 %v2773_v37, %v2581_v52  ;;  %v2557_v5 = vld [vmem:[#allocation5] sm:$0xf]  ;;  %v2768_v10 = vld [vmem:[#allocation5 + $0xc] sm:$0xf0] }
  0x46   :  { %605 = vmatpush.bf16.msrb.mxu0 %v3381_v23  ;;  %4573 = vst [vmem:[#allocation51_spill] sm:$0xff] %v3393_v56  ;;  %v3413_v37 = vor.u32 %v2768_v10, %v2557_v5  ;;  %v2559_v52 = vld [vmem:[#allocation5 + $0x10] sm:$0xf0] }
  0x47   :  { %643 = vmatpush.bf16.msrb.mxu3 %v3376_v4  ;;  %v2575_v4 = vld [vmem:[#allocation5 + $0x30] sm:$0xf0]  ;;  %4576 = vst [vmem:[#allocation54_spill] sm:$0xff] %v3402_v30 }
  0x48   :  { %618 = vmatpush.bf16.msrb.mxu1 %v3383_v31  ;;  %631 = vmatpush.bf16.msrb.mxu2 %v3391_v61  ;;  %v3400_v26 = vor.u32 %v2770_v15, %v2575_v4  ;;  %4577 = vst [vmem:[#allocation55_spill] sm:$0xff] %v3405_v50  ;;  %v3408_v31 = vor.u32 %v2771_v43, %v2583_v44  ;;  %v2565_v4 = vld [vmem:[#allocation5 + $0x8] sm:$0xf]  ;;  %v2769_v15 = vld [vmem:[#allocation5 + $0x14] sm:$0xf0]  ;;  %v3416_v61 = vperm.slane %v3388_v60, 1 }
  0x49   :  { %v3420_v43 = vor.u32 %v2769_v15, %v2565_v4  ;;  %v2767_v44 = vld [vmem:[#allocation5 + $0xc] sm:$0xf]  ;;  %v3435_v4 = vperm.slane %v3388_v60, 2 }
  0x4a   :  { %4575 = vst [vmem:[#allocation53_spill] sm:$0xff] %v3400_v26  ;;  %606 = vmatpush.bf16.msrb.mxu0 %v3398_v29 }
  0x4b   :  { %644 = vmatpush.bf16.msrb.mxu3 %v3393_v56  ;;  %v2766_v56 = vld [vmem:[#allocation5 + $0x4] sm:$0xf]  ;;  %4578 = vst [vmem:[#allocation56_spill] sm:$0xff] %v3416_v61 }
  0x4c   :  { %619 = vmatpush.bf16.msrb.mxu1 %v3400_v26  ;;  %632 = vmatpush.bf16.msrb.mxu2 %v3402_v30  ;;  %v3418_v29 = vor.u32 %v2766_v56, %v2559_v52  ;;  %v2567_v26 = vld [vmem:[#allocation5 + $0x18] sm:$0xf0]  ;;  %4579 = vst [vmem:[#allocation57_spill] sm:$0xff] %v3435_v4 }
  0x4d   :  { %v3423_v23 = vor.u32 %v2767_v44, %v2567_v26 }
  0x4e   :  { %607 = vmatpush.bf16.msrb.mxu0 %v3413_v37 }
  0x4f   :  { %645 = vmatpush.bf16.msrb.mxu3 %v3408_v31 }
  0x50   :  { %620 = vmatpush.bf16.msrb.mxu1 %v3418_v29  ;;  %633 = vmatpush.bf16.msrb.mxu2 %v3420_v43 }
  0x52   :  { %653 = vmatpush.bf16.msra.mxu0 %v3222_v3 }
  0x53   :  { %646 = vmatpush.bf16.msrb.mxu3 %v3423_v23 }
  0x54   :  { %666 = vmatpush.bf16.msra.mxu1 %v3224_v7  ;;  %679 = vmatpush.bf16.msra.mxu2 %v3226_v8 }
  0x56   :  { %654 = vmatpush.bf16.msra.mxu0 %v3229_v12 }
  0x57   :  { %692 = vmatpush.bf16.msra.mxu3 %v3237_v21 }
  0x58   :  { %667 = vmatpush.bf16.msra.mxu1 %v3233_v16  ;;  %680 = vmatpush.bf16.msra.mxu2 %v3235_v17 }
  0x5a   :  { %655 = vmatpush.bf16.msra.mxu0 %v3241_v28 }
  0x5b   :  { %693 = vmatpush.bf16.msra.mxu3 %v3249_v34 }
  0x5c   :  { %668 = vmatpush.bf16.msra.mxu1 %v3245_v32  ;;  %681 = vmatpush.bf16.msra.mxu2 %v3247_v33 }
  0x5e   :  { %656 = vmatpush.bf16.msra.mxu0 %v3253_v41 }
  0x5f   :  { %694 = vmatpush.bf16.msra.mxu3 %v3255_v42 }
  0x60   :  { %669 = vmatpush.bf16.msra.mxu1 %v3259_v45  ;;  %682 = vmatpush.bf16.msra.mxu2 %v3261_v46 }
  0x62   :  { %657 = vmatpush.bf16.msra.mxu0 %v3265_v53 }
  0x63   :  { %695 = vmatpush.bf16.msra.mxu3 %v3267_v54 }
  0x64   :  { %670 = vmatpush.bf16.msra.mxu1 %v3271_v57  ;;  %683 = vmatpush.bf16.msra.mxu2 %v3273_v58 }
  0x66   :  { %658 = vmatpush.bf16.msra.mxu0 %v3277_v1 }
  0x67   :  { %696 = vmatpush.bf16.msra.mxu3 %v3279_v2 }
  0x68   :  { %671 = vmatpush.bf16.msra.mxu1 %v3283_v6  ;;  %684 = vmatpush.bf16.msra.mxu2 %v3285_v9 }
  0x6a   :  { %659 = vmatpush.bf16.msra.mxu0 %v3289_v19 }
  0x6b   :  { %697 = vmatpush.bf16.msra.mxu3 %v3291_v20 }
  0x6c   :  { %672 = vmatpush.bf16.msra.mxu1 %v3295_v24  ;;  %685 = vmatpush.bf16.msra.mxu2 %v3297_v25 }
  0x6e   :  { %660 = vmatpush.bf16.msra.mxu0 %v3301_v36 }
  0x6f   :  { %698 = vmatpush.bf16.msra.mxu3 %v3306_v38 }
  0x70   :  { %673 = vmatpush.bf16.msra.mxu1 %v3310_v39  ;;  %686 = vmatpush.bf16.msra.mxu2 %v3312_v40 }
  0x73   :  { %699 = vmatpush.bf16.msra.mxu3 %v3318_v48 }
  0xae   :  { %v297_v30 = vpop.f32.mrf.mxu0 }
  0xaf   :  { %v298_v5 = vadd.f32 %v297_v30, %v3405_v50  ;;  %v310_v10 = vpop.f32.mrf.mxu1 }
  0xb0   :  { %v311_v56 = vadd.f32 %v310_v10, %v3416_v61 }
  0xb1   :  { %v2551_v26 = vmul.f32 -1.442695, %v298_v5 }
  0xb2   :  { %v2552_v52 = vmul.f32 -1.442695, %v311_v56 }
  0xb3   :  { %2807 = vpow2.f32 %v2551_v26 }
  0xb4   :  { %2809 = vpow2.f32 %v2552_v52 }
  0xb6   :  { %v323_v30 = vpop.f32.mrf.mxu2  ;;  %v299_v44 = vpop.f32.mrf.mxu0 }
  0xb7   :  { %v324_v15 = vadd.f32 %v323_v30, %v3435_v4  ;;  %v312_v5 = vpop.f32.mrf.mxu1  ;;  %v3448_v30 = vperm.slane %v3388_v60, 3 }
  0xb9   :  { %v2553_v10 = vmul.f32 -1.442695, %v324_v15  ;;  %v2808_v56 = vpop.eup %2807  ;;  %v336_v26 = vpop.f32.mrf.mxu3  ;;  %4580 = vst [vmem:[#allocation58_spill] sm:$0xff] %v3448_v30 }
  0xba   :  { %v2810_v52 = vpop.eup %2809  ;;  %v349_v61 = vadd.f32 1.0, %v2808_v56  ;;  %v337_v5 = vadd.f32 %v336_v26, %v3448_v30 }
  0xbb   :  { %2811 = vpow2.f32 %v2553_v10  ;;  %v350_v50 = vadd.f32 1.0, %v2810_v52 }
  0xbc   :  { %2813 = vrcp.f32 %v349_v61  ;;  %v361_v1 = vand.u32 2147483647, %v349_v61  ;;  %vm357_vm2 = vweird.f32 %v349_v61 }
  0xbd   :  { %2815 = vrcp.f32 %v350_v50  ;;  %v376_v57 = vand.u32 2147483647, %v350_v50  ;;  %vm372_vm3 = vweird.f32 %v350_v50 }
  0xbe   :  { %v325_v15 = vpop.f32.mrf.mxu2  ;;  %vm362_vm5 = vcmp.eq.f32.partialorder %v361_v1, 8.507059e+37 }
  0xbf   :  { %vm377_vm7 = vcmp.eq.f32.partialorder %v376_v57, 8.507059e+37 }
  0xc1   :  { %v2812_v44 = vpop.eup %2811  ;;  %v338_v60 = vpop.f32.mrf.mxu3 }
  0xc2   :  { %v351_v10 = vadd.f32 1.0, %v2812_v44  ;;  %v2814_v56 = vpop.eup %2813  ;;  %v363_v44 = vand.u32 2147483648, %v349_v61  ;;  %v378_v60 = vand.u32 2147483648, %v350_v50 }
  0xc3   :  { %v2816_v52 = vpop.eup %2815  ;;  %v353_v15 = vmul.f32 %v2814_v56, %v349_v61  ;;  %vm358_vm0 = vweird.f32 %v2814_v56 }
  0xc4   :  { %2817 = vrcp.f32 %v351_v10  ;;  %v368_v4 = vmul.f32 %v2816_v52, %v350_v50  ;;  %vm373_vm1 = vweird.f32 %v2816_v52  ;;  %vm359_vm4 = vmor %vm357_vm2, %vm358_vm0  ;;  %v364_v19 = vor.u32 1.1754944e-38, %v363_v44 }
  0xc5   :  { %2819 = vtanh.f32 %v337_v5  ;;  %v354_v26 = vsub.f32 1.0, %v353_v15  ;;  %vm374_vm6 = vmor %vm372_vm3, %vm373_vm1  ;;  %v393_v1 = vand.u32 2147483648, %v351_v10  ;;  %vm387_vm9 = vweird.f32 %v351_v10 }
  0xc6   :  { %v369_v30 = vsub.f32 1.0, %v368_v4 }
  0xc7   :  { %v355_v2 = vmul.f32 %v2814_v56, %v354_v26 }
  0xc8   :  { %v370_v58 = vmul.f32 %v2816_v52, %v369_v30  ;;  %v379_v30 = vor.u32 1.1754944e-38, %v378_v60 }
  0xc9   :  { %v356_v9 = vadd.f32 %v2814_v56, %v355_v2 }
  0xca   :  { %v2818_v5 = vpop.eup %2817  ;;  %v371_v26 = vadd.f32 %v2816_v52, %v370_v58 }
  0xcb   :  { %v2820_v4 = vpop.eup %2819  ;;  %v383_v15 = vmul.f32 %v2818_v5, %v351_v10  ;;  %v360_v20 = vsel %vm359_vm4, %v2814_v56, %v356_v9  ;;  %vm388_vm8 = vweird.f32 %v2818_v5 }
  0xcc   :  { %v365_v25 = vsel %vm362_vm5, %v364_v19, %v360_v20  ;;  %v375_v6 = vsel %vm374_vm6, %v2816_v52, %v371_v26  ;;  %v391_v19 = vand.u32 2147483647, %v351_v10  ;;  %vm389_vm10 = vmor %vm387_vm9, %vm388_vm8  ;;  %v394_v20 = vor.u32 1.1754944e-38, %v393_v1  ;;  %v4584_v26 = vld [vmem:[#allocation46_spill] sm:$0xff]  ;;  %v4591_v1 = vld [vmem:[#allocation53_spill] sm:$0xff] }
  0xcd   :  { %v384_v24 = vsub.f32 1.0, %v383_v15  ;;  %v380_v2 = vsel %vm377_vm7, %v379_v30, %v375_v6  ;;  %v399_v61 = vmul.f32 %v2820_v4, %v365_v25  ;;  %v4582_v4 = vld [vmem:[#allocation44_spill] sm:$0xff]  ;;  %v4583_v15 = vld [vmem:[#allocation45_spill] sm:$0xff]  ;;  %v4585_v30 = vld [vmem:[#allocation47_spill] sm:$0xff] }
  0xce   :  { %v398_v50 = vmul.f32 0.0, %v380_v2  ;;  %vm392_vm11 = vcmp.eq.f32.partialorder %v391_v19, 8.507059e+37  ;;  %v4586_v2 = vld [vmem:[#allocation48_spill] sm:$0xff]  ;;  %v4592_v19 = vld [vmem:[#allocation54_spill] sm:$0xff] }
  0xcf   :  { %v385_v58 = vmul.f32 %v2818_v5, %v384_v24  ;;  %v2554_v24 = vld [vmem:[%s4424_s0 + $0x2] sm:$0x3] }
  0xd0   :  { %v3471_v44 = vadd.f32 %v399_v61, %v398_v50  ;;  %v4587_v61 = vld [vmem:[#allocation49_spill] sm:$0xff]  ;;  %v4589_v50 = vld [vmem:[#allocation51_spill] sm:$0xff] }
  0xd1   :  { %v386_v9 = vadd.f32 %v2818_v5, %v385_v58  ;;  %v4588_v58 = vld [vmem:[#allocation50_spill] sm:$0xff] }
  0xd2   :  { %2821 = vtanh.f32 %v3471_v44 }
  0xd3   :  { %v390_v57 = vsel %vm389_vm10, %v2818_v5, %v386_v9  ;;  %v4581_v5 = vld [vmem:[#allocation43_spill] sm:$0xff]  ;;  %v4590_v9 = vld [vmem:[#allocation52_spill] sm:$0xff] }
  0xd4   :  { %v395_v6 = vsel %vm392_vm11, %v394_v20, %v390_v57  ;;  %v4593_v57 = vld [vmem:[#allocation28_spill] sm:$0xff]  ;;  %v4594_v20 = vld [vmem:[#allocation29_spill] sm:$0xff] }
  0xd8   :  { %v2822_v56 = vpop.eup %2821 }
  0xd9   :  { %v402_v25 = vmul.f32 %v2822_v56, %v395_v6  ;;  %v4595_v56 = vld [vmem:[#allocation31_spill] sm:$0xff]  ;;  %v4596_v6 = vld [vmem:[#allocation30_spill] sm:$0xff] }
  0xdb   :  { %v407_v52 = vpack.c.bf16 %v402_v25, %v402_v25  ;;  %v406_v10 = vadd.f32 %v2554_v24, %v402_v25  ;;  %v4597_v25 = vld [vmem:[#allocation32_spill] sm:$0xff]  ;;  %v4599_v24 = vld [vmem:[#allocation35_spill] sm:$0xff] }
  0xdd   :  { %608 = vmatmul.bf16.vlgmr.msrb.gmra.mxu0 %v407_v52  ;;  %621 = vmatmul.bf16.vlgmr.msrb.gmra.mxu1 %v407_v52  ;;  %v652_v60 = vpack.c.bf16 %v406_v10, %v406_v10  ;;  %v4600_v10 = vld [vmem:[#allocation34_spill] sm:$0xff] }
  0xde   :  { %634 = vmatmul.bf16.vlgmr.msrb.gmra.mxu2 %v407_v52  ;;  %647 = vmatmul.bf16.vlgmr.msrb.gmra.mxu3 %v407_v52  ;;  %v4598_v52 = vld [vmem:[#allocation33_spill] sm:$0xff] }
  0xdf   :  { %836 = vmatpush.bf16.msrb.mxu0 %v3321_v51  ;;  %849 = vmatpush.bf16.msrb.mxu1 %v3323_v59 }
  0xe0   :  { %862 = vmatpush.bf16.msrb.mxu2 %v3326_v63  ;;  %875 = vmatpush.bf16.msrb.mxu3 %v3328_v0 }
  0xe3   :  { %837 = vmatpush.bf16.msrb.mxu0 %v3333_v11  ;;  %850 = vmatpush.bf16.msrb.mxu1 %v3335_v18 }
  0xe4   :  { %863 = vmatpush.bf16.msrb.mxu2 %v3337_v22  ;;  %876 = vmatpush.bf16.msrb.mxu3 %v3340_v27 }
  0xe7   :  { %838 = vmatpush.bf16.msrb.mxu0 %v3345_v35  ;;  %851 = vmatpush.bf16.msrb.mxu1 %v3347_v47 }
  0xe8   :  { %864 = vmatpush.bf16.msrb.mxu2 %v3349_v49  ;;  %877 = vmatpush.bf16.msrb.mxu3 %v3352_v55 }
  0xeb   :  { %839 = vmatpush.bf16.msrb.mxu0 %v3357_v62  ;;  %852 = vmatpush.bf16.msrb.mxu1 %v3359_v13 }
  0xec   :  { %865 = vmatpush.bf16.msrb.mxu2 %v3361_v14  ;;  %878 = vmatpush.bf16.msrb.mxu3 %v4581_v5 }
  0xed   :  { %661 = vmatmul.bf16.vlgmr.msra.gmra.mxu0 %v652_v60  ;;  %674 = vmatmul.bf16.vlgmr.msra.gmra.mxu1 %v652_v60 }
  0xee   :  { %687 = vmatmul.bf16.vlgmr.msra.gmra.mxu2 %v652_v60  ;;  %700 = vmatmul.bf16.vlgmr.msra.gmra.mxu3 %v652_v60  ;;  %v4601_v60 = vld [vmem:[#allocation36_spill] sm:$0xff] }
  0xef   :  { %840 = vmatpush.bf16.msrb.mxu0 %v4582_v4  ;;  %853 = vmatpush.bf16.msrb.mxu1 %v4583_v15 }
  0xf0   :  { %866 = vmatpush.bf16.msrb.mxu2 %v4584_v26  ;;  %879 = vmatpush.bf16.msrb.mxu3 %v4585_v30 }
  0xf3   :  { %841 = vmatpush.bf16.msrb.mxu0 %v4586_v2  ;;  %854 = vmatpush.bf16.msrb.mxu1 %v4587_v61 }
  0xf4   :  { %867 = vmatpush.bf16.msrb.mxu2 %v4588_v58  ;;  %880 = vmatpush.bf16.msrb.mxu3 %v4589_v50 }
  0xf7   :  { %842 = vmatpush.bf16.msrb.mxu0 %v4590_v9  ;;  %855 = vmatpush.bf16.msrb.mxu1 %v4591_v1 }
  0xf8   :  { %868 = vmatpush.bf16.msrb.mxu2 %v4592_v19  ;;  %881 = vmatpush.bf16.msrb.mxu3 %v3408_v31 }
  0xfb   :  { %843 = vmatpush.bf16.msrb.mxu0 %v3413_v37  ;;  %856 = vmatpush.bf16.msrb.mxu1 %v3418_v29 }
  0xfc   :  { %869 = vmatpush.bf16.msrb.mxu2 %v3420_v43  ;;  %882 = vmatpush.bf16.msrb.mxu3 %v3423_v23 }
  0xff   :  { %889 = vmatpush.bf16.msra.mxu0 %v3222_v3  ;;  %902 = vmatpush.bf16.msra.mxu1 %v3224_v7 }
 0x100   :  { %915 = vmatpush.bf16.msra.mxu2 %v3226_v8  ;;  %928 = vmatpush.bf16.msra.mxu3 %v3237_v21 }
 0x103   :  { %890 = vmatpush.bf16.msra.mxu0 %v3229_v12  ;;  %903 = vmatpush.bf16.msra.mxu1 %v3233_v16 }
 0x104   :  { %916 = vmatpush.bf16.msra.mxu2 %v3235_v17  ;;  %929 = vmatpush.bf16.msra.mxu3 %v3249_v34 }
 0x107   :  { %891 = vmatpush.bf16.msra.mxu0 %v3241_v28  ;;  %904 = vmatpush.bf16.msra.mxu1 %v3245_v32  ;;  %v4608_v32 = vld [vmem:[#allocation57_spill] sm:$0xff] }
 0x108   :  { %917 = vmatpush.bf16.msra.mxu2 %v3247_v33  ;;  %930 = vmatpush.bf16.msra.mxu3 %v3255_v42 }
 0x10b   :  { %892 = vmatpush.bf16.msra.mxu0 %v3253_v41  ;;  %905 = vmatpush.bf16.msra.mxu1 %v3259_v45 }
 0x10c   :  { %918 = vmatpush.bf16.msra.mxu2 %v3261_v46  ;;  %931 = vmatpush.bf16.msra.mxu3 %v3267_v54  ;;  %v4602_v54 = vld [vmem:[#allocation37_spill] sm:$0xff] }
 0x10f   :  { %893 = vmatpush.bf16.msra.mxu0 %v3265_v53  ;;  %906 = vmatpush.bf16.msra.mxu1 %v4593_v57 }
 0x110   :  { %919 = vmatpush.bf16.msra.mxu2 %v4594_v20  ;;  %932 = vmatpush.bf16.msra.mxu3 %v4595_v56 }
 0x113   :  { %894 = vmatpush.bf16.msra.mxu0 %v4596_v6  ;;  %907 = vmatpush.bf16.msra.mxu1 %v4597_v25 }
 0x114   :  { %920 = vmatpush.bf16.msra.mxu2 %v4598_v52  ;;  %933 = vmatpush.bf16.msra.mxu3 %v4599_v24  ;;  %v84_v24 = vld [vmem:[%s4428_s4] sm:$0xf] }
 0x115   :  { %v3544_v52 = vperm.slane %v84_v24, 0 }
 0x117   :  { %895 = vmatpush.bf16.msra.mxu0 %v4600_v10  ;;  %908 = vmatpush.bf16.msra.mxu1 %v4601_v60  ;;  %4603 = vst [vmem:[#allocation43_spill] sm:$0xff] %v3544_v52  ;;  %v3546_v10 = vperm.slane %v84_v24, 1 }
 0x118   :  { %921 = vmatpush.bf16.msra.mxu2 %v4602_v54  ;;  %934 = vmatpush.bf16.msra.mxu3 %v3306_v38 }
 0x119   :  { %4604 = vst [vmem:[#allocation44_spill] sm:$0xff] %v3546_v10 }
 0x11b   :  { %896 = vmatpush.bf16.msra.mxu0 %v3301_v36  ;;  %909 = vmatpush.bf16.msra.mxu1 %v3310_v39 }
 0x11c   :  { %922 = vmatpush.bf16.msra.mxu2 %v3312_v40  ;;  %935 = vmatpush.bf16.msra.mxu3 %v3318_v48  ;;  %v3550_v40 = vperm.slane %v84_v24, 2 }
 0x11e   :  { %4605 = vst [vmem:[#allocation45_spill] sm:$0xff] %v3550_v40 }
 0x15a   :  { %v609_v60 = vpop.f32.mrf.mxu0  ;;  %v622_v54 = vpop.f32.mrf.mxu1 }
 0x15b   :  { %v610_v38 = vadd.f32 %v609_v60, %v3544_v52  ;;  %v623_v36 = vadd.f32 %v622_v54, %v3546_v10 }
 0x15d   :  { %v2683_v25 = vmul.f32 -1.442695, %v610_v38  ;;  %v2684_v39 = vmul.f32 -1.442695, %v623_v36 }
 0x15f   :  { %2823 = vpow2.f32 %v2683_v25  ;;  %v4607_v25 = vld [vmem:[#allocation56_spill] sm:$0xff] }
 0x160   :  { %2825 = vpow2.f32 %v2684_v39 }
 0x161   :  { %v635_v48 = vpop.f32.mrf.mxu2  ;;  %v648_v6 = vpop.f32.mrf.mxu3 }
 0x162   :  { %v611_v56 = vpop.f32.mrf.mxu0  ;;  %v624_v20 = vpop.f32.mrf.mxu1  ;;  %v636_v57 = vadd.f32 %v635_v48, %v3550_v40 }
 0x163   :  { %v4606_v56 = vld [vmem:[#allocation55_spill] sm:$0xff] }
 0x164   :  { %v2685_v60 = vmul.f32 -1.442695, %v636_v57 }
 0x165   :  { %v2824_v53 = vpop.eup %2823 }
 0x166   :  { %v2826_v46 = vpop.eup %2825  ;;  %v3553_v45 = vadd.f32 1.0, %v2824_v53 }
 0x167   :  { %v3555_v41 = vadd.f32 1.0, %v2826_v46 }
 0x168   :  { %2827 = vrcp.f32 %v3553_v45  ;;  %vm722_vm13 = vweird.f32 %v3553_v45 }
 0x169   :  { %2829 = vrcp.f32 %v3555_v41  ;;  %v637_v54 = vpop.f32.mrf.mxu2  ;;  %v650_v36 = vpop.f32.mrf.mxu3  ;;  %vm737_vm0 = vweird.f32 %v3555_v41 }
 0x16a   :  { %v662_v38 = vpop.f32.mrf.mxu0  ;;  %v675_v39 = vpop.f32.mrf.mxu1  ;;  %2831 = vpow2.f32 %v2685_v60 }
 0x16b   :  { %v663_v20 = vadd.f32 %v662_v38, %v4606_v56  ;;  %v676_v48 = vadd.f32 %v675_v39, %v4607_v25 }
 0x16d   :  { %v2686_v40 = vmul.f32 -1.442695, %v663_v20  ;;  %v2687_v10 = vmul.f32 -1.442695, %v676_v48  ;;  %v3566_v20 = vperm.slane %v84_v24, 3 }
 0x16e   :  { %v2828_v53 = vpop.eup %2827 }
 0x16f   :  { %v2830_v52 = vpop.eup %2829  ;;  %v718_v46 = vmul.f32 %v2828_v53, %v3553_v45  ;;  %2833 = vpow2.f32 %v2686_v40  ;;  %4609 = vst [vmem:[#allocation46_spill] sm:$0xff] %v3566_v20  ;;  %vm723_vm12 = vweird.f32 %v2828_v53 }
 0x170   :  { %v733_v57 = vmul.f32 %v2830_v52, %v3555_v41  ;;  %v2832_v42 = vpop.eup %2831  ;;  %2835 = vpow2.f32 %v2687_v10  ;;  %v649_v10 = vadd.f32 %v648_v6, %v3566_v20  ;;  %vm738_vm14 = vweird.f32 %v2830_v52  ;;  %vm3580_vm15 = vmor %vm722_vm13, %vm723_vm12 }
 0x171   :  { %v719_v33 = vsub.f32 1.0, %v718_v46  ;;  %v688_v54 = vpop.f32.mrf.mxu2  ;;  %v701_v36 = vpop.f32.mrf.mxu3  ;;  %v3564_v39 = vadd.f32 1.0, %v2832_v42  ;;  %vm739_vm1 = vmor %vm737_vm0, %vm738_vm14 }
 0x172   :  { %v689_v60 = vadd.f32 %v688_v54, %v4608_v32  ;;  %v664_v28 = vpop.f32.mrf.mxu0  ;;  %v677_v38 = vpop.f32.mrf.mxu1  ;;  %v734_v56 = vsub.f32 1.0, %v733_v57  ;;  %v741_v54 = vand.u32 2147483647, %v3555_v41 }
 0x173   :  { %v720_v25 = vmul.f32 %v2828_v53, %v719_v33  ;;  %v728_v33 = vand.u32 2147483648, %v3553_v45  ;;  %vm752_vm14 = vweird.f32 %v3564_v39 }
 0x174   :  { %v2688_v48 = vmul.f32 -1.442695, %v689_v60  ;;  %v735_v40 = vmul.f32 %v2830_v52, %v734_v56  ;;  %vm742_vm3 = vcmp.eq.f32.partialorder %v741_v54, 8.507059e+37 }
 0x175   :  { %v2834_v34 = vpop.eup %2833  ;;  %v721_v28 = vadd.f32 %v2828_v53, %v720_v25  ;;  %v729_v38 = vor.u32 1.1754944e-38, %v728_v33 }
 0x176   :  { %2837 = vpow2.f32 %v2688_v48  ;;  %v2836_v17 = vpop.eup %2835  ;;  %v3568_v16 = vadd.f32 1.0, %v2834_v34  ;;  %v726_v34 = vand.u32 2147483647, %v3553_v45  ;;  %v736_v56 = vadd.f32 %v2830_v52, %v735_v40 }
 0x177   :  { %2839 = vrcp.f32 %v3564_v39  ;;  %v3572_v46 = vadd.f32 1.0, %v2836_v17  ;;  %v743_v17 = vand.u32 2147483648, %v3555_v41  ;;  %v725_v25 = vsel %vm3580_vm15, %v2828_v53, %v721_v28 }
 0x178   :  { %2841 = vrcp.f32 %v3568_v16  ;;  %vm727_vm2 = vcmp.eq.f32.partialorder %v726_v34, 8.507059e+37  ;;  %v740_v40 = vsel %vm739_vm1, %v2830_v52, %v736_v56  ;;  %v791_v56 = vand.u32 2147483648, %v3568_v16 }
 0x179   :  { %v690_v42 = vpop.f32.mrf.mxu2  ;;  %v703_v24 = vpop.f32.mrf.mxu3  ;;  %2843 = vrcp.f32 %v3572_v46  ;;  %v744_v20 = vor.u32 1.1754944e-38, %v743_v17  ;;  %v730_v32 = vsel %vm727_vm2, %v729_v38, %v725_v25  ;;  %v789_v25 = vand.u32 2147483647, %v3568_v16 }
 0x17a   :  { %2845 = vtanh.f32 %v649_v10  ;;  %v4612_v42 = vld [vmem:[#allocation58_spill] sm:$0xff]  ;;  %v804_v12 = vand.u32 2147483647, %v3572_v46  ;;  %vm785_vm6 = vweird.f32 %v3568_v16  ;;  %vm800_vm7 = vweird.f32 %v3572_v46 }
 0x17b   :  { %v702_v10 = vadd.f32 %v701_v36, %v4612_v42  ;;  %v806_v36 = vand.u32 2147483648, %v3572_v46  ;;  %vm790_vm10 = vcmp.eq.f32.partialorder %v789_v25, 8.507059e+37 }
 0x17c   :  { %v2838_v57 = vpop.eup %2837  ;;  %vm805_vm11 = vcmp.eq.f32.partialorder %v804_v12, 8.507059e+37  ;;  %v758_v12 = vand.u32 2147483648, %v3564_v39 }
 0x17d   :  { %v3588_v60 = vadd.f32 1.0, %v2838_v57  ;;  %v3590_v45 = vpop.eup %2839  ;;  %v745_v57 = vsel %vm742_vm3, %v744_v20, %v740_v40  ;;  %v792_v40 = vor.u32 1.1754944e-38, %v791_v56 }
 0x17e   :  { %v2842_v48 = vpop.eup %2841  ;;  %v748_v33 = vmul.f32 %v3590_v45, %v3564_v39  ;;  %v763_v38 = vmul.f32 0.0, %v745_v57  ;;  %vm753_vm12 = vweird.f32 %v3590_v45 }
 0x17f   :  { %2847 = vrcp.f32 %v3588_v60  ;;  %v2844_v24 = vpop.eup %2843  ;;  %v781_v53 = vmul.f32 %v2842_v48, %v3568_v16  ;;  %vm786_vm4 = vweird.f32 %v2842_v48  ;;  %vm815_vm15 = vweird.f32 %v3588_v60  ;;  %vm754_vm0 = vmor %vm752_vm14, %vm753_vm12 }
 0x180   :  { %v796_v41 = vmul.f32 %v2844_v24, %v3572_v46  ;;  %v2846_v28 = vpop.eup %2845  ;;  %2849 = vtanh.f32 %v702_v10  ;;  %vm801_vm5 = vweird.f32 %v2844_v24  ;;  %v749_v21 = vsub.f32 1.0, %v748_v33  ;;  %vm787_vm8 = vmor %vm785_vm6, %vm786_vm4 }
 0x181   :  { %v782_v6 = vsub.f32 1.0, %v781_v53  ;;  %v764_v34 = vmul.f32 %v2846_v28, %v730_v32  ;;  %vm802_vm9 = vmor %vm800_vm7, %vm801_vm5  ;;  %v807_v53 = vor.u32 1.1754944e-38, %v806_v36  ;;  %v759_v36 = vor.u32 1.1754944e-38, %v758_v12  ;;  %v4623_v12 = vld [vmem:[#allocation23_spill] sm:$0xff] }
 0x182   :  { %v797_v52 = vsub.f32 1.0, %v796_v41 }
 0x183   :  { %v783_v17 = vmul.f32 %v2842_v48, %v782_v6  ;;  %v3605_v6 = vadd.f32 %v764_v34, %v763_v38 }
 0x184   :  { %v798_v42 = vmul.f32 %v2844_v24, %v797_v52 }
 0x185   :  { %v2848_v54 = vpop.eup %2847  ;;  %v784_v32 = vadd.f32 %v2842_v48, %v783_v17  ;;  %v750_v17 = vmul.f32 %v3590_v45, %v749_v21  ;;  %2851 = vtanh.f32 %v3605_v6  ;;  %v821_v21 = vand.u32 2147483648, %v3588_v60 }
 0x186   :  { %v811_v20 = vmul.f32 %v2848_v54, %v3588_v60  ;;  %v799_v10 = vadd.f32 %v2844_v24, %v798_v42  ;;  %v2850_v57 = vpop.eup %2849  ;;  %vm816_vm13 = vweird.f32 %v2848_v54 }
 0x187   :  { %v788_v28 = vsel %vm787_vm8, %v2842_v48, %v784_v32  ;;  %v751_v48 = vadd.f32 %v3590_v45, %v750_v17  ;;  %vm817_vm1 = vmor %vm815_vm15, %vm816_vm13  ;;  %v822_v25 = vor.u32 1.1754944e-38, %v821_v21  ;;  %v4618_v17 = vld [vmem:[#allocation16_spill] sm:$0xff]  ;;  %v4624_v21 = vld [vmem:[#allocation22_spill] sm:$0xff] }
 0x188   :  { %v812_v41 = vsub.f32 1.0, %v811_v20  ;;  %v793_v52 = vsel %vm790_vm10, %v792_v40, %v788_v28  ;;  %v803_v33 = vsel %vm802_vm9, %v2844_v24, %v799_v10  ;;  %v4614_v28 = vld [vmem:[#allocation13_spill] sm:$0xff] }
 0x189   :  { %v808_v16 = vsel %vm805_vm11, %v807_v53, %v803_v33  ;;  %v827_v7 = vmul.f32 %v2850_v57, %v793_v52  ;;  %v755_v24 = vsel %vm754_vm0, %v3590_v45, %v751_v48  ;;  %v4615_v57 = vld [vmem:[#allocation17_spill] sm:$0xff]  ;;  %v4616_v52 = vld [vmem:[#allocation14_spill] sm:$0xff]  ;;  %v4617_v33 = vld [vmem:[#allocation15_spill] sm:$0xff] }
 0x18a   :  { %v813_v8 = vmul.f32 %v2848_v54, %v812_v41  ;;  %v826_v46 = vmul.f32 %v808_v16, %v3471_v44  ;;  %v819_v44 = vand.u32 2147483647, %v3588_v60  ;;  %v4619_v16 = vld [vmem:[#allocation21_spill] sm:$0xff]  ;;  %v4621_v48 = vld [vmem:[#allocation19_spill] sm:$0xff] }
 0x18b   :  { %v2852_v56 = vpop.eup %2851 }
 0x18c   :  { %v3610_v42 = vadd.f32 %v827_v7, %v826_v46  ;;  %v814_v34 = vadd.f32 %v2848_v54, %v813_v8  ;;  %v756_v7 = vand.u32 2147483647, %v3564_v39  ;;  %vm820_vm3 = vcmp.eq.f32.partialorder %v819_v44, 8.507059e+37  ;;  %v2689_v39 = vld [vmem:[%s4424_s0 + $0x4] sm:$0x3]  ;;  %v4620_v46 = vld [vmem:[#allocation18_spill] sm:$0xff] }
 0x18d   :  { %v4626_v44 = vld [vmem:[#allocation25_spill] sm:$0xff] }
 0x18e   :  { %2853 = vtanh.f32 %v3610_v42  ;;  %v818_v8 = vsel %vm817_vm1, %v2848_v54, %v814_v34  ;;  %vm757_vm2 = vcmp.eq.f32.partialorder %v756_v7, 8.507059e+37  ;;  %v4613_v54 = vld [vmem:[#allocation12_spill] sm:$0xff] }
 0x18f   :  { %v760_v20 = vsel %vm757_vm2, %v759_v36, %v755_v24  ;;  %v823_v32 = vsel %vm820_vm3, %v822_v25, %v818_v8  ;;  %v4622_v34 = vld [vmem:[#allocation20_spill] sm:$0xff]  ;;  %v4627_v24 = vld [vmem:[#allocation27_spill] sm:$0xff]  ;;  %v4628_v8 = vld [vmem:[#allocation26_spill] sm:$0xff] }
 0x190   :  { %v767_v40 = vmul.f32 %v2852_v56, %v760_v20  ;;  %v4625_v7 = vld [vmem:[#allocation24_spill] sm:$0xff]  ;;  %v4630_v36 = vld [vmem:[#allocation29_spill] sm:$0xff]  ;;  %v4631_v25 = vld [vmem:[#allocation31_spill] sm:$0xff] }
 0x191   :  { %v4629_v56 = vld [vmem:[#allocation28_spill] sm:$0xff] }
 0x192   :  { %v4633_v20 = vld [vmem:[#allocation32_spill] sm:$0xff] }
 0x194   :  { %v2854_v38 = vpop.eup %2853 }
 0x195   :  { %v830_v10 = vmul.f32 %v2854_v38, %v823_v32  ;;  %v4632_v38 = vld [vmem:[#allocation30_spill] sm:$0xff]  ;;  %v4634_v32 = vld [vmem:[#allocation33_spill] sm:$0xff] }
 0x197   :  { %v831_v53 = vadd.f32 %v830_v10, %v767_v40  ;;  %v834_v60 = vadd.f32 %v2689_v39, %v830_v10  ;;  %v4635_v40 = vld [vmem:[#allocation35_spill] sm:$0xff]  ;;  %v4636_v10 = vld [vmem:[#allocation34_spill] sm:$0xff] }
 0x198   :  { %v4639_v39 = vld [vmem:[#allocation39_spill] sm:$0xff] }
 0x199   :  { %v835_v41 = vpack.c.bf16 %v831_v53, %v831_v53  ;;  %v888_v45 = vpack.c.bf16 %v834_v60, %v834_v60  ;;  %v4637_v53 = vld [vmem:[#allocation36_spill] sm:$0xff]  ;;  %v4640_v60 = vld [vmem:[#allocation38_spill] sm:$0xff] }
 0x19b   :  { %844 = vmatmul.bf16.vlgmr.msrb.gmra.mxu0 %v835_v41  ;;  %857 = vmatmul.bf16.vlgmr.msrb.gmra.mxu1 %v835_v41 }
 0x19c   :  { %870 = vmatmul.bf16.vlgmr.msrb.gmra.mxu2 %v835_v41  ;;  %883 = vmatmul.bf16.vlgmr.msrb.gmra.mxu3 %v835_v41  ;;  %v4638_v41 = vld [vmem:[#allocation37_spill] sm:$0xff] }
 0x19d   :  { %1072 = vmatpush.bf16.msrb.mxu0 %v3321_v51  ;;  %1085 = vmatpush.bf16.msrb.mxu1 %v3323_v59 }
 0x19e   :  { %1098 = vmatpush.bf16.msrb.mxu2 %v3326_v63  ;;  %1111 = vmatpush.bf16.msrb.mxu3 %v3328_v0 }
 0x1a1   :  { %1073 = vmatpush.bf16.msrb.mxu0 %v3333_v11  ;;  %1086 = vmatpush.bf16.msrb.mxu1 %v3335_v18 }
 0x1a2   :  { %1099 = vmatpush.bf16.msrb.mxu2 %v3337_v22  ;;  %1112 = vmatpush.bf16.msrb.mxu3 %v3340_v27 }
 0x1a5   :  { %1074 = vmatpush.bf16.msrb.mxu0 %v3345_v35  ;;  %1087 = vmatpush.bf16.msrb.mxu1 %v3347_v47 }
 0x1a6   :  { %1100 = vmatpush.bf16.msrb.mxu2 %v3349_v49  ;;  %1113 = vmatpush.bf16.msrb.mxu3 %v3352_v55 }
 0x1a9   :  { %1075 = vmatpush.bf16.msrb.mxu0 %v3357_v62  ;;  %1088 = vmatpush.bf16.msrb.mxu1 %v3359_v13 }
 0x1aa   :  { %1101 = vmatpush.bf16.msrb.mxu2 %v3361_v14  ;;  %1114 = vmatpush.bf16.msrb.mxu3 %v4581_v5 }
 0x1ab   :  { %897 = vmatmul.bf16.vlgmr.msra.gmra.mxu0 %v888_v45  ;;  %910 = vmatmul.bf16.vlgmr.msra.gmra.mxu1 %v888_v45 }
 0x1ac   :  { %923 = vmatmul.bf16.vlgmr.msra.gmra.mxu2 %v888_v45  ;;  %936 = vmatmul.bf16.vlgmr.msra.gmra.mxu3 %v888_v45  ;;  %v4641_v45 = vld [vmem:[#allocation40_spill] sm:$0xff] }
 0x1ad   :  { %1076 = vmatpush.bf16.msrb.mxu0 %v4582_v4  ;;  %1089 = vmatpush.bf16.msrb.mxu1 %v4583_v15 }
 0x1ae   :  { %1102 = vmatpush.bf16.msrb.mxu2 %v4584_v26  ;;  %1115 = vmatpush.bf16.msrb.mxu3 %v4585_v30 }
 0x1b1   :  { %1077 = vmatpush.bf16.msrb.mxu0 %v4586_v2  ;;  %1090 = vmatpush.bf16.msrb.mxu1 %v4587_v61 }
 0x1b2   :  { %1103 = vmatpush.bf16.msrb.mxu2 %v4588_v58  ;;  %1116 = vmatpush.bf16.msrb.mxu3 %v4589_v50 }
 0x1b5   :  { %1078 = vmatpush.bf16.msrb.mxu0 %v4590_v9  ;;  %1091 = vmatpush.bf16.msrb.mxu1 %v4591_v1 }
 0x1b6   :  { %1104 = vmatpush.bf16.msrb.mxu2 %v4592_v19  ;;  %1117 = vmatpush.bf16.msrb.mxu3 %v3408_v31 }
 0x1b9   :  { %1079 = vmatpush.bf16.msrb.mxu0 %v3413_v37  ;;  %1092 = vmatpush.bf16.msrb.mxu1 %v3418_v29 }
 0x1ba   :  { %1105 = vmatpush.bf16.msrb.mxu2 %v3420_v43  ;;  %1118 = vmatpush.bf16.msrb.mxu3 %v3423_v23 }
 0x1bd   :  { %1125 = vmatpush.bf16.msra.mxu0 %v3222_v3  ;;  %1138 = vmatpush.bf16.msra.mxu1 %v4613_v54 }
 0x1be   :  { %1151 = vmatpush.bf16.msra.mxu2 %v4614_v28  ;;  %1164 = vmatpush.bf16.msra.mxu3 %v4615_v57 }
 0x1c1   :  { %1126 = vmatpush.bf16.msra.mxu0 %v4616_v52  ;;  %1139 = vmatpush.bf16.msra.mxu1 %v4617_v33 }
 0x1c2   :  { %1152 = vmatpush.bf16.msra.mxu2 %v4618_v17  ;;  %1165 = vmatpush.bf16.msra.mxu3 %v4619_v16 }
 0x1c5   :  { %1127 = vmatpush.bf16.msra.mxu0 %v4620_v46  ;;  %1140 = vmatpush.bf16.msra.mxu1 %v4621_v48  ;;  %v4649_v48 = vld [vmem:[#allocation57_spill] sm:$0xff] }
 0x1c6   :  { %1153 = vmatpush.bf16.msra.mxu2 %v4622_v34  ;;  %1166 = vmatpush.bf16.msra.mxu3 %v4623_v12 }
 0x1c9   :  { %1128 = vmatpush.bf16.msra.mxu0 %v4624_v21  ;;  %1141 = vmatpush.bf16.msra.mxu1 %v4625_v7 }
 0x1ca   :  { %1154 = vmatpush.bf16.msra.mxu2 %v4626_v44  ;;  %1167 = vmatpush.bf16.msra.mxu3 %v4627_v24  ;;  %v4646_v44 = vld [vmem:[#allocation45_spill] sm:$0xff] }
 0x1cd   :  { %1129 = vmatpush.bf16.msra.mxu0 %v4628_v8  ;;  %1142 = vmatpush.bf16.msra.mxu1 %v4629_v56  ;;  %v4645_v56 = vld [vmem:[#allocation44_spill] sm:$0xff] }
 0x1ce   :  { %1155 = vmatpush.bf16.msra.mxu2 %v4630_v36  ;;  %1168 = vmatpush.bf16.msra.mxu3 %v4631_v25  ;;  %v4642_v25 = vld [vmem:[#allocation41_spill] sm:$0xff]  ;;  %v4644_v36 = vld [vmem:[#allocation43_spill] sm:$0xff] }
 0x1d1   :  { %1130 = vmatpush.bf16.msra.mxu0 %v4632_v38  ;;  %1143 = vmatpush.bf16.msra.mxu1 %v4633_v20  ;;  %v4643_v38 = vld [vmem:[#allocation42_spill] sm:$0xff] }
 0x1d2   :  { %1156 = vmatpush.bf16.msra.mxu2 %v4634_v32  ;;  %1169 = vmatpush.bf16.msra.mxu3 %v4635_v40 }
 0x1d5   :  { %1131 = vmatpush.bf16.msra.mxu0 %v4636_v10  ;;  %1144 = vmatpush.bf16.msra.mxu1 %v4637_v53 }
 0x1d6   :  { %1157 = vmatpush.bf16.msra.mxu2 %v4638_v41  ;;  %1170 = vmatpush.bf16.msra.mxu3 %v4639_v39 }
 0x1d9   :  { %1132 = vmatpush.bf16.msra.mxu0 %v4640_v60  ;;  %1145 = vmatpush.bf16.msra.mxu1 %v4641_v45 }
 0x1da   :  { %1158 = vmatpush.bf16.msra.mxu2 %v4642_v25  ;;  %1171 = vmatpush.bf16.msra.mxu3 %v4643_v38 }
 0x218   :  { %v845_v20 = vpop.f32.mrf.mxu0  ;;  %v858_v32 = vpop.f32.mrf.mxu1 }
 0x219   :  { %v846_v40 = vadd.f32 %v845_v20, %v4644_v36  ;;  %v859_v10 = vadd.f32 %v858_v32, %v4645_v56 }
 0x21b   :  { %v2690_v8 = vmul.f32 -1.442695, %v846_v40  ;;  %v2691_v53 = vmul.f32 -1.442695, %v859_v10  ;;  %v4647_v10 = vld [vmem:[#allocation55_spill] sm:$0xff] }
 0x21d   :  { %2855 = vpow2.f32 %v2690_v8 }
 0x21e   :  { %2857 = vpow2.f32 %v2691_v53 }
 0x21f   :  { %v871_v41 = vpop.f32.mrf.mxu2  ;;  %v884_v39 = vpop.f32.mrf.mxu3 }
 0x220   :  { %v847_v24 = vpop.f32.mrf.mxu0  ;;  %v860_v60 = vpop.f32.mrf.mxu1  ;;  %v872_v45 = vadd.f32 %v871_v41, %v4646_v44 }
 0x221   :  { %v4648_v24 = vld [vmem:[#allocation56_spill] sm:$0xff] }
 0x222   :  { %v2692_v12 = vmul.f32 -1.442695, %v872_v45 }
 0x223   :  { %v2856_v7 = vpop.eup %2855 }
 0x224   :  { %v2858_v25 = vpop.eup %2857  ;;  %v950_v21 = vadd.f32 1.0, %v2856_v7 }
 0x225   :  { %v3692_v38 = vadd.f32 1.0, %v2858_v25 }
 0x226   :  { %2859 = vrcp.f32 %v950_v21  ;;  %vm958_vm6 = vweird.f32 %v950_v21 }
 0x227   :  { %2861 = vrcp.f32 %v3692_v38  ;;  %v873_v20 = vpop.f32.mrf.mxu2  ;;  %v886_v32 = vpop.f32.mrf.mxu3  ;;  %vm973_vm8 = vweird.f32 %v3692_v38 }
 0x228   :  { %v898_v40 = vpop.f32.mrf.mxu0  ;;  %v911_v8 = vpop.f32.mrf.mxu1  ;;  %2863 = vpow2.f32 %v2692_v12 }
 0x229   :  { %v899_v53 = vadd.f32 %v898_v40, %v4647_v10  ;;  %v912_v60 = vadd.f32 %v911_v8, %v4648_v24 }
 0x22b   :  { %v2693_v56 = vmul.f32 -1.442695, %v899_v53  ;;  %v2694_v41 = vmul.f32 -1.442695, %v912_v60 }
 0x22c   :  { %v2860_v44 = vpop.eup %2859 }
 0x22d   :  { %v2862_v36 = vpop.eup %2861  ;;  %v954_v7 = vmul.f32 %v2860_v44, %v950_v21  ;;  %2865 = vpow2.f32 %v2693_v56  ;;  %v4650_v56 = vld [vmem:[#allocation46_spill] sm:$0xff]  ;;  %vm959_vm4 = vweird.f32 %v2860_v44 }
 0x22e   :  { %v969_v25 = vmul.f32 %v2862_v36, %v3692_v38  ;;  %v2864_v45 = vpop.eup %2863  ;;  %2867 = vpow2.f32 %v2694_v41  ;;  %v885_v41 = vadd.f32 %v884_v39, %v4650_v56  ;;  %vm974_vm5 = vweird.f32 %v2862_v36  ;;  %vm3710_vm7 = vmor %vm958_vm6, %vm959_vm4 }
 0x22f   :  { %v955_v34 = vsub.f32 1.0, %v954_v7  ;;  %v924_v20 = vpop.f32.mrf.mxu2  ;;  %v937_v32 = vpop.f32.mrf.mxu3  ;;  %v3699_v10 = vadd.f32 1.0, %v2864_v45  ;;  %vm3722_vm9 = vmor %vm973_vm8, %vm974_vm5 }
 0x230   :  { %v925_v46 = vadd.f32 %v924_v20, %v4649_v48  ;;  %v900_v12 = vpop.f32.mrf.mxu0  ;;  %v913_v16 = vpop.f32.mrf.mxu1  ;;  %v970_v40 = vsub.f32 1.0, %v969_v25 }
 0x231   :  { %v956_v53 = vmul.f32 %v2860_v44, %v955_v34  ;;  %v962_v34 = vand.u32 2147483647, %v950_v21  ;;  %vm988_vm6 = vweird.f32 %v3699_v10 }
 0x232   :  { %v2695_v8 = vmul.f32 -1.442695, %v925_v46  ;;  %v971_v17 = vmul.f32 %v2862_v36, %v970_v40  ;;  %v964_v46 = vand.u32 2147483648, %v950_v21  ;;  %v979_v40 = vand.u32 2147483648, %v3692_v38 }
 0x233   :  { %v2866_v60 = vpop.eup %2865  ;;  %v957_v20 = vadd.f32 %v2860_v44, %v956_v53  ;;  %vm963_vm10 = vcmp.eq.f32.partialorder %v962_v34, 8.507059e+37 }
 0x234   :  { %2869 = vpow2.f32 %v2695_v8  ;;  %v2868_v24 = vpop.eup %2867  ;;  %v3701_v33 = vadd.f32 1.0, %v2866_v60  ;;  %v972_v45 = vadd.f32 %v2862_v36, %v971_v17  ;;  %v977_v8 = vand.u32 2147483647, %v3692_v38 }
 0x235   :  { %2871 = vrcp.f32 %v3699_v10  ;;  %v3705_v7 = vadd.f32 1.0, %v2868_v24  ;;  %v961_v24 = vsel %vm3710_vm7, %v2860_v44, %v957_v20  ;;  %v965_v21 = vor.u32 1.1754944e-38, %v964_v46 }
 0x236   :  { %2873 = vrcp.f32 %v3701_v33  ;;  %v980_v38 = vor.u32 1.1754944e-38, %v979_v40  ;;  %vm978_vm11 = vcmp.eq.f32.partialorder %v977_v8, 8.507059e+37  ;;  %vm1021_vm14 = vweird.f32 %v3701_v33 }
 0x237   :  { %v926_v16 = vpop.f32.mrf.mxu2  ;;  %v939_v25 = vpop.f32.mrf.mxu3  ;;  %2875 = vrcp.f32 %v3705_v7  ;;  %v1040_v57 = vand.u32 2147483647, %v3705_v7  ;;  %vm1036_vm15 = vweird.f32 %v3705_v7 }
 0x238   :  { %2877 = vtanh.f32 %v885_v41  ;;  %v976_v41 = vsel %vm3722_vm9, %v2862_v36, %v972_v45  ;;  %v4655_v25 = vld [vmem:[#allocation58_spill] sm:$0xff]  ;;  %v1027_v45 = vand.u32 2147483648, %v3701_v33 }
 0x239   :  { %v938_v44 = vadd.f32 %v937_v32, %v4655_v25  ;;  %v981_v34 = vsel %vm978_vm11, %v980_v38, %v976_v41  ;;  %v1042_v32 = vand.u32 2147483648, %v3705_v7  ;;  %vm1041_vm3 = vcmp.eq.f32.partialorder %v1040_v57, 8.507059e+37 }
 0x23a   :  { %v2870_v12 = vpop.eup %2869  ;;  %v994_v57 = vand.u32 2147483648, %v3699_v10 }
 0x23b   :  { %v3718_v53 = vadd.f32 1.0, %v2870_v12  ;;  %v3720_v60 = vpop.eup %2871  ;;  %v966_v12 = vsel %vm963_vm10, %v965_v21, %v961_v24  ;;  %v1025_v24 = vand.u32 2147483647, %v3701_v33  ;;  %v999_v21 = vmul.f32 %v981_v34, %v3605_v6 }
 0x23c   :  { %v2874_v16 = vpop.eup %2873  ;;  %v984_v46 = vmul.f32 %v3720_v60, %v3699_v10  ;;  %v1043_v38 = vor.u32 1.1754944e-38, %v1042_v32  ;;  %vm989_vm4 = vweird.f32 %v3720_v60 }
 0x23d   :  { %2879 = vrcp.f32 %v3718_v53  ;;  %v2876_v20 = vpop.eup %2875  ;;  %v1017_v39 = vmul.f32 %v2874_v16, %v3701_v33  ;;  %vm1022_vm12 = vweird.f32 %v2874_v16  ;;  %vm1026_vm2 = vcmp.eq.f32.partialorder %v1025_v24, 8.507059e+37  ;;  %vm990_vm8 = vmor %vm988_vm6, %vm989_vm4 }
 0x23e   :  { %v1032_v56 = vmul.f32 %v2876_v20, %v3705_v7  ;;  %v2878_v48 = vpop.eup %2877  ;;  %2881 = vtanh.f32 %v938_v44  ;;  %vm1037_vm13 = vweird.f32 %v2876_v20  ;;  %v985_v41 = vsub.f32 1.0, %v984_v46  ;;  %vm1023_vm0 = vmor %vm1021_vm14, %vm1022_vm12 }
 0x23f   :  { %v1018_v52 = vsub.f32 1.0, %v1017_v39  ;;  %v1000_v17 = vmul.f32 %v2878_v48, %v966_v12  ;;  %vm1038_vm1 = vmor %vm1036_vm15, %vm1037_vm13  ;;  %vm1051_vm7 = vweird.f32 %v3718_v53  ;;  %v995_v24 = vor.u32 1.1754944e-38, %v994_v57  ;;  %v4666_v57 = vld [vmem:[#allocation23_spill] sm:$0xff] }
 0x240   :  { %v1033_v36 = vsub.f32 1.0, %v1032_v56 }
 0x241   :  { %v1019_v40 = vmul.f32 %v2874_v16, %v1018_v52  ;;  %v1028_v52 = vor.u32 1.1754944e-38, %v1027_v45  ;;  %v3742_v34 = vadd.f32 %v1000_v17, %v999_v21 }
 0x242   :  { %v1034_v25 = vmul.f32 %v2876_v20, %v1033_v36 }
 0x243   :  { %v2880_v8 = vpop.eup %2879  ;;  %v1020_v56 = vadd.f32 %v2874_v16, %v1019_v40  ;;  %v986_v40 = vmul.f32 %v3720_v60, %v985_v41  ;;  %2883 = vtanh.f32 %v3742_v34 }
 0x244   :  { %v1047_v48 = vmul.f32 %v2880_v8, %v3718_v53  ;;  %v1035_v44 = vadd.f32 %v2876_v20, %v1034_v25  ;;  %v2882_v6 = vpop.eup %2881  ;;  %vm1052_vm5 = vweird.f32 %v2880_v8 }
 0x245   :  { %v1024_v39 = vsel %vm1023_vm0, %v2874_v16, %v1020_v56  ;;  %v987_v16 = vadd.f32 %v3720_v60, %v986_v40  ;;  %vm1053_vm9 = vmor %vm1051_vm7, %vm1052_vm5  ;;  %v4661_v40 = vld [vmem:[#allocation16_spill] sm:$0xff] }
 0x246   :  { %v1048_v12 = vsub.f32 1.0, %v1047_v48  ;;  %v1029_v36 = vsel %vm1026_vm2, %v1028_v52, %v1024_v39  ;;  %v1039_v46 = vsel %vm1038_vm1, %v2876_v20, %v1035_v44  ;;  %v1057_v20 = vand.u32 2147483648, %v3718_v53  ;;  %v4657_v39 = vld [vmem:[#allocation13_spill] sm:$0xff] }
 0x247   :  { %v1044_v33 = vsel %vm1041_vm3, %v1043_v38, %v1039_v46  ;;  %v1063_v54 = vmul.f32 %v2882_v6, %v1029_v36  ;;  %v991_v45 = vsel %vm990_vm8, %v3720_v60, %v987_v16  ;;  %v4658_v6 = vld [vmem:[#allocation17_spill] sm:$0xff]  ;;  %v4659_v36 = vld [vmem:[#allocation14_spill] sm:$0xff]  ;;  %v4660_v46 = vld [vmem:[#allocation15_spill] sm:$0xff] }
 0x248   :  { %v1049_v28 = vmul.f32 %v2880_v8, %v1048_v12  ;;  %v1062_v7 = vmul.f32 %v1044_v33, %v3610_v42  ;;  %v992_v42 = vand.u32 2147483647, %v3699_v10  ;;  %v1058_v21 = vor.u32 1.1754944e-38, %v1057_v20  ;;  %v2696_v10 = vld [vmem:[%s4424_s0 + $0x6] sm:$0x3]  ;;  %v4662_v33 = vld [vmem:[#allocation21_spill] sm:$0xff] }
 0x249   :  { %v2884_v32 = vpop.eup %2883  ;;  %v4664_v16 = vld [vmem:[#allocation19_spill] sm:$0xff]  ;;  %v4667_v20 = vld [vmem:[#allocation22_spill] sm:$0xff] }
 0x24a   :  { %v3747_v25 = vadd.f32 %v1063_v54, %v1062_v7  ;;  %v1050_v17 = vadd.f32 %v2880_v8, %v1049_v28  ;;  %v1055_v54 = vand.u32 2147483647, %v3718_v53  ;;  %vm993_vm10 = vcmp.eq.f32.partialorder %v992_v42, 8.507059e+37  ;;  %v4663_v7 = vld [vmem:[#allocation18_spill] sm:$0xff]  ;;  %v4668_v42 = vld [vmem:[#allocation24_spill] sm:$0xff] }
 0x24b   :  { %v996_v48 = vsel %vm993_vm10, %v995_v24, %v991_v45  ;;  %v4670_v45 = vld [vmem:[#allocation27_spill] sm:$0xff]  ;;  %v4673_v24 = vld [vmem:[#allocation29_spill] sm:$0xff] }
 0x24c   :  { %2885 = vtanh.f32 %v3747_v25  ;;  %v1054_v28 = vsel %vm1053_vm9, %v2880_v8, %v1050_v17  ;;  %vm1056_vm11 = vcmp.eq.f32.partialorder %v1055_v54, 8.507059e+37  ;;  %v1003_v52 = vmul.f32 %v2884_v32, %v996_v48  ;;  %v4656_v8 = vld [vmem:[#allocation12_spill] sm:$0xff]  ;;  %v4669_v54 = vld [vmem:[#allocation25_spill] sm:$0xff] }
 0x24d   :  { %v1059_v56 = vsel %vm1056_vm11, %v1058_v21, %v1054_v28  ;;  %v4665_v17 = vld [vmem:[#allocation20_spill] sm:$0xff]  ;;  %v4671_v28 = vld [vmem:[#allocation26_spill] sm:$0xff]  ;;  %v4674_v21 = vld [vmem:[#allocation31_spill] sm:$0xff] }
 0x24e   :  { %v4672_v32 = vld [vmem:[#allocation28_spill] sm:$0xff] }
 0x24f   :  { %v4676_v48 = vld [vmem:[#allocation32_spill] sm:$0xff] }
 0x252   :  { %v2886_v41 = vpop.eup %2885 }
 0x253   :  { %v1066_v44 = vmul.f32 %v2886_v41, %v1059_v56  ;;  %v4675_v41 = vld [vmem:[#allocation30_spill] sm:$0xff]  ;;  %v4677_v56 = vld [vmem:[#allocation33_spill] sm:$0xff] }
 0x255   :  { %v1067_v38 = vadd.f32 %v1066_v44, %v1003_v52  ;;  %v1070_v53 = vadd.f32 %v2696_v10, %v1066_v44  ;;  %v4678_v52 = vld [vmem:[#allocation35_spill] sm:$0xff]  ;;  %v4679_v44 = vld [vmem:[#allocation34_spill] sm:$0xff] }
 0x256   :  { %v4682_v10 = vld [vmem:[#allocation39_spill] sm:$0xff] }
 0x257   :  { %v1071_v12 = vpack.c.bf16 %v1067_v38, %v1067_v38  ;;  %v1124_v60 = vpack.c.bf16 %v1070_v53, %v1070_v53  ;;  %v4680_v38 = vld [vmem:[#allocation36_spill] sm:$0xff]  ;;  %v4683_v53 = vld [vmem:[#allocation38_spill] sm:$0xff] }
 0x259   :  { %1080 = vmatmul.bf16.vlgmr.msrb.gmra.mxu0 %v1071_v12  ;;  %1093 = vmatmul.bf16.vlgmr.msrb.gmra.mxu1 %v1071_v12 }
 0x25a   :  { %1106 = vmatmul.bf16.vlgmr.msrb.gmra.mxu2 %v1071_v12  ;;  %1119 = vmatmul.bf16.vlgmr.msrb.gmra.mxu3 %v1071_v12  ;;  %v4681_v12 = vld [vmem:[#allocation37_spill] sm:$0xff] }
 0x25b   :  { %1308 = vmatpush.bf16.msrb.mxu0 %v3321_v51  ;;  %1321 = vmatpush.bf16.msrb.mxu1 %v3323_v59 }
 0x25c   :  { %1334 = vmatpush.bf16.msrb.mxu2 %v3326_v63  ;;  %1347 = vmatpush.bf16.msrb.mxu3 %v3328_v0 }
 0x25f   :  { %1309 = vmatpush.bf16.msrb.mxu0 %v3333_v11  ;;  %1322 = vmatpush.bf16.msrb.mxu1 %v3335_v18 }
 0x260   :  { %1335 = vmatpush.bf16.msrb.mxu2 %v3337_v22  ;;  %1348 = vmatpush.bf16.msrb.mxu3 %v3340_v27 }
 0x263   :  { %1310 = vmatpush.bf16.msrb.mxu0 %v3345_v35  ;;  %1323 = vmatpush.bf16.msrb.mxu1 %v3347_v47 }
 0x264   :  { %1336 = vmatpush.bf16.msrb.mxu2 %v3349_v49  ;;  %1349 = vmatpush.bf16.msrb.mxu3 %v3352_v55 }
 0x267   :  { %1311 = vmatpush.bf16.msrb.mxu0 %v3357_v62  ;;  %1324 = vmatpush.bf16.msrb.mxu1 %v3359_v13 }
 0x268   :  { %1337 = vmatpush.bf16.msrb.mxu2 %v3361_v14  ;;  %1350 = vmatpush.bf16.msrb.mxu3 %v4581_v5 }
 0x269   :  { %1133 = vmatmul.bf16.vlgmr.msra.gmra.mxu0 %v1124_v60  ;;  %1146 = vmatmul.bf16.vlgmr.msra.gmra.mxu1 %v1124_v60 }
 0x26a   :  { %1159 = vmatmul.bf16.vlgmr.msra.gmra.mxu2 %v1124_v60  ;;  %1172 = vmatmul.bf16.vlgmr.msra.gmra.mxu3 %v1124_v60  ;;  %v4684_v60 = vld [vmem:[#allocation40_spill] sm:$0xff] }
 0x26b   :  { %1312 = vmatpush.bf16.msrb.mxu0 %v4582_v4  ;;  %1325 = vmatpush.bf16.msrb.mxu1 %v4583_v15 }
 0x26c   :  { %1338 = vmatpush.bf16.msrb.mxu2 %v4584_v26  ;;  %1351 = vmatpush.bf16.msrb.mxu3 %v4585_v30 }
 0x26f   :  { %1313 = vmatpush.bf16.msrb.mxu0 %v4586_v2  ;;  %1326 = vmatpush.bf16.msrb.mxu1 %v4587_v61 }
 0x270   :  { %1339 = vmatpush.bf16.msrb.mxu2 %v4588_v58  ;;  %1352 = vmatpush.bf16.msrb.mxu3 %v4589_v50 }
 0x273   :  { %1314 = vmatpush.bf16.msrb.mxu0 %v4590_v9  ;;  %1327 = vmatpush.bf16.msrb.mxu1 %v4591_v1 }
 0x274   :  { %1340 = vmatpush.bf16.msrb.mxu2 %v4592_v19  ;;  %1353 = vmatpush.bf16.msrb.mxu3 %v3408_v31 }
 0x277   :  { %1315 = vmatpush.bf16.msrb.mxu0 %v3413_v37  ;;  %1328 = vmatpush.bf16.msrb.mxu1 %v3418_v29 }
 0x278   :  { %1341 = vmatpush.bf16.msrb.mxu2 %v3420_v43  ;;  %1354 = vmatpush.bf16.msrb.mxu3 %v3423_v23 }
 0x27b   :  { %1361 = vmatpush.bf16.msra.mxu0 %v3222_v3  ;;  %1374 = vmatpush.bf16.msra.mxu1 %v4656_v8 }
 0x27c   :  { %1387 = vmatpush.bf16.msra.mxu2 %v4657_v39  ;;  %1400 = vmatpush.bf16.msra.mxu3 %v4658_v6 }
 0x27f   :  { %1362 = vmatpush.bf16.msra.mxu0 %v4659_v36  ;;  %1375 = vmatpush.bf16.msra.mxu1 %v4660_v46 }
 0x280   :  { %1388 = vmatpush.bf16.msra.mxu2 %v4661_v40  ;;  %1401 = vmatpush.bf16.msra.mxu3 %v4662_v33 }
 0x283   :  { %1363 = vmatpush.bf16.msra.mxu0 %v4663_v7  ;;  %1376 = vmatpush.bf16.msra.mxu1 %v4664_v16  ;;  %v4692_v16 = vld [vmem:[#allocation57_spill] sm:$0xff] }
 0x284   :  { %1389 = vmatpush.bf16.msra.mxu2 %v4665_v17  ;;  %1402 = vmatpush.bf16.msra.mxu3 %v4666_v57 }
 0x287   :  { %1364 = vmatpush.bf16.msra.mxu0 %v4667_v20  ;;  %1377 = vmatpush.bf16.msra.mxu1 %v4668_v42 }
 0x288   :  { %1390 = vmatpush.bf16.msra.mxu2 %v4669_v54  ;;  %1403 = vmatpush.bf16.msra.mxu3 %v4670_v45  ;;  %v4689_v54 = vld [vmem:[#allocation45_spill] sm:$0xff] }
 0x28b   :  { %1365 = vmatpush.bf16.msra.mxu0 %v4671_v28  ;;  %1378 = vmatpush.bf16.msra.mxu1 %v4672_v32  ;;  %v4688_v32 = vld [vmem:[#allocation44_spill] sm:$0xff] }
 0x28c   :  { %1391 = vmatpush.bf16.msra.mxu2 %v4673_v24  ;;  %1404 = vmatpush.bf16.msra.mxu3 %v4674_v21  ;;  %v4685_v21 = vld [vmem:[#allocation41_spill] sm:$0xff]  ;;  %v4687_v24 = vld [vmem:[#allocation43_spill] sm:$0xff] }
 0x28f   :  { %1366 = vmatpush.bf16.msra.mxu0 %v4675_v41  ;;  %1379 = vmatpush.bf16.msra.mxu1 %v4676_v48  ;;  %v4686_v41 = vld [vmem:[#allocation42_spill] sm:$0xff] }
 0x290   :  { %1392 = vmatpush.bf16.msra.mxu2 %v4677_v56  ;;  %1405 = vmatpush.bf16.msra.mxu3 %v4678_v52 }
 0x293   :  { %1367 = vmatpush.bf16.msra.mxu0 %v4679_v44  ;;  %1380 = vmatpush.bf16.msra.mxu1 %v4680_v38 }
 0x294   :  { %1393 = vmatpush.bf16.msra.mxu2 %v4681_v12  ;;  %1406 = vmatpush.bf16.msra.mxu3 %v4682_v10 }
 0x297   :  { %1368 = vmatpush.bf16.msra.mxu0 %v4683_v53  ;;  %1381 = vmatpush.bf16.msra.mxu1 %v4684_v60 }
 0x298   :  { %1394 = vmatpush.bf16.msra.mxu2 %v4685_v21  ;;  %1407 = vmatpush.bf16.msra.mxu3 %v4686_v41 }
 0x2d6   :  { %v1081_v48 = vpop.f32.mrf.mxu0  ;;  %v1094_v56 = vpop.f32.mrf.mxu1 }
 0x2d7   :  { %v1082_v52 = vadd.f32 %v1081_v48, %v4687_v24  ;;  %v1095_v44 = vadd.f32 %v1094_v56, %v4688_v32 }
 0x2d9   :  { %v2697_v28 = vmul.f32 -1.442695, %v1082_v52  ;;  %v2698_v38 = vmul.f32 -1.442695, %v1095_v44  ;;  %v4690_v44 = vld [vmem:[#allocation55_spill] sm:$0xff] }
 0x2db   :  { %2887 = vpow2.f32 %v2697_v28 }
 0x2dc   :  { %2889 = vpow2.f32 %v2698_v38 }
 0x2dd   :  { %v1107_v12 = vpop.f32.mrf.mxu2  ;;  %v1120_v10 = vpop.f32.mrf.mxu3 }
 0x2de   :  { %v1083_v45 = vpop.f32.mrf.mxu0  ;;  %v1096_v53 = vpop.f32.mrf.mxu1  ;;  %v1108_v60 = vadd.f32 %v1107_v12, %v4689_v54 }
 0x2df   :  { %v4691_v45 = vld [vmem:[#allocation56_spill] sm:$0xff] }
 0x2e0   :  { %v2699_v57 = vmul.f32 -1.442695, %v1108_v60 }
 0x2e1   :  { %v2888_v42 = vpop.eup %2887 }
 0x2e2   :  { %v2890_v21 = vpop.eup %2889  ;;  %v1186_v20 = vadd.f32 1.0, %v2888_v42 }
 0x2e3   :  { %v3829_v41 = vadd.f32 1.0, %v2890_v21 }
 0x2e4   :  { %2891 = vrcp.f32 %v1186_v20  ;;  %vm1194_vm14 = vweird.f32 %v1186_v20 }
 0x2e5   :  { %2893 = vrcp.f32 %v3829_v41  ;;  %v1109_v48 = vpop.f32.mrf.mxu2  ;;  %v1122_v56 = vpop.f32.mrf.mxu3  ;;  %vm1209_vm0 = vweird.f32 %v3829_v41 }
 0x2e6   :  { %v1134_v52 = vpop.f32.mrf.mxu0  ;;  %v1147_v28 = vpop.f32.mrf.mxu1  ;;  %2895 = vpow2.f32 %v2699_v57 }
 0x2e7   :  { %v1135_v38 = vadd.f32 %v1134_v52, %v4690_v44  ;;  %v1148_v53 = vadd.f32 %v1147_v28, %v4691_v45 }
 0x2e9   :  { %v2700_v32 = vmul.f32 -1.442695, %v1135_v38  ;;  %v2701_v12 = vmul.f32 -1.442695, %v1148_v53 }
 0x2ea   :  { %v2892_v54 = vpop.eup %2891 }
 0x2eb   :  { %v2894_v24 = vpop.eup %2893  ;;  %v1190_v42 = vmul.f32 %v2892_v54, %v1186_v20  ;;  %2897 = vpow2.f32 %v2700_v32  ;;  %v4693_v32 = vld [vmem:[#allocation46_spill] sm:$0xff]  ;;  %vm1195_vm12 = vweird.f32 %v2892_v54 }
 0x2ec   :  { %v1205_v21 = vmul.f32 %v2894_v24, %v3829_v41  ;;  %v2896_v60 = vpop.eup %2895  ;;  %2899 = vpow2.f32 %v2701_v12  ;;  %v1121_v12 = vadd.f32 %v1120_v10, %v4693_v32  ;;  %vm1210_vm13 = vweird.f32 %v2894_v24  ;;  %vm3847_vm15 = vmor %vm1194_vm14, %vm1195_vm12 }
 0x2ed   :  { %v1191_v17 = vsub.f32 1.0, %v1190_v42  ;;  %v1160_v48 = vpop.f32.mrf.mxu2  ;;  %v1173_v56 = vpop.f32.mrf.mxu3  ;;  %v3836_v44 = vadd.f32 1.0, %v2896_v60  ;;  %vm3859_vm1 = vmor %vm1209_vm0, %vm1210_vm13 }
 0x2ee   :  { %v1161_v7 = vadd.f32 %v1160_v48, %v4692_v16  ;;  %v1136_v57 = vpop.f32.mrf.mxu0  ;;  %v1149_v33 = vpop.f32.mrf.mxu1  ;;  %v1206_v52 = vsub.f32 1.0, %v1205_v21 }
 0x2ef   :  { %v1192_v38 = vmul.f32 %v2892_v54, %v1191_v17  ;;  %v1198_v17 = vand.u32 2147483647, %v1186_v20  ;;  %vm1224_vm14 = vweird.f32 %v3836_v44 }
 0x2f0   :  { %v2702_v28 = vmul.f32 -1.442695, %v1161_v7  ;;  %v1207_v40 = vmul.f32 %v2894_v24, %v1206_v52  ;;  %v1200_v7 = vand.u32 2147483648, %v1186_v20  ;;  %v1215_v52 = vand.u32 2147483648, %v3829_v41 }
 0x2f1   :  { %v2898_v53 = vpop.eup %2897  ;;  %v1193_v48 = vadd.f32 %v2892_v54, %v1192_v38  ;;  %vm1199_vm2 = vcmp.eq.f32.partialorder %v1198_v17, 8.507059e+37 }
 0x2f2   :  { %2901 = vpow2.f32 %v2702_v28  ;;  %v2900_v45 = vpop.eup %2899  ;;  %v3838_v46 = vadd.f32 1.0, %v2898_v53  ;;  %v1208_v60 = vadd.f32 %v2894_v24, %v1207_v40  ;;  %v1213_v28 = vand.u32 2147483647, %v3829_v41 }
 0x2f3   :  { %2903 = vrcp.f32 %v3836_v44  ;;  %v3842_v42 = vadd.f32 1.0, %v2900_v45  ;;  %v1197_v45 = vsel %vm3847_vm15, %v2892_v54, %v1193_v48  ;;  %v1201_v20 = vor.u32 1.1754944e-38, %v1200_v7 }
 0x2f4   :  { %2905 = vrcp.f32 %v3838_v46  ;;  %v1216_v41 = vor.u32 1.1754944e-38, %v1215_v52  ;;  %vm1214_vm3 = vcmp.eq.f32.partialorder %v1213_v28, 8.507059e+37  ;;  %vm1257_vm6 = vweird.f32 %v3838_v46 }
 0x2f5   :  { %v1162_v33 = vpop.f32.mrf.mxu2  ;;  %v1175_v21 = vpop.f32.mrf.mxu3  ;;  %2907 = vrcp.f32 %v3842_v42  ;;  %v1276_v6 = vand.u32 2147483647, %v3842_v42  ;;  %vm1272_vm7 = vweird.f32 %v3842_v42 }
 0x2f6   :  { %2909 = vtanh.f32 %v1121_v12  ;;  %v1212_v12 = vsel %vm3859_vm1, %v2894_v24, %v1208_v60  ;;  %v4698_v21 = vld [vmem:[#allocation58_spill] sm:$0xff]  ;;  %v1263_v60 = vand.u32 2147483648, %v3838_v46 }
 0x2f7   :  { %v1174_v54 = vadd.f32 %v1173_v56, %v4698_v21  ;;  %v1217_v17 = vsel %vm1214_vm3, %v1216_v41, %v1212_v12  ;;  %v1278_v56 = vand.u32 2147483648, %v3842_v42  ;;  %vm1277_vm11 = vcmp.eq.f32.partialorder %v1276_v6, 8.507059e+37 }
 0x2f8   :  { %v2902_v57 = vpop.eup %2901  ;;  %v1230_v6 = vand.u32 2147483648, %v3836_v44 }
 0x2f9   :  { %v3855_v38 = vadd.f32 1.0, %v2902_v57  ;;  %v3857_v53 = vpop.eup %2903  ;;  %v1202_v57 = vsel %vm1199_vm2, %v1201_v20, %v1197_v45  ;;  %v1261_v45 = vand.u32 2147483647, %v3838_v46  ;;  %v1235_v20 = vmul.f32 %v1217_v17, %v3742_v34 }
 0x2fa   :  { %v2906_v33 = vpop.eup %2905  ;;  %v1220_v7 = vmul.f32 %v3857_v53, %v3836_v44  ;;  %v1279_v41 = vor.u32 1.1754944e-38, %v1278_v56  ;;  %vm1225_vm12 = vweird.f32 %v3857_v53 }
 0x2fb   :  { %2911 = vrcp.f32 %v3855_v38  ;;  %v2908_v48 = vpop.eup %2907  ;;  %v1253_v10 = vmul.f32 %v2906_v33, %v3838_v46  ;;  %vm1258_vm4 = vweird.f32 %v2906_v33  ;;  %vm1262_vm10 = vcmp.eq.f32.partialorder %v1261_v45, 8.507059e+37  ;;  %vm1226_vm0 = vmor %vm1224_vm14, %vm1225_vm12 }
 0x2fc   :  { %v1268_v32 = vmul.f32 %v2908_v48, %v3842_v42  ;;  %v2910_v16 = vpop.eup %2909  ;;  %2913 = vtanh.f32 %v1174_v54  ;;  %vm1273_vm5 = vweird.f32 %v2908_v48  ;;  %v1221_v12 = vsub.f32 1.0, %v1220_v7  ;;  %vm1259_vm8 = vmor %vm1257_vm6, %vm1258_vm4 }
 0x2fd   :  { %v1254_v36 = vsub.f32 1.0, %v1253_v10  ;;  %v1236_v40 = vmul.f32 %v2910_v16, %v1202_v57  ;;  %vm1274_vm9 = vmor %vm1272_vm7, %vm1273_vm5  ;;  %vm1287_vm15 = vweird.f32 %v3855_v38  ;;  %v1231_v45 = vor.u32 1.1754944e-38, %v1230_v6  ;;  %v4709_v6 = vld [vmem:[#allocation23_spill] sm:$0xff] }
 0x2fe   :  { %v1269_v24 = vsub.f32 1.0, %v1268_v32 }
 0x2ff   :  { %v1255_v52 = vmul.f32 %v2906_v33, %v1254_v36  ;;  %v1264_v36 = vor.u32 1.1754944e-38, %v1263_v60  ;;  %v3879_v17 = vadd.f32 %v1236_v40, %v1235_v20 }
 0x300   :  { %v1270_v21 = vmul.f32 %v2908_v48, %v1269_v24 }
 0x301   :  { %v2912_v28 = vpop.eup %2911  ;;  %v1256_v32 = vadd.f32 %v2906_v33, %v1255_v52  ;;  %v1222_v52 = vmul.f32 %v3857_v53, %v1221_v12  ;;  %2915 = vtanh.f32 %v3879_v17 }
 0x302   :  { %v1283_v16 = vmul.f32 %v2912_v28, %v3855_v38  ;;  %v1271_v54 = vadd.f32 %v2908_v48, %v1270_v21  ;;  %v2914_v34 = vpop.eup %2913  ;;  %vm1288_vm13 = vweird.f32 %v2912_v28 }
 0x303   :  { %v1260_v10 = vsel %vm1259_vm8, %v2906_v33, %v1256_v32  ;;  %v1223_v33 = vadd.f32 %v3857_v53, %v1222_v52  ;;  %vm1289_vm1 = vmor %vm1287_vm15, %vm1288_vm13  ;;  %v4704_v52 = vld [vmem:[#allocation16_spill] sm:$0xff] }
 0x304   :  { %v1284_v57 = vsub.f32 1.0, %v1283_v16  ;;  %v1265_v24 = vsel %vm1262_vm10, %v1264_v36, %v1260_v10  ;;  %v1275_v7 = vsel %vm1274_vm9, %v2908_v48, %v1271_v54  ;;  %v1293_v48 = vand.u32 2147483648, %v3855_v38  ;;  %v4700_v10 = vld [vmem:[#allocation13_spill] sm:$0xff] }
 0x305   :  { %v1280_v46 = vsel %vm1277_vm11, %v1279_v41, %v1275_v7  ;;  %v1299_v8 = vmul.f32 %v2914_v34, %v1265_v24  ;;  %v1227_v60 = vsel %vm1226_vm0, %v3857_v53, %v1223_v33  ;;  %v4701_v34 = vld [vmem:[#allocation17_spill] sm:$0xff]  ;;  %v4702_v24 = vld [vmem:[#allocation14_spill] sm:$0xff]  ;;  %v4703_v7 = vld [vmem:[#allocation15_spill] sm:$0xff] }
 0x306   :  { %v1285_v39 = vmul.f32 %v2912_v28, %v1284_v57  ;;  %v1298_v42 = vmul.f32 %v1280_v46, %v3747_v25  ;;  %v1228_v25 = vand.u32 2147483647, %v3836_v44  ;;  %v1294_v20 = vor.u32 1.1754944e-38, %v1293_v48  ;;  %v2703_v44 = vld [vmem:[%s4424_s0 + $0x8] sm:$0x3]  ;;  %v4705_v46 = vld [vmem:[#allocation21_spill] sm:$0xff] }
 0x307   :  { %v2916_v56 = vpop.eup %2915  ;;  %v4707_v33 = vld [vmem:[#allocation19_spill] sm:$0xff]  ;;  %v4710_v48 = vld [vmem:[#allocation22_spill] sm:$0xff] }
 0x308   :  { %v3884_v21 = vadd.f32 %v1299_v8, %v1298_v42  ;;  %v1286_v40 = vadd.f32 %v2912_v28, %v1285_v39  ;;  %v1291_v8 = vand.u32 2147483647, %v3855_v38  ;;  %vm1229_vm2 = vcmp.eq.f32.partialorder %v1228_v25, 8.507059e+37  ;;  %v4706_v42 = vld [vmem:[#allocation18_spill] sm:$0xff]  ;;  %v4711_v25 = vld [vmem:[#allocation24_spill] sm:$0xff] }
 0x309   :  { %v1232_v16 = vsel %vm1229_vm2, %v1231_v45, %v1227_v60  ;;  %v4713_v60 = vld [vmem:[#allocation27_spill] sm:$0xff]  ;;  %v4716_v45 = vld [vmem:[#allocation29_spill] sm:$0xff] }
 0x30a   :  { %2917 = vtanh.f32 %v3884_v21  ;;  %v1290_v39 = vsel %vm1289_vm1, %v2912_v28, %v1286_v40  ;;  %vm1292_vm3 = vcmp.eq.f32.partialorder %v1291_v8, 8.507059e+37  ;;  %v1239_v36 = vmul.f32 %v2916_v56, %v1232_v16  ;;  %v4699_v28 = vld [vmem:[#allocation12_spill] sm:$0xff]  ;;  %v4712_v8 = vld [vmem:[#allocation25_spill] sm:$0xff] }
 0x30b   :  { %v1295_v32 = vsel %vm1292_vm3, %v1294_v20, %v1290_v39  ;;  %v4708_v40 = vld [vmem:[#allocation20_spill] sm:$0xff]  ;;  %v4714_v39 = vld [vmem:[#allocation26_spill] sm:$0xff]  ;;  %v4717_v20 = vld [vmem:[#allocation31_spill] sm:$0xff] }
 0x30c   :  { %v4715_v56 = vld [vmem:[#allocation28_spill] sm:$0xff] }
 0x30d   :  { %v4719_v16 = vld [vmem:[#allocation32_spill] sm:$0xff] }
 0x310   :  { %v2918_v12 = vpop.eup %2917 }
 0x311   :  { %v1302_v54 = vmul.f32 %v2918_v12, %v1295_v32  ;;  %v4718_v12 = vld [vmem:[#allocation30_spill] sm:$0xff]  ;;  %v4720_v32 = vld [vmem:[#allocation33_spill] sm:$0xff] }
 0x313   :  { %v1303_v41 = vadd.f32 %v1302_v54, %v1239_v36  ;;  %v1306_v38 = vadd.f32 %v2703_v44, %v1302_v54  ;;  %v4721_v36 = vld [vmem:[#allocation35_spill] sm:$0xff]  ;;  %v4722_v54 = vld [vmem:[#allocation34_spill] sm:$0xff] }
 0x314   :  { %v4725_v44 = vld [vmem:[#allocation39_spill] sm:$0xff] }
 0x315   :  { %v1307_v57 = vpack.c.bf16 %v1303_v41, %v1303_v41  ;;  %v1360_v53 = vpack.c.bf16 %v1306_v38, %v1306_v38  ;;  %v4723_v41 = vld [vmem:[#allocation36_spill] sm:$0xff]  ;;  %v4726_v38 = vld [vmem:[#allocation38_spill] sm:$0xff] }
 0x317   :  { %1316 = vmatmul.bf16.vlgmr.msrb.gmra.mxu0 %v1307_v57  ;;  %1329 = vmatmul.bf16.vlgmr.msrb.gmra.mxu1 %v1307_v57 }
 0x318   :  { %1342 = vmatmul.bf16.vlgmr.msrb.gmra.mxu2 %v1307_v57  ;;  %1355 = vmatmul.bf16.vlgmr.msrb.gmra.mxu3 %v1307_v57  ;;  %v4724_v57 = vld [vmem:[#allocation37_spill] sm:$0xff] }
 0x319   :  { %1544 = vmatpush.bf16.msrb.mxu0 %v3321_v51  ;;  %1557 = vmatpush.bf16.msrb.mxu1 %v3323_v59 }
 0x31a   :  { %1570 = vmatpush.bf16.msrb.mxu2 %v3326_v63  ;;  %1583 = vmatpush.bf16.msrb.mxu3 %v3328_v0 }
 0x31d   :  { %1545 = vmatpush.bf16.msrb.mxu0 %v3333_v11  ;;  %1558 = vmatpush.bf16.msrb.mxu1 %v3335_v18 }
 0x31e   :  { %1571 = vmatpush.bf16.msrb.mxu2 %v3337_v22  ;;  %1584 = vmatpush.bf16.msrb.mxu3 %v3340_v27 }
 0x321   :  { %1546 = vmatpush.bf16.msrb.mxu0 %v3345_v35  ;;  %1559 = vmatpush.bf16.msrb.mxu1 %v3347_v47 }
 0x322   :  { %1572 = vmatpush.bf16.msrb.mxu2 %v3349_v49  ;;  %1585 = vmatpush.bf16.msrb.mxu3 %v3352_v55 }
 0x325   :  { %1547 = vmatpush.bf16.msrb.mxu0 %v3357_v62  ;;  %1560 = vmatpush.bf16.msrb.mxu1 %v3359_v13 }
 0x326   :  { %1573 = vmatpush.bf16.msrb.mxu2 %v3361_v14  ;;  %1586 = vmatpush.bf16.msrb.mxu3 %v4581_v5 }
 0x327   :  { %1369 = vmatmul.bf16.vlgmr.msra.gmra.mxu0 %v1360_v53  ;;  %1382 = vmatmul.bf16.vlgmr.msra.gmra.mxu1 %v1360_v53 }
 0x328   :  { %1395 = vmatmul.bf16.vlgmr.msra.gmra.mxu2 %v1360_v53  ;;  %1408 = vmatmul.bf16.vlgmr.msra.gmra.mxu3 %v1360_v53  ;;  %v4727_v53 = vld [vmem:[#allocation40_spill] sm:$0xff] }
 0x329   :  { %1548 = vmatpush.bf16.msrb.mxu0 %v4582_v4  ;;  %1561 = vmatpush.bf16.msrb.mxu1 %v4583_v15 }
 0x32a   :  { %1574 = vmatpush.bf16.msrb.mxu2 %v4584_v26  ;;  %1587 = vmatpush.bf16.msrb.mxu3 %v4585_v30 }
 0x32d   :  { %1549 = vmatpush.bf16.msrb.mxu0 %v4586_v2  ;;  %1562 = vmatpush.bf16.msrb.mxu1 %v4587_v61 }
 0x32e   :  { %1575 = vmatpush.bf16.msrb.mxu2 %v4588_v58  ;;  %1588 = vmatpush.bf16.msrb.mxu3 %v4589_v50 }
 0x331   :  { %1550 = vmatpush.bf16.msrb.mxu0 %v4590_v9  ;;  %1563 = vmatpush.bf16.msrb.mxu1 %v4591_v1 }
 0x332   :  { %1576 = vmatpush.bf16.msrb.mxu2 %v4592_v19  ;;  %1589 = vmatpush.bf16.msrb.mxu3 %v3408_v31 }
 0x335   :  { %1551 = vmatpush.bf16.msrb.mxu0 %v3413_v37  ;;  %1564 = vmatpush.bf16.msrb.mxu1 %v3418_v29 }
 0x336   :  { %1577 = vmatpush.bf16.msrb.mxu2 %v3420_v43  ;;  %1590 = vmatpush.bf16.msrb.mxu3 %v3423_v23 }
 0x339   :  { %1597 = vmatpush.bf16.msra.mxu0 %v3222_v3  ;;  %1610 = vmatpush.bf16.msra.mxu1 %v4699_v28 }
 0x33a   :  { %1623 = vmatpush.bf16.msra.mxu2 %v4700_v10  ;;  %1636 = vmatpush.bf16.msra.mxu3 %v4701_v34 }
 0x33d   :  { %1598 = vmatpush.bf16.msra.mxu0 %v4702_v24  ;;  %1611 = vmatpush.bf16.msra.mxu1 %v4703_v7 }
 0x33e   :  { %1624 = vmatpush.bf16.msra.mxu2 %v4704_v52  ;;  %1637 = vmatpush.bf16.msra.mxu3 %v4705_v46 }
 0x341   :  { %1599 = vmatpush.bf16.msra.mxu0 %v4706_v42  ;;  %1612 = vmatpush.bf16.msra.mxu1 %v4707_v33  ;;  %v4735_v33 = vld [vmem:[#allocation57_spill] sm:$0xff] }
 0x342   :  { %1625 = vmatpush.bf16.msra.mxu2 %v4708_v40  ;;  %1638 = vmatpush.bf16.msra.mxu3 %v4709_v6 }
 0x345   :  { %1600 = vmatpush.bf16.msra.mxu0 %v4710_v48  ;;  %1613 = vmatpush.bf16.msra.mxu1 %v4711_v25 }
 0x346   :  { %1626 = vmatpush.bf16.msra.mxu2 %v4712_v8  ;;  %1639 = vmatpush.bf16.msra.mxu3 %v4713_v60  ;;  %v4732_v8 = vld [vmem:[#allocation45_spill] sm:$0xff] }
 0x349   :  { %1601 = vmatpush.bf16.msra.mxu0 %v4714_v39  ;;  %1614 = vmatpush.bf16.msra.mxu1 %v4715_v56  ;;  %v4731_v56 = vld [vmem:[#allocation44_spill] sm:$0xff] }
 0x34a   :  { %1627 = vmatpush.bf16.msra.mxu2 %v4716_v45  ;;  %1640 = vmatpush.bf16.msra.mxu3 %v4717_v20  ;;  %v4728_v20 = vld [vmem:[#allocation41_spill] sm:$0xff]  ;;  %v4730_v45 = vld [vmem:[#allocation43_spill] sm:$0xff] }
 0x34d   :  { %1602 = vmatpush.bf16.msra.mxu0 %v4718_v12  ;;  %1615 = vmatpush.bf16.msra.mxu1 %v4719_v16  ;;  %v4729_v12 = vld [vmem:[#allocation42_spill] sm:$0xff] }
 0x34e   :  { %1628 = vmatpush.bf16.msra.mxu2 %v4720_v32  ;;  %1641 = vmatpush.bf16.msra.mxu3 %v4721_v36 }
 0x351   :  { %1603 = vmatpush.bf16.msra.mxu0 %v4722_v54  ;;  %1616 = vmatpush.bf16.msra.mxu1 %v4723_v41 }
 0x352   :  { %1629 = vmatpush.bf16.msra.mxu2 %v4724_v57  ;;  %1642 = vmatpush.bf16.msra.mxu3 %v4725_v44 }
 0x355   :  { %1604 = vmatpush.bf16.msra.mxu0 %v4726_v38  ;;  %1617 = vmatpush.bf16.msra.mxu1 %v4727_v53 }
 0x356   :  { %1630 = vmatpush.bf16.msra.mxu2 %v4728_v20  ;;  %1643 = vmatpush.bf16.msra.mxu3 %v4729_v12 }
 0x394   :  { %v1317_v16 = vpop.f32.mrf.mxu0  ;;  %v1330_v32 = vpop.f32.mrf.mxu1 }
 0x395   :  { %v1318_v36 = vadd.f32 %v1317_v16, %v4730_v45  ;;  %v1331_v54 = vadd.f32 %v1330_v32, %v4731_v56 }
 0x397   :  { %v2704_v39 = vmul.f32 -1.442695, %v1318_v36  ;;  %v2705_v41 = vmul.f32 -1.442695, %v1331_v54  ;;  %v4733_v54 = vld [vmem:[#allocation55_spill] sm:$0xff] }
 0x399   :  { %2919 = vpow2.f32 %v2704_v39 }
 0x39a   :  { %2921 = vpow2.f32 %v2705_v41 }
 0x39b   :  { %v1343_v57 = vpop.f32.mrf.mxu2  ;;  %v1356_v44 = vpop.f32.mrf.mxu3 }
 0x39c   :  { %v1319_v60 = vpop.f32.mrf.mxu0  ;;  %v1332_v38 = vpop.f32.mrf.mxu1  ;;  %v1344_v53 = vadd.f32 %v1343_v57, %v4732_v8 }
 0x39d   :  { %v4734_v60 = vld [vmem:[#allocation56_spill] sm:$0xff] }
 0x39e   :  { %v2706_v6 = vmul.f32 -1.442695, %v1344_v53 }
 0x39f   :  { %v2920_v25 = vpop.eup %2919 }
 0x3a0   :  { %v2922_v20 = vpop.eup %2921  ;;  %v1422_v48 = vadd.f32 1.0, %v2920_v25 }
 0x3a1   :  { %v3966_v12 = vadd.f32 1.0, %v2922_v20 }
 0x3a2   :  { %2923 = vrcp.f32 %v1422_v48  ;;  %vm1430_vm6 = vweird.f32 %v1422_v48 }
 0x3a3   :  { %2925 = vrcp.f32 %v3966_v12  ;;  %v1345_v16 = vpop.f32.mrf.mxu2  ;;  %v1358_v32 = vpop.f32.mrf.mxu3  ;;  %vm1445_vm8 = vweird.f32 %v3966_v12 }
 0x3a4   :  { %v1370_v36 = vpop.f32.mrf.mxu0  ;;  %v1383_v39 = vpop.f32.mrf.mxu1  ;;  %2927 = vpow2.f32 %v2706_v6 }
 0x3a5   :  { %v1371_v41 = vadd.f32 %v1370_v36, %v4733_v54  ;;  %v1384_v38 = vadd.f32 %v1383_v39, %v4734_v60 }
 0x3a7   :  { %v2707_v56 = vmul.f32 -1.442695, %v1371_v41  ;;  %v2708_v57 = vmul.f32 -1.442695, %v1384_v38 }
 0x3a8   :  { %v2924_v8 = vpop.eup %2923 }
 0x3a9   :  { %v2926_v45 = vpop.eup %2925  ;;  %v1426_v25 = vmul.f32 %v2924_v8, %v1422_v48  ;;  %2929 = vpow2.f32 %v2707_v56  ;;  %v4736_v56 = vld [vmem:[#allocation46_spill] sm:$0xff]  ;;  %vm1431_vm4 = vweird.f32 %v2924_v8 }
 0x3aa   :  { %v1441_v20 = vmul.f32 %v2926_v45, %v3966_v12  ;;  %v2928_v53 = vpop.eup %2927  ;;  %2931 = vpow2.f32 %v2708_v57  ;;  %v1357_v57 = vadd.f32 %v1356_v44, %v4736_v56  ;;  %vm1446_vm5 = vweird.f32 %v2926_v45  ;;  %vm3984_vm7 = vmor %vm1430_vm6, %vm1431_vm4 }
 0x3ab   :  { %v1427_v40 = vsub.f32 1.0, %v1426_v25  ;;  %v1396_v16 = vpop.f32.mrf.mxu2  ;;  %v1409_v32 = vpop.f32.mrf.mxu3  ;;  %v3973_v54 = vadd.f32 1.0, %v2928_v53  ;;  %vm3996_vm9 = vmor %vm1445_vm8, %vm1446_vm5 }
 0x3ac   :  { %v1397_v42 = vadd.f32 %v1396_v16, %v4735_v33  ;;  %v1372_v6 = vpop.f32.mrf.mxu0  ;;  %v1385_v46 = vpop.f32.mrf.mxu1  ;;  %v1442_v36 = vsub.f32 1.0, %v1441_v20 }
 0x3ad   :  { %v1428_v41 = vmul.f32 %v2924_v8, %v1427_v40  ;;  %v1434_v40 = vand.u32 2147483647, %v1422_v48  ;;  %vm1460_vm6 = vweird.f32 %v3973_v54 }
 0x3ae   :  { %v2709_v39 = vmul.f32 -1.442695, %v1397_v42  ;;  %v1443_v52 = vmul.f32 %v2926_v45, %v1442_v36  ;;  %v1436_v42 = vand.u32 2147483648, %v1422_v48  ;;  %v1451_v36 = vand.u32 2147483648, %v3966_v12 }
 0x3af   :  { %v2930_v38 = vpop.eup %2929  ;;  %v1429_v16 = vadd.f32 %v2924_v8, %v1428_v41  ;;  %vm1435_vm10 = vcmp.eq.f32.partialorder %v1434_v40, 8.507059e+37 }
 0x3b0   :  { %2933 = vpow2.f32 %v2709_v39  ;;  %v2932_v60 = vpop.eup %2931  ;;  %v3975_v7 = vadd.f32 1.0, %v2930_v38  ;;  %v1444_v53 = vadd.f32 %v2926_v45, %v1443_v52  ;;  %v1449_v39 = vand.u32 2147483647, %v3966_v12 }
 0x3b1   :  { %2935 = vrcp.f32 %v3973_v54  ;;  %v3979_v25 = vadd.f32 1.0, %v2932_v60  ;;  %v1433_v60 = vsel %vm3984_vm7, %v2924_v8, %v1429_v16  ;;  %v1437_v48 = vor.u32 1.1754944e-38, %v1436_v42 }
 0x3b2   :  { %2937 = vrcp.f32 %v3975_v7  ;;  %v1452_v12 = vor.u32 1.1754944e-38, %v1451_v36  ;;  %vm1450_vm11 = vcmp.eq.f32.partialorder %v1449_v39, 8.507059e+37  ;;  %vm1493_vm14 = vweird.f32 %v3975_v7 }
 0x3b3   :  { %v1398_v46 = vpop.f32.mrf.mxu2  ;;  %v1411_v20 = vpop.f32.mrf.mxu3  ;;  %2939 = vrcp.f32 %v3979_v25  ;;  %v1512_v34 = vand.u32 2147483647, %v3979_v25  ;;  %vm1508_vm15 = vweird.f32 %v3979_v25 }
 0x3b4   :  { %2941 = vtanh.f32 %v1357_v57  ;;  %v1448_v57 = vsel %vm3996_vm9, %v2926_v45, %v1444_v53  ;;  %v4741_v20 = vld [vmem:[#allocation58_spill] sm:$0xff]  ;;  %v1499_v53 = vand.u32 2147483648, %v3975_v7 }
 0x3b5   :  { %v1410_v8 = vadd.f32 %v1409_v32, %v4741_v20  ;;  %v1453_v40 = vsel %vm1450_vm11, %v1452_v12, %v1448_v57  ;;  %v1514_v32 = vand.u32 2147483648, %v3979_v25  ;;  %vm1513_vm3 = vcmp.eq.f32.partialorder %v1512_v34, 8.507059e+37 }
 0x3b6   :  { %v2934_v6 = vpop.eup %2933  ;;  %v1466_v34 = vand.u32 2147483648, %v3973_v54 }
 0x3b7   :  { %v3992_v41 = vadd.f32 1.0, %v2934_v6  ;;  %v3994_v38 = vpop.eup %2935  ;;  %v1438_v6 = vsel %vm1435_vm10, %v1437_v48, %v1433_v60  ;;  %v1497_v60 = vand.u32 2147483647, %v3975_v7  ;;  %v1471_v48 = vmul.f32 %v1453_v40, %v3879_v17 }
 0x3b8   :  { %v2938_v46 = vpop.eup %2937  ;;  %v1456_v42 = vmul.f32 %v3994_v38, %v3973_v54  ;;  %v1515_v12 = vor.u32 1.1754944e-38, %v1514_v32  ;;  %vm1461_vm4 = vweird.f32 %v3994_v38 }
 0x3b9   :  { %2943 = vrcp.f32 %v3992_v41  ;;  %v2940_v16 = vpop.eup %2939  ;;  %v1489_v44 = vmul.f32 %v2938_v46, %v3975_v7  ;;  %vm1494_vm12 = vweird.f32 %v2938_v46  ;;  %vm1498_vm2 = vcmp.eq.f32.partialorder %v1497_v60, 8.507059e+37  ;;  %vm1462_vm8 = vmor %vm1460_vm6, %vm1461_vm4 }
 0x3ba   :  { %v1504_v56 = vmul.f32 %v2940_v16, %v3979_v25  ;;  %v2942_v33 = vpop.eup %2941  ;;  %2945 = vtanh.f32 %v1410_v8  ;;  %vm1509_vm13 = vweird.f32 %v2940_v16  ;;  %v1457_v57 = vsub.f32 1.0, %v1456_v42  ;;  %vm1495_vm0 = vmor %vm1493_vm14, %vm1494_vm12 }
 0x3bb   :  { %v1490_v24 = vsub.f32 1.0, %v1489_v44  ;;  %v1472_v52 = vmul.f32 %v2942_v33, %v1438_v6  ;;  %vm1510_vm1 = vmor %vm1508_vm15, %vm1509_vm13  ;;  %vm1523_vm7 = vweird.f32 %v3992_v41  ;;  %v1467_v60 = vor.u32 1.1754944e-38, %v1466_v34  ;;  %v4752_v34 = vld [vmem:[#allocation23_spill] sm:$0xff] }
 0x3bc   :  { %v1505_v45 = vsub.f32 1.0, %v1504_v56 }
 0x3bd   :  { %v1491_v36 = vmul.f32 %v2938_v46, %v1490_v24  ;;  %v1500_v24 = vor.u32 1.1754944e-38, %v1499_v53  ;;  %v4016_v40 = vadd.f32 %v1472_v52, %v1471_v48 }
 0x3be   :  { %v1506_v20 = vmul.f32 %v2940_v16, %v1505_v45 }
 0x3bf   :  { %v2944_v39 = vpop.eup %2943  ;;  %v1492_v56 = vadd.f32 %v2938_v46, %v1491_v36  ;;  %v1458_v36 = vmul.f32 %v3994_v38, %v1457_v57  ;;  %2947 = vtanh.f32 %v4016_v40 }
 0x3c0   :  { %v1519_v33 = vmul.f32 %v2944_v39, %v3992_v41  ;;  %v1507_v8 = vadd.f32 %v2940_v16, %v1506_v20  ;;  %v2946_v17 = vpop.eup %2945  ;;  %vm1524_vm5 = vweird.f32 %v2944_v39 }
 0x3c1   :  { %v1496_v44 = vsel %vm1495_vm0, %v2938_v46, %v1492_v56  ;;  %v1459_v46 = vadd.f32 %v3994_v38, %v1458_v36  ;;  %vm1525_vm9 = vmor %vm1523_vm7, %vm1524_vm5  ;;  %v4747_v36 = vld [vmem:[#allocation16_spill] sm:$0xff] }
 0x3c2   :  { %v1520_v6 = vsub.f32 1.0, %v1519_v33  ;;  %v1501_v45 = vsel %vm1498_vm2, %v1500_v24, %v1496_v44  ;;  %v1511_v42 = vsel %vm1510_vm1, %v2940_v16, %v1507_v8  ;;  %v1529_v16 = vand.u32 2147483648, %v3992_v41  ;;  %v4743_v44 = vld [vmem:[#allocation13_spill] sm:$0xff] }
 0x3c3   :  { %v1516_v7 = vsel %vm1513_vm3, %v1515_v12, %v1511_v42  ;;  %v1535_v28 = vmul.f32 %v2946_v17, %v1501_v45  ;;  %v1463_v53 = vsel %vm1462_vm8, %v3994_v38, %v1459_v46  ;;  %v4744_v17 = vld [vmem:[#allocation17_spill] sm:$0xff]  ;;  %v4745_v45 = vld [vmem:[#allocation14_spill] sm:$0xff]  ;;  %v4746_v42 = vld [vmem:[#allocation15_spill] sm:$0xff] }
 0x3c4   :  { %v1521_v10 = vmul.f32 %v2944_v39, %v1520_v6  ;;  %v1534_v25 = vmul.f32 %v1516_v7, %v3884_v21  ;;  %v1464_v21 = vand.u32 2147483647, %v3973_v54  ;;  %v1530_v48 = vor.u32 1.1754944e-38, %v1529_v16  ;;  %v2710_v54 = vld [vmem:[%s4424_s0 + $0xa] sm:$0x3]  ;;  %v4750_v46 = vld [vmem:[#allocation19_spill] sm:$0xff] }
 0x3c5   :  { %v2948_v32 = vpop.eup %2947  ;;  %v4748_v7 = vld [vmem:[#allocation21_spill] sm:$0xff]  ;;  %v4753_v16 = vld [vmem:[#allocation22_spill] sm:$0xff] }
 0x3c6   :  { %v4021_v20 = vadd.f32 %v1535_v28, %v1534_v25  ;;  %v1522_v52 = vadd.f32 %v2944_v39, %v1521_v10  ;;  %v1527_v28 = vand.u32 2147483647, %v3992_v41  ;;  %vm1465_vm10 = vcmp.eq.f32.partialorder %v1464_v21, 8.507059e+37  ;;  %v4749_v25 = vld [vmem:[#allocation18_spill] sm:$0xff]  ;;  %v4754_v21 = vld [vmem:[#allocation24_spill] sm:$0xff] }
 0x3c7   :  { %v1468_v33 = vsel %vm1465_vm10, %v1467_v60, %v1463_v53  ;;  %v4756_v53 = vld [vmem:[#allocation27_spill] sm:$0xff]  ;;  %v4759_v60 = vld [vmem:[#allocation29_spill] sm:$0xff] }
 0x3c8   :  { %2949 = vtanh.f32 %v4021_v20  ;;  %v1526_v10 = vsel %vm1525_vm9, %v2944_v39, %v1522_v52  ;;  %vm1528_vm11 = vcmp.eq.f32.partialorder %v1527_v28, 8.507059e+37  ;;  %v1475_v24 = vmul.f32 %v2948_v32, %v1468_v33  ;;  %v4742_v39 = vld [vmem:[#allocation12_spill] sm:$0xff]  ;;  %v4755_v28 = vld [vmem:[#allocation25_spill] sm:$0xff] }
 0x3c9   :  { %v1531_v56 = vsel %vm1528_vm11, %v1530_v48, %v1526_v10  ;;  %v4751_v52 = vld [vmem:[#allocation20_spill] sm:$0xff]  ;;  %v4757_v10 = vld [vmem:[#allocation26_spill] sm:$0xff]  ;;  %v4760_v48 = vld [vmem:[#allocation31_spill] sm:$0xff] }
 0x3ca   :  { %v4758_v32 = vld [vmem:[#allocation28_spill] sm:$0xff] }
 0x3cb   :  { %v4762_v33 = vld [vmem:[#allocation32_spill] sm:$0xff] }
 0x3ce   :  { %v2950_v57 = vpop.eup %2949 }
 0x3cf   :  { %v1538_v8 = vmul.f32 %v2950_v57, %v1531_v56  ;;  %v4761_v57 = vld [vmem:[#allocation30_spill] sm:$0xff]  ;;  %v4763_v56 = vld [vmem:[#allocation33_spill] sm:$0xff] }
 0x3d1   :  { %v1539_v12 = vadd.f32 %v1538_v8, %v1475_v24  ;;  %v1542_v41 = vadd.f32 %v2710_v54, %v1538_v8  ;;  %v4764_v24 = vld [vmem:[#allocation35_spill] sm:$0xff]  ;;  %v4765_v8 = vld [vmem:[#allocation34_spill] sm:$0xff] }
 0x3d2   :  { %v4768_v54 = vld [vmem:[#allocation39_spill] sm:$0xff] }
 0x3d3   :  { %v1543_v6 = vpack.c.bf16 %v1539_v12, %v1539_v12  ;;  %v1596_v38 = vpack.c.bf16 %v1542_v41, %v1542_v41  ;;  %v4766_v12 = vld [vmem:[#allocation36_spill] sm:$0xff]  ;;  %v4769_v41 = vld [vmem:[#allocation38_spill] sm:$0xff] }
 0x3d5   :  { %1552 = vmatmul.bf16.vlgmr.msrb.gmra.mxu0 %v1543_v6  ;;  %1565 = vmatmul.bf16.vlgmr.msrb.gmra.mxu1 %v1543_v6 }
 0x3d6   :  { %1578 = vmatmul.bf16.vlgmr.msrb.gmra.mxu2 %v1543_v6  ;;  %1591 = vmatmul.bf16.vlgmr.msrb.gmra.mxu3 %v1543_v6  ;;  %v4767_v6 = vld [vmem:[#allocation37_spill] sm:$0xff] }
 0x3d7   :  { %1780 = vmatpush.bf16.msrb.mxu0 %v3321_v51  ;;  %1793 = vmatpush.bf16.msrb.mxu1 %v3323_v59 }
 0x3d8   :  { %1806 = vmatpush.bf16.msrb.mxu2 %v3326_v63  ;;  %1819 = vmatpush.bf16.msrb.mxu3 %v3328_v0 }
 0x3db   :  { %1781 = vmatpush.bf16.msrb.mxu0 %v3333_v11  ;;  %1794 = vmatpush.bf16.msrb.mxu1 %v3335_v18 }
 0x3dc   :  { %1807 = vmatpush.bf16.msrb.mxu2 %v3337_v22  ;;  %1820 = vmatpush.bf16.msrb.mxu3 %v3340_v27 }
 0x3df   :  { %1782 = vmatpush.bf16.msrb.mxu0 %v3345_v35  ;;  %1795 = vmatpush.bf16.msrb.mxu1 %v3347_v47 }
 0x3e0   :  { %1808 = vmatpush.bf16.msrb.mxu2 %v3349_v49  ;;  %1821 = vmatpush.bf16.msrb.mxu3 %v3352_v55 }
 0x3e3   :  { %1783 = vmatpush.bf16.msrb.mxu0 %v3357_v62  ;;  %1796 = vmatpush.bf16.msrb.mxu1 %v3359_v13 }
 0x3e4   :  { %1809 = vmatpush.bf16.msrb.mxu2 %v3361_v14  ;;  %1822 = vmatpush.bf16.msrb.mxu3 %v4581_v5 }
 0x3e5   :  { %1605 = vmatmul.bf16.vlgmr.msra.gmra.mxu0 %v1596_v38  ;;  %1618 = vmatmul.bf16.vlgmr.msra.gmra.mxu1 %v1596_v38 }
 0x3e6   :  { %1631 = vmatmul.bf16.vlgmr.msra.gmra.mxu2 %v1596_v38  ;;  %1644 = vmatmul.bf16.vlgmr.msra.gmra.mxu3 %v1596_v38  ;;  %v4770_v38 = vld [vmem:[#allocation40_spill] sm:$0xff] }
 0x3e7   :  { %1784 = vmatpush.bf16.msrb.mxu0 %v4582_v4  ;;  %1797 = vmatpush.bf16.msrb.mxu1 %v4583_v15 }
 0x3e8   :  { %1810 = vmatpush.bf16.msrb.mxu2 %v4584_v26  ;;  %1823 = vmatpush.bf16.msrb.mxu3 %v4585_v30 }
 0x3eb   :  { %1785 = vmatpush.bf16.msrb.mxu0 %v4586_v2  ;;  %1798 = vmatpush.bf16.msrb.mxu1 %v4587_v61 }
 0x3ec   :  { %1811 = vmatpush.bf16.msrb.mxu2 %v4588_v58  ;;  %1824 = vmatpush.bf16.msrb.mxu3 %v4589_v50 }
 0x3ef   :  { %1786 = vmatpush.bf16.msrb.mxu0 %v4590_v9  ;;  %1799 = vmatpush.bf16.msrb.mxu1 %v4591_v1 }
 0x3f0   :  { %1812 = vmatpush.bf16.msrb.mxu2 %v4592_v19  ;;  %1825 = vmatpush.bf16.msrb.mxu3 %v3408_v31 }
 0x3f3   :  { %1787 = vmatpush.bf16.msrb.mxu0 %v3413_v37  ;;  %1800 = vmatpush.bf16.msrb.mxu1 %v3418_v29 }
 0x3f4   :  { %1813 = vmatpush.bf16.msrb.mxu2 %v3420_v43  ;;  %1826 = vmatpush.bf16.msrb.mxu3 %v3423_v23 }
 0x3f7   :  { %1833 = vmatpush.bf16.msra.mxu0 %v3222_v3  ;;  %1846 = vmatpush.bf16.msra.mxu1 %v4742_v39 }
 0x3f8   :  { %1859 = vmatpush.bf16.msra.mxu2 %v4743_v44  ;;  %1872 = vmatpush.bf16.msra.mxu3 %v4744_v17 }
 0x3fb   :  { %1834 = vmatpush.bf16.msra.mxu0 %v4745_v45  ;;  %1847 = vmatpush.bf16.msra.mxu1 %v4746_v42 }
 0x3fc   :  { %1860 = vmatpush.bf16.msra.mxu2 %v4747_v36  ;;  %1873 = vmatpush.bf16.msra.mxu3 %v4748_v7 }
 0x3ff   :  { %1835 = vmatpush.bf16.msra.mxu0 %v4749_v25  ;;  %1848 = vmatpush.bf16.msra.mxu1 %v4750_v46  ;;  %v4778_v46 = vld [vmem:[#allocation57_spill] sm:$0xff] }
 0x400   :  { %1861 = vmatpush.bf16.msra.mxu2 %v4751_v52  ;;  %1874 = vmatpush.bf16.msra.mxu3 %v4752_v34 }
 0x403   :  { %1836 = vmatpush.bf16.msra.mxu0 %v4753_v16  ;;  %1849 = vmatpush.bf16.msra.mxu1 %v4754_v21 }
 0x404   :  { %1862 = vmatpush.bf16.msra.mxu2 %v4755_v28  ;;  %1875 = vmatpush.bf16.msra.mxu3 %v4756_v53  ;;  %v4775_v28 = vld [vmem:[#allocation45_spill] sm:$0xff] }
 0x407   :  { %1837 = vmatpush.bf16.msra.mxu0 %v4757_v10  ;;  %1850 = vmatpush.bf16.msra.mxu1 %v4758_v32  ;;  %v4774_v32 = vld [vmem:[#allocation44_spill] sm:$0xff] }
 0x408   :  { %1863 = vmatpush.bf16.msra.mxu2 %v4759_v60  ;;  %1876 = vmatpush.bf16.msra.mxu3 %v4760_v48  ;;  %v4771_v48 = vld [vmem:[#allocation41_spill] sm:$0xff]  ;;  %v4773_v60 = vld [vmem:[#allocation43_spill] sm:$0xff] }
 0x40b   :  { %1838 = vmatpush.bf16.msra.mxu0 %v4761_v57  ;;  %1851 = vmatpush.bf16.msra.mxu1 %v4762_v33  ;;  %v4772_v57 = vld [vmem:[#allocation42_spill] sm:$0xff] }
 0x40c   :  { %1864 = vmatpush.bf16.msra.mxu2 %v4763_v56  ;;  %1877 = vmatpush.bf16.msra.mxu3 %v4764_v24 }
 0x40f   :  { %1839 = vmatpush.bf16.msra.mxu0 %v4765_v8  ;;  %1852 = vmatpush.bf16.msra.mxu1 %v4766_v12 }
 0x410   :  { %1865 = vmatpush.bf16.msra.mxu2 %v4767_v6  ;;  %1878 = vmatpush.bf16.msra.mxu3 %v4768_v54 }
 0x413   :  { %1840 = vmatpush.bf16.msra.mxu0 %v4769_v41  ;;  %1853 = vmatpush.bf16.msra.mxu1 %v4770_v38 }
 0x414   :  { %1866 = vmatpush.bf16.msra.mxu2 %v4771_v48  ;;  %1879 = vmatpush.bf16.msra.mxu3 %v4772_v57 }
 0x452   :  { %v1553_v33 = vpop.f32.mrf.mxu0  ;;  %v1566_v56 = vpop.f32.mrf.mxu1 }
 0x453   :  { %v1554_v24 = vadd.f32 %v1553_v33, %v4773_v60  ;;  %v1567_v8 = vadd.f32 %v1566_v56, %v4774_v32 }
 0x455   :  { %v2711_v10 = vmul.f32 -1.442695, %v1554_v24  ;;  %v2712_v12 = vmul.f32 -1.442695, %v1567_v8  ;;  %v4776_v8 = vld [vmem:[#allocation55_spill] sm:$0xff] }
 0x457   :  { %2951 = vpow2.f32 %v2711_v10 }
 0x458   :  { %2953 = vpow2.f32 %v2712_v12 }
 0x459   :  { %v1579_v6 = vpop.f32.mrf.mxu2  ;;  %v1592_v54 = vpop.f32.mrf.mxu3 }
 0x45a   :  { %v1555_v53 = vpop.f32.mrf.mxu0  ;;  %v1568_v41 = vpop.f32.mrf.mxu1  ;;  %v1580_v38 = vadd.f32 %v1579_v6, %v4775_v28 }
 0x45b   :  { %v4777_v53 = vld [vmem:[#allocation56_spill] sm:$0xff] }
 0x45c   :  { %v2713_v34 = vmul.f32 -1.442695, %v1580_v38 }
 0x45d   :  { %v2952_v21 = vpop.eup %2951 }
 0x45e   :  { %v2954_v48 = vpop.eup %2953  ;;  %v1658_v16 = vadd.f32 1.0, %v2952_v21 }
 0x45f   :  { %v4103_v57 = vadd.f32 1.0, %v2954_v48 }
 0x460   :  { %2955 = vrcp.f32 %v1658_v16  ;;  %vm1666_vm14 = vweird.f32 %v1658_v16 }
 0x461   :  { %2957 = vrcp.f32 %v4103_v57  ;;  %v1581_v33 = vpop.f32.mrf.mxu2  ;;  %v1594_v56 = vpop.f32.mrf.mxu3  ;;  %vm1681_vm0 = vweird.f32 %v4103_v57 }
 0x462   :  { %v1606_v24 = vpop.f32.mrf.mxu0  ;;  %v1619_v10 = vpop.f32.mrf.mxu1  ;;  %2959 = vpow2.f32 %v2713_v34 }
 0x463   :  { %v1607_v12 = vadd.f32 %v1606_v24, %v4776_v8  ;;  %v1620_v41 = vadd.f32 %v1619_v10, %v4777_v53 }
 0x465   :  { %v2714_v32 = vmul.f32 -1.442695, %v1607_v12  ;;  %v2715_v6 = vmul.f32 -1.442695, %v1620_v41 }
 0x466   :  { %v2956_v28 = vpop.eup %2955 }
 0x467   :  { %v2958_v60 = vpop.eup %2957  ;;  %v1662_v21 = vmul.f32 %v2956_v28, %v1658_v16  ;;  %2961 = vpow2.f32 %v2714_v32  ;;  %v4779_v32 = vld [vmem:[#allocation46_spill] sm:$0xff]  ;;  %vm1667_vm12 = vweird.f32 %v2956_v28 }
 0x468   :  { %v1677_v48 = vmul.f32 %v2958_v60, %v4103_v57  ;;  %v2960_v38 = vpop.eup %2959  ;;  %2963 = vpow2.f32 %v2715_v6  ;;  %v1593_v6 = vadd.f32 %v1592_v54, %v4779_v32  ;;  %vm1682_vm13 = vweird.f32 %v2958_v60  ;;  %vm4121_vm15 = vmor %vm1666_vm14, %vm1667_vm12 }
 0x469   :  { %v1663_v52 = vsub.f32 1.0, %v1662_v21  ;;  %v1632_v33 = vpop.f32.mrf.mxu2  ;;  %v1645_v56 = vpop.f32.mrf.mxu3  ;;  %v4110_v8 = vadd.f32 1.0, %v2960_v38  ;;  %vm4133_vm1 = vmor %vm1681_vm0, %vm1682_vm13 }
 0x46a   :  { %v1633_v25 = vadd.f32 %v1632_v33, %v4778_v46  ;;  %v1608_v34 = vpop.f32.mrf.mxu0  ;;  %v1621_v7 = vpop.f32.mrf.mxu1  ;;  %v1678_v24 = vsub.f32 1.0, %v1677_v48 }
 0x46b   :  { %v1664_v12 = vmul.f32 %v2956_v28, %v1663_v52  ;;  %v1670_v52 = vand.u32 2147483647, %v1658_v16  ;;  %vm1696_vm14 = vweird.f32 %v4110_v8 }
 0x46c   :  { %v2716_v10 = vmul.f32 -1.442695, %v1633_v25  ;;  %v1679_v36 = vmul.f32 %v2958_v60, %v1678_v24  ;;  %v1672_v25 = vand.u32 2147483648, %v1658_v16  ;;  %v1687_v24 = vand.u32 2147483648, %v4103_v57 }
 0x46d   :  { %v2962_v41 = vpop.eup %2961  ;;  %v1665_v33 = vadd.f32 %v2956_v28, %v1664_v12  ;;  %vm1671_vm2 = vcmp.eq.f32.partialorder %v1670_v52, 8.507059e+37 }
 0x46e   :  { %2965 = vpow2.f32 %v2716_v10  ;;  %v2964_v53 = vpop.eup %2963  ;;  %v4112_v42 = vadd.f32 1.0, %v2962_v41  ;;  %v1680_v38 = vadd.f32 %v2958_v60, %v1679_v36  ;;  %v1685_v10 = vand.u32 2147483647, %v4103_v57 }
 0x46f   :  { %2967 = vrcp.f32 %v4110_v8  ;;  %v4116_v21 = vadd.f32 1.0, %v2964_v53  ;;  %v1669_v53 = vsel %vm4121_vm15, %v2956_v28, %v1665_v33  ;;  %v1673_v16 = vor.u32 1.1754944e-38, %v1672_v25 }
 0x470   :  { %2969 = vrcp.f32 %v4112_v42  ;;  %v1688_v57 = vor.u32 1.1754944e-38, %v1687_v24  ;;  %vm1686_vm3 = vcmp.eq.f32.partialorder %v1685_v10, 8.507059e+37  ;;  %vm1729_vm6 = vweird.f32 %v4112_v42 }
 0x471   :  { %v1634_v7 = vpop.f32.mrf.mxu2  ;;  %v1647_v48 = vpop.f32.mrf.mxu3  ;;  %2971 = vrcp.f32 %v4116_v21  ;;  %v1748_v17 = vand.u32 2147483647, %v4116_v21  ;;  %vm1744_vm7 = vweird.f32 %v4116_v21 }
 0x472   :  { %2973 = vtanh.f32 %v1593_v6  ;;  %v1684_v6 = vsel %vm4133_vm1, %v2958_v60, %v1680_v38  ;;  %v4784_v48 = vld [vmem:[#allocation58_spill] sm:$0xff]  ;;  %v1735_v38 = vand.u32 2147483648, %v4112_v42 }
 0x473   :  { %v1646_v28 = vadd.f32 %v1645_v56, %v4784_v48  ;;  %v1689_v52 = vsel %vm1686_vm3, %v1688_v57, %v1684_v6  ;;  %v1750_v56 = vand.u32 2147483648, %v4116_v21  ;;  %vm1749_vm11 = vcmp.eq.f32.partialorder %v1748_v17, 8.507059e+37 }
 0x474   :  { %v2966_v34 = vpop.eup %2965  ;;  %v1702_v17 = vand.u32 2147483648, %v4110_v8 }
 0x475   :  { %v4129_v12 = vadd.f32 1.0, %v2966_v34  ;;  %v4131_v41 = vpop.eup %2967  ;;  %v1674_v34 = vsel %vm1671_vm2, %v1673_v16, %v1669_v53  ;;  %v1733_v53 = vand.u32 2147483647, %v4112_v42  ;;  %v1707_v16 = vmul.f32 %v1689_v52, %v4016_v40 }
 0x476   :  { %v2970_v7 = vpop.eup %2969  ;;  %v1692_v25 = vmul.f32 %v4131_v41, %v4110_v8  ;;  %v1751_v57 = vor.u32 1.1754944e-38, %v1750_v56  ;;  %vm1697_vm12 = vweird.f32 %v4131_v41 }
 0x477   :  { %2975 = vrcp.f32 %v4129_v12  ;;  %v2972_v33 = vpop.eup %2971  ;;  %v1725_v54 = vmul.f32 %v2970_v7, %v4112_v42  ;;  %vm1730_vm4 = vweird.f32 %v2970_v7  ;;  %vm1734_vm10 = vcmp.eq.f32.partialorder %v1733_v53, 8.507059e+37  ;;  %vm1698_vm0 = vmor %vm1696_vm14, %vm1697_vm12 }
 0x478   :  { %v1740_v32 = vmul.f32 %v2972_v33, %v4116_v21  ;;  %v2974_v46 = vpop.eup %2973  ;;  %2977 = vtanh.f32 %v1646_v28  ;;  %vm1745_vm5 = vweird.f32 %v2972_v33  ;;  %v1693_v6 = vsub.f32 1.0, %v1692_v25  ;;  %vm1731_vm8 = vmor %vm1729_vm6, %vm1730_vm4 }
 0x479   :  { %v1726_v45 = vsub.f32 1.0, %v1725_v54  ;;  %v1708_v36 = vmul.f32 %v2974_v46, %v1674_v34  ;;  %vm1746_vm9 = vmor %vm1744_vm7, %vm1745_vm5  ;;  %vm1759_vm15 = vweird.f32 %v4129_v12  ;;  %v1703_v53 = vor.u32 1.1754944e-38, %v1702_v17  ;;  %v4796_v17 = vld [vmem:[#allocation22_spill] sm:$0xff] }
 0x47a   :  { %v1741_v60 = vsub.f32 1.0, %v1740_v32 }
 0x47b   :  { %v1727_v24 = vmul.f32 %v2970_v7, %v1726_v45  ;;  %v1736_v45 = vor.u32 1.1754944e-38, %v1735_v38  ;;  %v4153_v52 = vadd.f32 %v1708_v36, %v1707_v16 }
 0x47c   :  { %v1742_v48 = vmul.f32 %v2972_v33, %v1741_v60 }
 0x47d   :  { %v2976_v10 = vpop.eup %2975  ;;  %v1728_v32 = vadd.f32 %v2970_v7, %v1727_v24  ;;  %v1694_v24 = vmul.f32 %v4131_v41, %v1693_v6  ;;  %2979 = vtanh.f32 %v4153_v52 }
 0x47e   :  { %v1755_v46 = vmul.f32 %v2976_v10, %v4129_v12  ;;  %v1743_v28 = vadd.f32 %v2972_v33, %v1742_v48  ;;  %v2978_v40 = vpop.eup %2977  ;;  %vm1760_vm13 = vweird.f32 %v2976_v10 }
 0x47f   :  { %v1732_v54 = vsel %vm1731_vm8, %v2970_v7, %v1728_v32  ;;  %v1695_v7 = vadd.f32 %v4131_v41, %v1694_v24  ;;  %vm1761_vm1 = vmor %vm1759_vm15, %vm1760_vm13  ;;  %v4790_v24 = vld [vmem:[#allocation16_spill] sm:$0xff] }
 0x480   :  { %v1756_v34 = vsub.f32 1.0, %v1755_v46  ;;  %v1737_v60 = vsel %vm1734_vm10, %v1736_v45, %v1732_v54  ;;  %v1747_v25 = vsel %vm1746_vm9, %v2972_v33, %v1743_v28  ;;  %v1765_v33 = vand.u32 2147483648, %v4129_v12  ;;  %v4786_v54 = vld [vmem:[#allocation13_spill] sm:$0xff] }
 0x481   :  { %v1752_v42 = vsel %vm1749_vm11, %v1751_v57, %v1747_v25  ;;  %v1771_v39 = vmul.f32 %v2978_v40, %v1737_v60  ;;  %v1699_v38 = vsel %vm1698_vm0, %v4131_v41, %v1695_v7  ;;  %v4787_v40 = vld [vmem:[#allocation17_spill] sm:$0xff]  ;;  %v4788_v60 = vld [vmem:[#allocation14_spill] sm:$0xff]  ;;  %v4789_v25 = vld [vmem:[#allocation15_spill] sm:$0xff] }
 0x482   :  { %v1757_v44 = vmul.f32 %v2976_v10, %v1756_v34  ;;  %v1770_v21 = vmul.f32 %v1752_v42, %v4021_v20  ;;  %v1700_v20 = vand.u32 2147483647, %v4110_v8  ;;  %v1766_v16 = vor.u32 1.1754944e-38, %v1765_v33  ;;  %v2717_v8 = vld [vmem:[%s4424_s0 + $0xc] sm:$0x3]  ;;  %v4793_v7 = vld [vmem:[#allocation19_spill] sm:$0xff] }
 0x483   :  { %v2980_v56 = vpop.eup %2979  ;;  %v4791_v42 = vld [vmem:[#allocation21_spill] sm:$0xff]  ;;  %v4797_v33 = vld [vmem:[#allocation24_spill] sm:$0xff] }
 0x484   :  { %v4158_v48 = vadd.f32 %v1771_v39, %v1770_v21  ;;  %v1758_v36 = vadd.f32 %v2976_v10, %v1757_v44  ;;  %v1763_v39 = vand.u32 2147483647, %v4129_v12  ;;  %vm1701_vm2 = vcmp.eq.f32.partialorder %v1700_v20, 8.507059e+37  ;;  %v4792_v21 = vld [vmem:[#allocation18_spill] sm:$0xff]  ;;  %v4798_v20 = vld [vmem:[#allocation25_spill] sm:$0xff] }
 0x485   :  { %v1704_v46 = vsel %vm1701_vm2, %v1703_v53, %v1699_v38  ;;  %v4800_v38 = vld [vmem:[#allocation26_spill] sm:$0xff]  ;;  %v4803_v53 = vld [vmem:[#allocation31_spill] sm:$0xff] }
 0x486   :  { %2981 = vtanh.f32 %v4158_v48  ;;  %v1762_v44 = vsel %vm1761_vm1, %v2976_v10, %v1758_v36  ;;  %vm1764_vm3 = vcmp.eq.f32.partialorder %v1763_v39, 8.507059e+37  ;;  %v1711_v45 = vmul.f32 %v2980_v56, %v1704_v46  ;;  %v4785_v10 = vld [vmem:[#allocation12_spill] sm:$0xff]  ;;  %v4799_v39 = vld [vmem:[#allocation27_spill] sm:$0xff]  ;;  %v4802_v56 = vld [vmem:[#allocation29_spill] sm:$0xff] }
 0x487   :  { %v1767_v32 = vsel %vm1764_vm3, %v1766_v16, %v1762_v44  ;;  %v4794_v36 = vld [vmem:[#allocation20_spill] sm:$0xff]  ;;  %v4804_v16 = vld [vmem:[#allocation30_spill] sm:$0xff]  ;;  %v4806_v46 = vld [vmem:[#allocation33_spill] sm:$0xff] }
 0x488   :  { %v4801_v44 = vld [vmem:[#allocation28_spill] sm:$0xff] }
 0x48c   :  { %v2982_v6 = vpop.eup %2981 }
 0x48d   :  { %v1774_v28 = vmul.f32 %v2982_v6, %v1767_v32  ;;  %v4805_v6 = vld [vmem:[#allocation32_spill] sm:$0xff]  ;;  %v4807_v32 = vld [vmem:[#allocation35_spill] sm:$0xff] }
 0x48f   :  { %v1775_v57 = vadd.f32 %v1774_v28, %v1711_v45  ;;  %v1778_v12 = vadd.f32 %v2717_v8, %v1774_v28  ;;  %v4808_v45 = vld [vmem:[#allocation34_spill] sm:$0xff]  ;;  %v4809_v28 = vld [vmem:[#allocation36_spill] sm:$0xff] }
 0x490   :  { %v4812_v8 = vld [vmem:[#allocation38_spill] sm:$0xff] }
 0x491   :  { %v1779_v34 = vpack.c.bf16 %v1775_v57, %v1775_v57  ;;  %v1832_v41 = vpack.c.bf16 %v1778_v12, %v1778_v12  ;;  %v4810_v57 = vld [vmem:[#allocation37_spill] sm:$0xff]  ;;  %v4813_v12 = vld [vmem:[#allocation40_spill] sm:$0xff] }
 0x493   :  { %1788 = vmatmul.bf16.vlgmr.msrb.gmra.mxu0 %v1779_v34  ;;  %1801 = vmatmul.bf16.vlgmr.msrb.gmra.mxu1 %v1779_v34 }
 0x494   :  { %1814 = vmatmul.bf16.vlgmr.msrb.gmra.mxu2 %v1779_v34  ;;  %1827 = vmatmul.bf16.vlgmr.msrb.gmra.mxu3 %v1779_v34  ;;  %v4811_v34 = vld [vmem:[#allocation39_spill] sm:$0xff] }
 0x495   :  { %2016 = vmatpush.bf16.msrb.mxu0 %v3321_v51  ;;  %2029 = vmatpush.bf16.msrb.mxu1 %v3323_v59 }
 0x496   :  { %2042 = vmatpush.bf16.msrb.mxu2 %v3326_v63  ;;  %2055 = vmatpush.bf16.msrb.mxu3 %v3328_v0 }
 0x499   :  { %2017 = vmatpush.bf16.msrb.mxu0 %v3333_v11  ;;  %2030 = vmatpush.bf16.msrb.mxu1 %v3335_v18 }
 0x49a   :  { %2043 = vmatpush.bf16.msrb.mxu2 %v3337_v22  ;;  %2056 = vmatpush.bf16.msrb.mxu3 %v3340_v27 }
 0x49d   :  { %2018 = vmatpush.bf16.msrb.mxu0 %v3345_v35  ;;  %2031 = vmatpush.bf16.msrb.mxu1 %v3347_v47 }
 0x49e   :  { %2044 = vmatpush.bf16.msrb.mxu2 %v3349_v49  ;;  %2057 = vmatpush.bf16.msrb.mxu3 %v3352_v55 }
 0x4a1   :  { %2019 = vmatpush.bf16.msrb.mxu0 %v3357_v62  ;;  %2032 = vmatpush.bf16.msrb.mxu1 %v3359_v13 }
 0x4a2   :  { %2045 = vmatpush.bf16.msrb.mxu2 %v3361_v14  ;;  %2058 = vmatpush.bf16.msrb.mxu3 %v4581_v5 }
 0x4a3   :  { %1841 = vmatmul.bf16.vlgmr.msra.gmra.mxu0 %v1832_v41  ;;  %1854 = vmatmul.bf16.vlgmr.msra.gmra.mxu1 %v1832_v41 }
 0x4a4   :  { %1867 = vmatmul.bf16.vlgmr.msra.gmra.mxu2 %v1832_v41  ;;  %1880 = vmatmul.bf16.vlgmr.msra.gmra.mxu3 %v1832_v41  ;;  %v4814_v41 = vld [vmem:[#allocation41_spill] sm:$0xff] }
 0x4a5   :  { %2020 = vmatpush.bf16.msrb.mxu0 %v4582_v4  ;;  %2033 = vmatpush.bf16.msrb.mxu1 %v4583_v15 }
 0x4a6   :  { %2046 = vmatpush.bf16.msrb.mxu2 %v4584_v26  ;;  %2059 = vmatpush.bf16.msrb.mxu3 %v4585_v30 }
 0x4a9   :  { %2021 = vmatpush.bf16.msrb.mxu0 %v4586_v2  ;;  %2034 = vmatpush.bf16.msrb.mxu1 %v4587_v61 }
 0x4aa   :  { %2047 = vmatpush.bf16.msrb.mxu2 %v4588_v58  ;;  %2060 = vmatpush.bf16.msrb.mxu3 %v4589_v50 }
 0x4ad   :  { %2022 = vmatpush.bf16.msrb.mxu0 %v4590_v9  ;;  %2035 = vmatpush.bf16.msrb.mxu1 %v4591_v1 }
 0x4ae   :  { %2048 = vmatpush.bf16.msrb.mxu2 %v4592_v19  ;;  %2061 = vmatpush.bf16.msrb.mxu3 %v3408_v31 }
 0x4b1   :  { %2023 = vmatpush.bf16.msrb.mxu0 %v3413_v37  ;;  %2036 = vmatpush.bf16.msrb.mxu1 %v3418_v29 }
 0x4b2   :  { %2049 = vmatpush.bf16.msrb.mxu2 %v3420_v43  ;;  %2062 = vmatpush.bf16.msrb.mxu3 %v3423_v23 }
 0x4b5   :  { %2069 = vmatpush.bf16.msra.mxu0 %v3222_v3  ;;  %2082 = vmatpush.bf16.msra.mxu1 %v4785_v10  ;;  %v4795_v3 = vld [vmem:[#allocation23_spill] sm:$0xff]  ;;  %v4815_v10 = vld [vmem:[#allocation42_spill] sm:$0xff] }
 0x4b6   :  { %2095 = vmatpush.bf16.msra.mxu2 %v4786_v54  ;;  %2108 = vmatpush.bf16.msra.mxu3 %v4787_v40 }
 0x4b9   :  { %2070 = vmatpush.bf16.msra.mxu0 %v4788_v60  ;;  %2083 = vmatpush.bf16.msra.mxu1 %v4789_v25  ;;  %v4816_v60 = vld [vmem:[#allocation43_spill] sm:$0xff] }
 0x4ba   :  { %2096 = vmatpush.bf16.msra.mxu2 %v4790_v24  ;;  %2109 = vmatpush.bf16.msra.mxu3 %v4791_v42  ;;  %v4817_v24 = vld [vmem:[#allocation44_spill] sm:$0xff] }
 0x4bd   :  { %2071 = vmatpush.bf16.msra.mxu0 %v4792_v21  ;;  %2084 = vmatpush.bf16.msra.mxu1 %v4793_v7 }
 0x4be   :  { %2097 = vmatpush.bf16.msra.mxu2 %v4794_v36  ;;  %2110 = vmatpush.bf16.msra.mxu3 %v4795_v3 }
 0x4c1   :  { %2072 = vmatpush.bf16.msra.mxu0 %v4796_v17  ;;  %2085 = vmatpush.bf16.msra.mxu1 %v4797_v33 }
 0x4c2   :  { %2098 = vmatpush.bf16.msra.mxu2 %v4798_v20  ;;  %2111 = vmatpush.bf16.msra.mxu3 %v4799_v39  ;;  %v4818_v20 = vld [vmem:[#allocation45_spill] sm:$0xff] }
 0x4c5   :  { %2073 = vmatpush.bf16.msra.mxu0 %v4800_v38  ;;  %2086 = vmatpush.bf16.msra.mxu1 %v4801_v44 }
 0x4c6   :  { %2099 = vmatpush.bf16.msra.mxu2 %v4802_v56  ;;  %2112 = vmatpush.bf16.msra.mxu3 %v4803_v53 }
 0x4c9   :  { %2074 = vmatpush.bf16.msra.mxu0 %v4804_v16  ;;  %2087 = vmatpush.bf16.msra.mxu1 %v4805_v6 }
 0x4ca   :  { %2100 = vmatpush.bf16.msra.mxu2 %v4806_v46  ;;  %2113 = vmatpush.bf16.msra.mxu3 %v4807_v32 }
 0x4cd   :  { %2075 = vmatpush.bf16.msra.mxu0 %v4808_v45  ;;  %2088 = vmatpush.bf16.msra.mxu1 %v4809_v28  ;;  %v4819_v28 = vld [vmem:[#allocation55_spill] sm:$0xff] }
 0x4ce   :  { %2101 = vmatpush.bf16.msra.mxu2 %v4810_v57  ;;  %2114 = vmatpush.bf16.msra.mxu3 %v4811_v34  ;;  %v4820_v34 = vld [vmem:[#allocation56_spill] sm:$0xff] }
 0x4d1   :  { %2076 = vmatpush.bf16.msra.mxu0 %v4812_v8  ;;  %2089 = vmatpush.bf16.msra.mxu1 %v4813_v12 }
 0x4d2   :  { %2102 = vmatpush.bf16.msra.mxu2 %v4814_v41  ;;  %2115 = vmatpush.bf16.msra.mxu3 %v4815_v10 }
 0x510   :  { %v1789_v54 = vpop.f32.mrf.mxu0  ;;  %v1802_v40 = vpop.f32.mrf.mxu1 }
 0x511   :  { %v1790_v25 = vadd.f32 %v1789_v54, %v4816_v60  ;;  %v1803_v42 = vadd.f32 %v1802_v40, %v4817_v24 }
 0x513   :  { %v2718_v21 = vmul.f32 -1.442695, %v1790_v25  ;;  %v2719_v7 = vmul.f32 -1.442695, %v1803_v42 }
 0x515   :  { %2983 = vpow2.f32 %v2718_v21 }
 0x516   :  { %2985 = vpow2.f32 %v2719_v7 }
 0x517   :  { %v1815_v36 = vpop.f32.mrf.mxu2  ;;  %v1828_v3 = vpop.f32.mrf.mxu3 }
 0x518   :  { %v1791_v17 = vpop.f32.mrf.mxu0  ;;  %v1804_v33 = vpop.f32.mrf.mxu1  ;;  %v1816_v39 = vadd.f32 %v1815_v36, %v4818_v20 }
 0x519   :  { %v4821_v33 = vld [vmem:[#allocation57_spill] sm:$0xff] }
 0x51a   :  { %v2720_v16 = vmul.f32 -1.442695, %v1816_v39 }
 0x51b   :  { %v2984_v38 = vpop.eup %2983 }
 0x51c   :  { %v2986_v44 = vpop.eup %2985  ;;  %v4240_v56 = vadd.f32 1.0, %v2984_v38 }
 0x51d   :  { %v4242_v53 = vadd.f32 1.0, %v2986_v44 }
 0x51e   :  { %2987 = vrcp.f32 %v4240_v56  ;;  %vm1902_vm8 = vweird.f32 %v4240_v56 }
 0x51f   :  { %2989 = vrcp.f32 %v4242_v53  ;;  %v1817_v6 = vpop.f32.mrf.mxu2  ;;  %v1830_v46 = vpop.f32.mrf.mxu3  ;;  %vm1917_vm6 = vweird.f32 %v4242_v53 }
 0x520   :  { %v1842_v32 = vpop.f32.mrf.mxu0  ;;  %v1855_v45 = vpop.f32.mrf.mxu1  ;;  %2991 = vpow2.f32 %v2720_v16 }
 0x521   :  { %v1843_v57 = vadd.f32 %v1842_v32, %v4819_v28  ;;  %v1856_v8 = vadd.f32 %v1855_v45, %v4820_v34 }
 0x523   :  { %v2721_v12 = vmul.f32 -1.442695, %v1843_v57  ;;  %v2722_v10 = vmul.f32 -1.442695, %v1856_v8 }
 0x524   :  { %v2988_v41 = vpop.eup %2987 }
 0x525   :  { %v2990_v54 = vpop.eup %2989  ;;  %v1898_v40 = vmul.f32 %v2988_v41, %v4240_v56  ;;  %2993 = vpow2.f32 %v2721_v12  ;;  %v4822_v12 = vld [vmem:[#allocation46_spill] sm:$0xff]  ;;  %vm1903_vm5 = vweird.f32 %v2988_v41 }
 0x526   :  { %v1913_v25 = vmul.f32 %v2990_v54, %v4242_v53  ;;  %v2992_v7 = vpop.eup %2991  ;;  %2995 = vpow2.f32 %v2722_v10  ;;  %vm1918_vm4 = vweird.f32 %v2990_v54  ;;  %vm1904_vm9 = vmor %vm1902_vm8, %vm1903_vm5 }
 0x527   :  { %v1868_v42 = vpop.f32.mrf.mxu2  ;;  %v1881_v21 = vpop.f32.mrf.mxu3  ;;  %v1899_v36 = vsub.f32 1.0, %v1898_v40  ;;  %v4251_v6 = vadd.f32 1.0, %v2992_v7  ;;  %v1829_v40 = vadd.f32 %v1828_v3, %v4822_v12  ;;  %vm4265_vm7 = vmor %vm1917_vm6, %vm1918_vm4  ;;  %v4825_v12 = vld [vmem:[#allocation58_spill] sm:$0xff] }
 0x528   :  { %v1914_v17 = vsub.f32 1.0, %v1913_v25  ;;  %v1869_v39 = vadd.f32 %v1868_v42, %v4821_v33  ;;  %v1844_v38 = vpop.f32.mrf.mxu0  ;;  %v1857_v44 = vpop.f32.mrf.mxu1  ;;  %v1882_v33 = vadd.f32 %v1881_v21, %v4825_v12 }
 0x529   :  { %v1900_v32 = vmul.f32 %v2988_v41, %v1899_v36  ;;  %v1923_v36 = vand.u32 2147483648, %v4242_v53  ;;  %v1906_v44 = vand.u32 2147483647, %v4240_v56  ;;  %vm1932_vm6 = vweird.f32 %v4251_v6 }
 0x52a   :  { %v2723_v16 = vmul.f32 -1.442695, %v1869_v39  ;;  %v1915_v46 = vmul.f32 %v2990_v54, %v1914_v17  ;;  %v1908_v17 = vand.u32 2147483648, %v4240_v56 }
 0x52b   :  { %v2994_v45 = vpop.eup %2993  ;;  %v1901_v38 = vadd.f32 %v2988_v41, %v1900_v32  ;;  %vm1907_vm10 = vcmp.eq.f32.partialorder %v1906_v44, 8.507059e+37 }
 0x52c   :  { %2997 = vpow2.f32 %v2723_v16  ;;  %v2996_v57 = vpop.eup %2995  ;;  %v4253_v8 = vadd.f32 1.0, %v2994_v45  ;;  %v1916_v7 = vadd.f32 %v2990_v54, %v1915_v46  ;;  %v1921_v16 = vand.u32 2147483647, %v4242_v53 }
 0x52d   :  { %2999 = vrcp.f32 %v4251_v6  ;;  %v4257_v10 = vadd.f32 1.0, %v2996_v57  ;;  %v1905_v32 = vsel %vm1904_vm9, %v2988_v41, %v1901_v38 }
 0x52e   :  { %3001 = vrcp.f32 %v4253_v8  ;;  %v1920_v45 = vsel %vm4265_vm7, %v2990_v54, %v1916_v7  ;;  %vm1922_vm11 = vcmp.eq.f32.partialorder %v1921_v16, 8.507059e+37  ;;  %v1971_v3 = vand.u32 2147483648, %v4253_v8 }
 0x52f   :  { %v1870_v25 = vpop.f32.mrf.mxu2  ;;  %v1883_v42 = vpop.f32.mrf.mxu3  ;;  %3003 = vrcp.f32 %v4257_v10  ;;  %v1986_v16 = vand.u32 2147483648, %v4257_v10  ;;  %vm1965_vm14 = vweird.f32 %v4253_v8  ;;  %vm1980_vm15 = vweird.f32 %v4257_v10 }
 0x530   :  { %3005 = vtanh.f32 %v1829_v40  ;;  %v1924_v25 = vor.u32 1.1754944e-38, %v1923_v36  ;;  %v1909_v42 = vor.u32 1.1754944e-38, %v1908_v17 }
 0x532   :  { %v2998_v39 = vpop.eup %2997  ;;  %v1910_v53 = vsel %vm1907_vm10, %v1909_v42, %v1905_v32  ;;  %v1925_v40 = vsel %vm1922_vm11, %v1924_v25, %v1920_v45  ;;  %v1969_v45 = vand.u32 2147483647, %v4253_v8 }
 0x533   :  { %v4272_v46 = vadd.f32 1.0, %v2998_v39  ;;  %v4276_v57 = vpop.eup %2999  ;;  %v1943_v36 = vmul.f32 %v1925_v40, %v4153_v52 }
 0x534   :  { %v3002_v34 = vpop.eup %3001  ;;  %v1928_v54 = vmul.f32 %v4276_v57, %v4251_v6  ;;  %vm1970_vm2 = vcmp.eq.f32.partialorder %v1969_v45, 8.507059e+37  ;;  %vm1933_vm4 = vweird.f32 %v4276_v57 }
 0x535   :  { %3007 = vrcp.f32 %v4272_v46  ;;  %v3004_v56 = vpop.eup %3003  ;;  %v1961_v39 = vmul.f32 %v3002_v34, %v4253_v8  ;;  %vm1966_vm12 = vweird.f32 %v3002_v34  ;;  %vm1934_vm7 = vmor %vm1932_vm6, %vm1933_vm4  ;;  %vm1995_vm8 = vweird.f32 %v4272_v46 }
 0x536   :  { %v1976_v41 = vmul.f32 %v3004_v56, %v4257_v10  ;;  %v3006_v38 = vpop.eup %3005  ;;  %3009 = vtanh.f32 %v1882_v33  ;;  %vm1981_vm13 = vweird.f32 %v3004_v56  ;;  %v1929_v33 = vsub.f32 1.0, %v1928_v54  ;;  %vm1967_vm0 = vmor %vm1965_vm14, %vm1966_vm12 }
 0x537   :  { %v1962_v7 = vsub.f32 1.0, %v1961_v39  ;;  %v1944_v17 = vmul.f32 %v3006_v38, %v1910_v53  ;;  %v1984_v39 = vand.u32 2147483647, %v4257_v10  ;;  %v1972_v53 = vor.u32 1.1754944e-38, %v1971_v3  ;;  %vm1982_vm1 = vmor %vm1980_vm15, %vm1981_vm13 }
 0x538   :  { %v1977_v21 = vsub.f32 1.0, %v1976_v41  ;;  %v1987_v38 = vor.u32 1.1754944e-38, %v1986_v16  ;;  %v1930_v54 = vmul.f32 %v4276_v57, %v1929_v33 }
 0x539   :  { %v1963_v32 = vmul.f32 %v3002_v34, %v1962_v7  ;;  %vm1985_vm3 = vcmp.eq.f32.partialorder %v1984_v39, 8.507059e+37 }
 0x53a   :  { %v1978_v25 = vmul.f32 %v3004_v56, %v1977_v21  ;;  %v4292_v21 = vadd.f32 %v1944_v17, %v1943_v36  ;;  %v2001_v36 = vand.u32 2147483648, %v4272_v46 }
 0x53b   :  { %v3008_v44 = vpop.eup %3007  ;;  %v1964_v12 = vadd.f32 %v3002_v34, %v1963_v32 }
 0x53c   :  { %v1991_v42 = vmul.f32 %v3008_v44, %v4272_v46  ;;  %v1979_v40 = vadd.f32 %v3004_v56, %v1978_v25  ;;  %v3010_v41 = vpop.eup %3009  ;;  %3011 = vtanh.f32 %v4292_v21  ;;  %vm1996_vm5 = vweird.f32 %v3008_v44 }
 0x53d   :  { %v1968_v7 = vsel %vm1967_vm0, %v3002_v34, %v1964_v12  ;;  %v1931_v34 = vadd.f32 %v4276_v57, %v1930_v54  ;;  %vm1997_vm9 = vmor %vm1995_vm8, %vm1996_vm5  ;;  %v2002_v45 = vor.u32 1.1754944e-38, %v2001_v36 }
 0x53e   :  { %v1992_v52 = vsub.f32 1.0, %v1991_v42  ;;  %v1973_v28 = vsel %vm1970_vm2, %v1972_v53, %v1968_v7  ;;  %v1983_v20 = vsel %vm1982_vm1, %v3004_v56, %v1979_v40  ;;  %v1938_v56 = vand.u32 2147483648, %v4251_v6 }
 0x53f   :  { %v1988_v8 = vsel %vm1985_vm3, %v1987_v38, %v1983_v20  ;;  %v2007_v24 = vmul.f32 %v3010_v41, %v1973_v28  ;;  %v1935_v20 = vsel %vm1934_vm7, %v4276_v57, %v1931_v34 }
 0x540   :  { %v1993_v32 = vmul.f32 %v3008_v44, %v1992_v52  ;;  %v2006_v10 = vmul.f32 %v1988_v8, %v4158_v48  ;;  %v1936_v48 = vand.u32 2147483647, %v4251_v6  ;;  %v1939_v16 = vor.u32 1.1754944e-38, %v1938_v56 }
 0x542   :  { %v4298_v3 = vadd.f32 %v2007_v24, %v2006_v10  ;;  %v1994_v12 = vadd.f32 %v3008_v44, %v1993_v32  ;;  %v1999_v24 = vand.u32 2147483647, %v4272_v46  ;;  %v3012_v17 = vpop.eup %3011  ;;  %vm1937_vm10 = vcmp.eq.f32.partialorder %v1936_v48, 8.507059e+37  ;;  %v2724_v46 = vld [vmem:[%s4424_s0 + $0xe] sm:$0x3] }
 0x543   :  { %v1940_v42 = vsel %vm1937_vm10, %v1939_v16, %v1935_v20  ;;  %v4830_v32 = vld [vmem:[#allocation57_spill] sm:$0xff] }
 0x544   :  { %3013 = vtanh.f32 %v4298_v3  ;;  %v1998_v28 = vsel %vm1997_vm9, %v3008_v44, %v1994_v12  ;;  %vm2000_vm11 = vcmp.eq.f32.partialorder %v1999_v24, 8.507059e+37  ;;  %v1947_v33 = vmul.f32 %v3012_v17, %v1940_v42  ;;  %v4831_v17 = vld [vmem:[#allocation46_spill] sm:$0xff] }
 0x545   :  { %v2003_v39 = vsel %vm2000_vm11, %v2002_v45, %v1998_v28 }
 0x54a   :  { %v3014_v25 = vpop.eup %3013 }
 0x54b   :  { %v2010_v52 = vmul.f32 %v3014_v25, %v2003_v39 }
 0x54d   :  { %v2011_v53 = vadd.f32 %v2010_v52, %v1947_v33  ;;  %v2014_v57 = vadd.f32 %v2724_v46, %v2010_v52 }
 0x54f   :  { %v2015_v6 = vpack.c.bf16 %v2011_v53, %v2011_v53 }
 0x551   :  { %2024 = vmatmul.bf16.vlgmr.msrb.gmra.mxu0 %v2015_v6  ;;  %2037 = vmatmul.bf16.vlgmr.msrb.gmra.mxu1 %v2015_v6 }
 0x552   :  { %2050 = vmatmul.bf16.vlgmr.msrb.gmra.mxu2 %v2015_v6  ;;  %2063 = vmatmul.bf16.vlgmr.msrb.gmra.mxu3 %v2015_v6 }
 0x553   :  { %2249 = vmatpush.bf16.msrb.mxu0 %v3321_v51  ;;  %2262 = vmatpush.bf16.msrb.mxu1 %v3323_v59  ;;  %v2068_v51 = vpack.c.bf16 %v2014_v57, %v2014_v57 }
 0x554   :  { %2275 = vmatpush.bf16.msrb.mxu2 %v3326_v63  ;;  %2288 = vmatpush.bf16.msrb.mxu3 %v3328_v0 }
 0x557   :  { %2250 = vmatpush.bf16.msrb.mxu0 %v3333_v11  ;;  %2263 = vmatpush.bf16.msrb.mxu1 %v3335_v18  ;;  %v4826_v11 = vld [vmem:[#allocation44_spill] sm:$0xff] }
 0x558   :  { %2276 = vmatpush.bf16.msrb.mxu2 %v3337_v22  ;;  %2289 = vmatpush.bf16.msrb.mxu3 %v3340_v27 }
 0x55b   :  { %2251 = vmatpush.bf16.msrb.mxu0 %v3345_v35  ;;  %2264 = vmatpush.bf16.msrb.mxu1 %v3347_v47 }
 0x55c   :  { %2277 = vmatpush.bf16.msrb.mxu2 %v3349_v49  ;;  %2290 = vmatpush.bf16.msrb.mxu3 %v3352_v55 }
 0x55f   :  { %2252 = vmatpush.bf16.msrb.mxu0 %v3357_v62  ;;  %2265 = vmatpush.bf16.msrb.mxu1 %v3359_v13  ;;  %v4827_v62 = vld [vmem:[#allocation45_spill] sm:$0xff] }
 0x560   :  { %2278 = vmatpush.bf16.msrb.mxu2 %v3361_v14  ;;  %2291 = vmatpush.bf16.msrb.mxu3 %v4581_v5 }
 0x561   :  { %2077 = vmatmul.bf16.vlgmr.msra.gmra.mxu0 %v2068_v51  ;;  %2090 = vmatmul.bf16.vlgmr.msra.gmra.mxu1 %v2068_v51 }
 0x562   :  { %2103 = vmatmul.bf16.vlgmr.msra.gmra.mxu2 %v2068_v51  ;;  %2116 = vmatmul.bf16.vlgmr.msra.gmra.mxu3 %v2068_v51 }
 0x563   :  { %2253 = vmatpush.bf16.msrb.mxu0 %v4582_v4  ;;  %2266 = vmatpush.bf16.msrb.mxu1 %v4583_v15 }
 0x564   :  { %2279 = vmatpush.bf16.msrb.mxu2 %v4584_v26  ;;  %2292 = vmatpush.bf16.msrb.mxu3 %v4585_v30  ;;  %v4828_v26 = vld [vmem:[#allocation55_spill] sm:$0xff] }
 0x567   :  { %2254 = vmatpush.bf16.msrb.mxu0 %v4586_v2  ;;  %2267 = vmatpush.bf16.msrb.mxu1 %v4587_v61  ;;  %v4829_v2 = vld [vmem:[#allocation56_spill] sm:$0xff] }
 0x568   :  { %2280 = vmatpush.bf16.msrb.mxu2 %v4588_v58  ;;  %2293 = vmatpush.bf16.msrb.mxu3 %v4589_v50 }
 0x56b   :  { %2255 = vmatpush.bf16.msrb.mxu0 %v4590_v9  ;;  %2268 = vmatpush.bf16.msrb.mxu1 %v4591_v1 }
 0x56c   :  { %2281 = vmatpush.bf16.msrb.mxu2 %v4592_v19  ;;  %2294 = vmatpush.bf16.msrb.mxu3 %v3408_v31 }
 0x56f   :  { %2256 = vmatpush.bf16.msrb.mxu0 %v3413_v37  ;;  %2269 = vmatpush.bf16.msrb.mxu1 %v3418_v29 }
 0x570   :  { %2282 = vmatpush.bf16.msrb.mxu2 %v3420_v43  ;;  %2295 = vmatpush.bf16.msrb.mxu3 %v3423_v23 }
 0x5ce   :  { %v2025_v59 = vpop.f32.mrf.mxu0  ;;  %v2038_v63 = vpop.f32.mrf.mxu1 }
 0x5cf   :  { %v2026_v0 = vadd.f32 %v2025_v59, %v4816_v60  ;;  %v2039_v18 = vadd.f32 %v2038_v63, %v4826_v11 }
 0x5d1   :  { %v2725_v22 = vmul.f32 -1.442695, %v2026_v0  ;;  %v2726_v27 = vmul.f32 -1.442695, %v2039_v18 }
 0x5d3   :  { %3015 = vpow2.f32 %v2725_v22 }
 0x5d4   :  { %3017 = vpow2.f32 %v2726_v27 }
 0x5d5   :  { %v2051_v35 = vpop.f32.mrf.mxu2  ;;  %v2064_v47 = vpop.f32.mrf.mxu3 }
 0x5d6   :  { %v2027_v49 = vpop.f32.mrf.mxu0  ;;  %v2040_v55 = vpop.f32.mrf.mxu1  ;;  %v2052_v13 = vadd.f32 %v2051_v35, %v4827_v62  ;;  %v2065_v16 = vadd.f32 %v2064_v47, %v4831_v17  ;;  %v4834_v35 = vld [vmem:[#allocation58_spill] sm:$0xff] }
 0x5d8   :  { %v2727_v37 = vmul.f32 -1.442695, %v2052_v13 }
 0x5d9   :  { %v3016_v14 = vpop.eup %3015 }
 0x5da   :  { %v3018_v31 = vpop.eup %3017  ;;  %v4347_v29 = vadd.f32 1.0, %v3016_v14 }
 0x5db   :  { %v4349_v23 = vadd.f32 1.0, %v3018_v31 }
 0x5dc   :  { %3019 = vrcp.f32 %v4347_v29  ;;  %v2144_v53 = vand.u32 2147483648, %v4347_v29  ;;  %vm2138_vm0 = vweird.f32 %v4347_v29  ;;  %v2142_v57 = vand.u32 2147483647, %v4347_v29 }
 0x5dd   :  { %3021 = vrcp.f32 %v4349_v23  ;;  %v2053_v43 = vpop.f32.mrf.mxu2  ;;  %v2066_v5 = vpop.f32.mrf.mxu3  ;;  %vm2153_vm14 = vweird.f32 %v4349_v23  ;;  %v2159_v52 = vand.u32 2147483648, %v4349_v23  ;;  %v2157_v51 = vand.u32 2147483647, %v4349_v23 }
 0x5de   :  { %v2078_v4 = vpop.f32.mrf.mxu0  ;;  %v2091_v15 = vpop.f32.mrf.mxu1  ;;  %3023 = vpow2.f32 %v2727_v37  ;;  %v2145_v27 = vor.u32 1.1754944e-38, %v2144_v53  ;;  %vm2143_vm2 = vcmp.eq.f32.partialorder %v2142_v57, 8.507059e+37 }
 0x5df   :  { %v2079_v30 = vadd.f32 %v2078_v4, %v4828_v26  ;;  %v2092_v61 = vadd.f32 %v2091_v15, %v4829_v2  ;;  %v2160_v22 = vor.u32 1.1754944e-38, %v2159_v52  ;;  %vm2158_vm3 = vcmp.eq.f32.partialorder %v2157_v51, 8.507059e+37 }
 0x5e1   :  { %v2728_v58 = vmul.f32 -1.442695, %v2079_v30  ;;  %v2729_v9 = vmul.f32 -1.442695, %v2092_v61 }
 0x5e2   :  { %v3020_v50 = vpop.eup %3019 }
 0x5e3   :  { %v3022_v1 = vpop.eup %3021  ;;  %v2134_v19 = vmul.f32 %v3020_v50, %v4347_v29  ;;  %3025 = vpow2.f32 %v2728_v58  ;;  %vm2139_vm13 = vweird.f32 %v3020_v50 }
 0x5e4   :  { %v2149_v44 = vmul.f32 %v3022_v1, %v4349_v23  ;;  %v3024_v38 = vpop.eup %3023  ;;  %3027 = vpow2.f32 %v2729_v9  ;;  %vm2154_vm12 = vweird.f32 %v3022_v1  ;;  %vm2140_vm1 = vmor %vm2138_vm0, %vm2139_vm13 }
 0x5e5   :  { %v2104_v40 = vpop.f32.mrf.mxu2  ;;  %v2117_v41 = vpop.f32.mrf.mxu3  ;;  %v2135_v7 = vsub.f32 1.0, %v2134_v19  ;;  %v4358_v56 = vadd.f32 1.0, %v3024_v38  ;;  %vm4372_vm15 = vmor %vm2153_vm14, %vm2154_vm12 }
 0x5e6   :  { %v2150_v54 = vsub.f32 1.0, %v2149_v44  ;;  %v2105_v8 = vadd.f32 %v2104_v40, %v4830_v32  ;;  %v2080_v10 = vpop.f32.mrf.mxu0  ;;  %v2093_v34 = vpop.f32.mrf.mxu1  ;;  %v2118_v47 = vadd.f32 %v2117_v41, %v4834_v35  ;;  %v2376_v35 = vld [vmem:[#allocation7 + $0x60] sm:$0xff] }
 0x5e7   :  { %v2136_v48 = vmul.f32 %v3020_v50, %v2135_v7  ;;  %vm2168_vm14 = vweird.f32 %v4358_v56 }
 0x5e8   :  { %v2730_v12 = vmul.f32 -1.442695, %v2105_v8  ;;  %v2151_v36 = vmul.f32 %v3022_v1, %v2150_v54 }
 0x5e9   :  { %v3026_v24 = vpop.eup %3025  ;;  %v2137_v39 = vadd.f32 %v3020_v50, %v2136_v48 }
 0x5ea   :  { %3029 = vpow2.f32 %v2730_v12  ;;  %v3028_v20 = vpop.eup %3027  ;;  %v4360_v28 = vadd.f32 1.0, %v3026_v24  ;;  %v2152_v33 = vadd.f32 %v3022_v1, %v2151_v36 }
 0x5eb   :  { %3031 = vrcp.f32 %v4358_v56  ;;  %v4364_v45 = vadd.f32 1.0, %v3028_v20  ;;  %v2141_v63 = vsel %vm2140_vm1, %v3020_v50, %v2137_v39 }
 0x5ec   :  { %3033 = vrcp.f32 %v4360_v28  ;;  %v2156_v0 = vsel %vm4372_vm15, %v3022_v1, %v2152_v33  ;;  %v2146_v13 = vsel %vm2143_vm2, %v2145_v27, %v2141_v63  ;;  %v2207_v26 = vand.u32 2147483648, %v4360_v28  ;;  %v2377_v27 = vld [vmem:[#allocation7 + $0x68] sm:$0xff] }
 0x5ed   :  { %v2106_v25 = vpop.f32.mrf.mxu2  ;;  %v2119_v42 = vpop.f32.mrf.mxu3  ;;  %3035 = vrcp.f32 %v4364_v45  ;;  %v2161_v14 = vsel %vm2158_vm3, %v2160_v22, %v2156_v0  ;;  %v2222_v2 = vand.u32 2147483648, %v4364_v45  ;;  %v2205_v58 = vand.u32 2147483647, %v4360_v28 }
 0x5ee   :  { %3037 = vtanh.f32 %v2065_v16  ;;  %v2179_v5 = vmul.f32 %v2161_v14, %v4292_v21  ;;  %v2220_v1 = vand.u32 2147483647, %v4364_v45  ;;  %vm2201_vm6 = vweird.f32 %v4360_v28  ;;  %v2371_v14 = vld [vmem:[#allocation7 + $0x38] sm:$0xff] }
 0x5ef   :  { %vm2216_vm7 = vweird.f32 %v4364_v45  ;;  %v2208_v40 = vor.u32 1.1754944e-38, %v2207_v26  ;;  %v2223_v7 = vor.u32 1.1754944e-38, %v2222_v2  ;;  %vm2206_vm10 = vcmp.eq.f32.partialorder %v2205_v58, 8.507059e+37  ;;  %v2368_v26 = vld [vmem:[#allocation7 + $0x20] sm:$0xff]  ;;  %v2366_v2 = vld [vmem:[#allocation7 + $0x10] sm:$0xff] }
 0x5f0   :  { %v3030_v6 = vpop.eup %3029  ;;  %vm2221_vm11 = vcmp.eq.f32.partialorder %v2220_v1, 8.507059e+37  ;;  %v2172_v42 = vand.u32 2147483647, %v4358_v56  ;;  %v2365_v1 = vld [vmem:[#allocation7 + $0x8] sm:$0xff] }
 0x5f1   :  { %v4379_v59 = vadd.f32 1.0, %v3030_v6  ;;  %v4383_v18 = vpop.eup %3031 }
 0x5f2   :  { %v3034_v49 = vpop.eup %3033  ;;  %v2164_v37 = vmul.f32 %v4383_v18, %v4358_v56  ;;  %vm2169_vm12 = vweird.f32 %v4383_v18  ;;  %vm2173_vm2 = vcmp.eq.f32.partialorder %v2172_v42, 8.507059e+37 }
 0x5f3   :  { %3039 = vrcp.f32 %v4379_v59  ;;  %v3036_v55 = vpop.eup %3035  ;;  %v2197_v31 = vmul.f32 %v3034_v49, %v4360_v28  ;;  %vm2202_vm4 = vweird.f32 %v3034_v49  ;;  %v2237_v25 = vand.u32 2147483648, %v4379_v59  ;;  %vm2170_vm15 = vmor %vm2168_vm14, %vm2169_vm12 }
 0x5f4   :  { %v2212_v29 = vmul.f32 %v3036_v55, %v4364_v45  ;;  %v3038_v23 = vpop.eup %3037  ;;  %3041 = vtanh.f32 %v2118_v47  ;;  %vm2217_vm5 = vweird.f32 %v3036_v55  ;;  %v2165_v19 = vsub.f32 1.0, %v2164_v37  ;;  %vm2203_vm8 = vmor %vm2201_vm6, %vm2202_vm4  ;;  %v2375_v47 = vld [vmem:[#allocation7 + $0x58] sm:$0xff] }
 0x5f5   :  { %v2198_v43 = vsub.f32 1.0, %v2197_v31  ;;  %v2180_v4 = vmul.f32 %v3038_v23, %v2146_v13  ;;  %vm2218_vm9 = vmor %vm2216_vm7, %vm2217_vm5  ;;  %v2174_v45 = vand.u32 2147483648, %v4358_v56  ;;  %vm2231_vm0 = vweird.f32 %v4379_v59  ;;  %v2372_v13 = vld [vmem:[#allocation7 + $0x40] sm:$0xff]  ;;  %v2370_v23 = vld [vmem:[#allocation7 + $0x30] sm:$0xff] }
 0x5f6   :  { %v2213_v15 = vsub.f32 1.0, %v2212_v29  ;;  %v2166_v34 = vmul.f32 %v4383_v18, %v2165_v19  ;;  %v2238_v6 = vor.u32 1.1754944e-38, %v2237_v25  ;;  %v2364_v19 = vld [vmem:[#allocation7] sm:$0xff] }
 0x5f7   :  { %v2199_v61 = vmul.f32 %v3034_v49, %v2198_v43  ;;  %v4399_v32 = vadd.f32 %v2180_v4, %v2179_v5  ;;  %v2175_v53 = vor.u32 1.1754944e-38, %v2174_v45  ;;  %v2369_v5 = vld [vmem:[#allocation7 + $0x28] sm:$0xff] }
 0x5f8   :  { %v2214_v50 = vmul.f32 %v3036_v55, %v2213_v15  ;;  %v2167_v28 = vadd.f32 %v4383_v18, %v2166_v34 }
 0x5f9   :  { %v3040_v30 = vpop.eup %3039  ;;  %v2200_v44 = vadd.f32 %v3034_v49, %v2199_v61  ;;  %3043 = vtanh.f32 %v4399_v32 }
 0x5fa   :  { %v2227_v9 = vmul.f32 %v3040_v30, %v4379_v59  ;;  %v2215_v41 = vadd.f32 %v3036_v55, %v2214_v50  ;;  %v3042_v38 = vpop.eup %3041  ;;  %vm2232_vm13 = vweird.f32 %v3040_v30  ;;  %v2171_v39 = vsel %vm2170_vm15, %v4383_v18, %v2167_v28  ;;  %v2378_v18 = vld [vmem:[#allocation7 + $0x70] sm:$0xff] }
 0x5fb   :  { %v2204_v54 = vsel %vm2203_vm8, %v3034_v49, %v2200_v44  ;;  %vm2233_vm1 = vmor %vm2231_vm0, %vm2232_vm13  ;;  %v2176_v57 = vsel %vm2173_vm2, %v2175_v53, %v2171_v39  ;;  %v2374_v49 = vld [vmem:[#allocation7 + $0x50] sm:$0xff] }
 0x5fc   :  { %v2228_v21 = vsub.f32 1.0, %v2227_v9  ;;  %v2209_v8 = vsel %vm2206_vm10, %v2208_v40, %v2204_v54  ;;  %v2219_v10 = vsel %vm2218_vm9, %v3036_v55, %v2215_v41  ;;  %v2373_v55 = vld [vmem:[#allocation7 + $0x48] sm:$0xff] }
 0x5fd   :  { %v2224_v36 = vsel %vm2221_vm11, %v2223_v7, %v2219_v10  ;;  %v2243_v48 = vmul.f32 %v3042_v38, %v2209_v8 }
 0x5fe   :  { %v2229_v12 = vmul.f32 %v3040_v30, %v2228_v21  ;;  %v2242_v24 = vmul.f32 %v2224_v36, %v4298_v3  ;;  %v2235_v3 = vand.u32 2147483647, %v4379_v59  ;;  %v2379_v59 = vld [vmem:[#allocation7 + $0x78] sm:$0xff] }
 0x5ff   :  { %v3044_v52 = vpop.eup %3043  ;;  %2384 = vmatpush.msra.mxu0 %v2379_v59 }
 0x600   :  { %v2244_v20 = vadd.f32 %v2243_v48, %v2242_v24  ;;  %v2230_v16 = vadd.f32 %v3040_v30, %v2229_v12  ;;  %vm2236_vm3 = vcmp.eq.f32.partialorder %v2235_v3, 8.507059e+37  ;;  %v2183_v63 = vmul.f32 %v3044_v52, %v2176_v57 }
 0x601   :  { %2385 = vmatpush.msra.mxu0 %v2378_v18 }
 0x602   :  { %3045 = vtanh.f32 %v2244_v20  ;;  %v2234_v33 = vsel %vm2233_vm1, %v3040_v30, %v2230_v16  ;;  %v2367_v30 = vld [vmem:[#allocation7 + $0x18] sm:$0xff] }
 0x603   :  { %v2239_v51 = vsel %vm2236_vm3, %v2238_v6, %v2234_v33  ;;  %2386 = vmatpush.msra.mxu0 %v2377_v27 }
 0x605   :  { %2387 = vmatpush.msra.mxu0 %v2376_v35 }
 0x607   :  { %2388 = vmatpush.msra.mxu0 %v2375_v47 }
 0x608   :  { %v3046_v46 = vpop.eup %3045 }
 0x609   :  { %v2246_v0 = vmul.f32 %v3046_v46, %v2239_v51  ;;  %2389 = vmatpush.msra.mxu0 %v2374_v49 }
 0x60b   :  { %v2247_v22 = vadd.f32 %v2246_v0, %v2183_v63  ;;  %2390 = vmatpush.msra.mxu0 %v2373_v55 }
 0x60d   :  { %v2248_v56 = vpack.c.bf16 %v2247_v22, %v2247_v22  ;;  %2391 = vmatpush.msra.mxu0 %v2372_v13 }
 0x60f   :  { %2257 = vmatmul.bf16.vlgmr.msrb.gmra.mxu0 %v2248_v56  ;;  %2270 = vmatmul.bf16.vlgmr.msrb.gmra.mxu1 %v2248_v56 }
 0x610   :  { %2283 = vmatmul.bf16.vlgmr.msrb.gmra.mxu2 %v2248_v56  ;;  %2296 = vmatmul.bf16.vlgmr.msrb.gmra.mxu3 %v2248_v56 }
 0x611   :  { %2392 = vmatpush.msra.mxu0 %v2371_v14 }
 0x613   :  { %2393 = vmatpush.msra.mxu0 %v2370_v23 }
 0x615   :  { %2394 = vmatpush.msra.mxu0 %v2369_v5 }
 0x617   :  { %2395 = vmatpush.msra.mxu0 %v2368_v26 }
 0x619   :  { %2396 = vmatpush.msra.mxu0 %v2367_v30 }
 0x61b   :  { %2397 = vmatpush.msra.mxu0 %v2366_v2 }
 0x61d   :  { %2398 = vmatpush.msra.mxu0 %v2365_v1 }
 0x61f   :  { %2399 = vmatpush.msra.mxu0 %v2364_v19 }
 0x68c   :  { %v2258_v31 = vpop.f32.mrf.mxu0  ;;  %v2271_v29 = vpop.f32.mrf.mxu1 }
 0x68d   :  { %v2259_v37 = vadd.f32 %v2258_v31, %v4816_v60  ;;  %v2272_v43 = vadd.f32 %v2271_v29, %v4826_v11  ;;  %v2806_v29 = vld [vmem:[%s4430_s6] ss:$0 sm:$0xff] }
 0x68f   :  { %v2731_v4 = vmul.f32 -1.442695, %v2259_v37  ;;  %v2732_v15 = vmul.f32 -1.442695, %v2272_v43 }
 0x691   :  { %3047 = vpow2.f32 %v2731_v4 }
 0x692   :  { %3049 = vpow2.f32 %v2732_v15 }
 0x693   :  { %v2284_v61 = vpop.f32.mrf.mxu2  ;;  %v2297_v58 = vpop.f32.mrf.mxu3 }
 0x694   :  { %v2285_v50 = vadd.f32 %v2284_v61, %v4827_v62  ;;  %v2260_v9 = vpop.f32.mrf.mxu0  ;;  %v2273_v60 = vpop.f32.mrf.mxu1  ;;  %v2298_v10 = vadd.f32 %v2297_v58, %v4831_v17 }
 0x696   :  { %v2733_v11 = vmul.f32 -1.442695, %v2285_v50 }
 0x697   :  { %v3048_v44 = vpop.eup %3047 }
 0x698   :  { %v3050_v21 = vpop.eup %3049  ;;  %v2310_v40 = vadd.f32 1.0, %v3048_v44  ;;  %3051 = vpow2.f32 %v2733_v11 }
 0x699   :  { %v2311_v41 = vadd.f32 1.0, %v3050_v21 }
 0x69a   :  { %3053 = vrcp.f32 %v2310_v40  ;;  %v2324_v20 = vand.u32 2147483648, %v2310_v40  ;;  %v2322_v45 = vand.u32 2147483647, %v2310_v40  ;;  %vm2318_vm6 = vweird.f32 %v2310_v40 }
 0x69b   :  { %3055 = vrcp.f32 %v2311_v41  ;;  %v2286_v38 = vpop.f32.mrf.mxu2  ;;  %v2299_v7 = vpop.f32.mrf.mxu3  ;;  %v2339_v28 = vand.u32 2147483648, %v2311_v41  ;;  %v2337_v42 = vand.u32 2147483647, %v2311_v41  ;;  %vm2333_vm7 = vweird.f32 %v2311_v41 }
 0x69c   :  { %v2325_v33 = vor.u32 1.1754944e-38, %v2324_v20  ;;  %vm2323_vm10 = vcmp.eq.f32.partialorder %v2322_v45, 8.507059e+37 }
 0x69d   :  { %v2340_v53 = vor.u32 1.1754944e-38, %v2339_v28  ;;  %vm2338_vm11 = vcmp.eq.f32.partialorder %v2337_v42, 8.507059e+37 }
 0x69e   :  { %v3052_v54 = vpop.eup %3051 }
 0x69f   :  { %v2312_v8 = vadd.f32 1.0, %v3052_v54 }
 0x6a0   :  { %v3054_v62 = vpop.eup %3053 }
 0x6a1   :  { %v3056_v34 = vpop.eup %3055  ;;  %v2314_v12 = vmul.f32 %v3054_v62, %v2310_v40  ;;  %3057 = vrcp.f32 %v2312_v8  ;;  %vm2319_vm4 = vweird.f32 %v3054_v62  ;;  %v2354_v35 = vand.u32 2147483648, %v2312_v8 }
 0x6a2   :  { %v2329_v36 = vmul.f32 %v3056_v34, %v2311_v41  ;;  %3059 = vtanh.f32 %v2298_v10  ;;  %vm2334_vm5 = vweird.f32 %v3056_v34  ;;  %vm2320_vm8 = vmor %vm2318_vm6, %vm2319_vm4  ;;  %vm2348_vm13 = vweird.f32 %v2312_v8 }
 0x6a3   :  { %v2315_v48 = vsub.f32 1.0, %v2314_v12  ;;  %vm2335_vm9 = vmor %vm2333_vm7, %vm2334_vm5  ;;  %v2352_v47 = vand.u32 2147483647, %v2312_v8  ;;  %v2355_v55 = vor.u32 1.1754944e-38, %v2354_v35 }
 0x6a4   :  { %v2330_v24 = vsub.f32 1.0, %v2329_v36 }
 0x6a5   :  { %v2316_v16 = vmul.f32 %v3054_v62, %v2315_v48  ;;  %vm2353_vm15 = vcmp.eq.f32.partialorder %v2352_v47, 8.507059e+37 }
 0x6a6   :  { %v2331_v25 = vmul.f32 %v3056_v34, %v2330_v24 }
 0x6a7   :  { %v3058_v3 = vpop.eup %3057  ;;  %v2317_v39 = vadd.f32 %v3054_v62, %v2316_v16 }
 0x6a8   :  { %v2344_v17 = vmul.f32 %v3058_v3, %v2312_v8  ;;  %v2332_v52 = vadd.f32 %v3056_v34, %v2331_v25  ;;  %v3060_v46 = vpop.eup %3059  ;;  %vm2349_vm12 = vweird.f32 %v3058_v3 }
 0x6a9   :  { %v2321_v6 = vsel %vm2320_vm8, %v3054_v62, %v2317_v39  ;;  %vm2350_vm14 = vmor %vm2348_vm13, %vm2349_vm12 }
 0x6aa   :  { %v2345_v57 = vsub.f32 1.0, %v2344_v17  ;;  %v2326_v51 = vsel %vm2323_vm10, %v2325_v33, %v2321_v6  ;;  %v2336_v63 = vsel %vm2335_vm9, %v3056_v34, %v2332_v52 }
 0x6ab   :  { %v2341_v0 = vsel %vm2338_vm11, %v2340_v53, %v2336_v63  ;;  %v2360_v22 = vmul.f32 %v3060_v46, %v2326_v51 }
 0x6ac   :  { %v2346_v56 = vmul.f32 %v3058_v3, %v2345_v57  ;;  %v2359_v59 = vmul.f32 %v2341_v0, %v4399_v32 }
 0x6ae   :  { %v2361_v18 = vadd.f32 %v2360_v22, %v2359_v59  ;;  %v2347_v27 = vadd.f32 %v3058_v3, %v2346_v56 }
 0x6b0   :  { %3061 = vtanh.f32 %v2361_v18  ;;  %v2351_v49 = vsel %vm2350_vm14, %v3058_v3, %v2347_v27 }
 0x6b1   :  { %v2356_v14 = vsel %vm2353_vm15, %v2355_v55, %v2351_v49 }
 0x6b6   :  { %v3062_v13 = vpop.eup %3061 }
 0x6b7   :  { %v2363_v31 = vmul.f32 %v3062_v13, %v2356_v14 }
 0x6b9   :  { %2400 = vmatmul.f32.vlgmr.msra.gmra.mxu0 %v2363_v31 }
 0x736   :  { %v2401_v32 = vpop.f32.mrf.mxu0 }
 0x737   :  { %v2402_v23 = vadd.f32 %v2806_v29, %v2401_v32 }
 0x739   :  { %2404 = vst [vmem:[#allocation8] sm:$0x3] %v2402_v23 }
 0x73a   :  { %2415 = dma.vmem_to_hbm [thread:$0]  %s2411_s14, 32, %s2413_s16, [#allocation4]  }
 0x73b   :  { %3163 = dma.done.wait [#allocation4], 32  }
 0x73c   :  { %3164 = vsyncadd [#allocation4], 4294967264 }
 0x73d   :  { %2420 = vsyncpa [#allocation3], 1 }
 0x73e   :  { %2421 = vsyncpa [#allocation6], 1 }
 0x73f   :  { %2422 = vsyncpa [#allocation4], 1 }

</bundles_post_ra>
